<compile_context>
chip_gen: v7x
topology: tpu7x:2x2x1
jax: 0.10.0
libtpu: 0.0.40
codegen_flags: <defaults>
</compile_context>

<pallas_src>
import math
from functools import partial

import jax
import jax.numpy as jnp
from jax.experimental import pallas as pl
from jax.experimental.pallas import tpu as pltpu


# ----------------------------------------------------------------------------- dims
FEAT = dict(trans=3, dist=0, size=3, rot=2, cat=23, objfeat=32,
            edge_cat=11, edge_dis=3, edge_angle=2, edge_angle_cls=4, edge_par=3)
X_DIM = E_DIM = Y_DIM = 32
Y_IN = 8
Y_OUT = 8
BBOX_DIM = FEAT['trans'] + FEAT['dist'] + FEAT['size'] + FEAT['rot']           # 8
X_IN = BBOX_DIM + FEAT['cat'] + FEAT['objfeat']                                # 63
E_IN = (FEAT['edge_cat'] + FEAT['edge_dis'] + FEAT['edge_angle']
        + FEAT['edge_angle_cls'] + FEAT['edge_par'])                           # 23

# Fused path layer schedule: enc L1 (GELU), enc L2 (GELU), enc L3,
#                            init-Linear (+mask), dec L1 (GELU), dec L2 (GELU), dec L3 (+mask)
PATH_ACTS = (True, True, False, False, True, True, False)
PATH_MASK = (False, False, False, True, False, False, True)
Y_ACTS = (True, True, True, False)

# Set to jnp.bfloat16 for the fast MXU path on v6e/v7x (halves weight/act traffic;
# slight numeric drift vs. the f32 PyTorch reference). Default f32 for exact semantics.
COMPUTE_DTYPE = jnp.float32


# ----------------------------------------------------------------------------- kernel
def _gelu_exact(x):
    # PyTorch nn.GELU() default: exact erf-based GELU.
    return 0.5 * x * (1.0 + jax.lax.erf(x * (1.0 / math.sqrt(2.0))))


def _fused_path_kernel(acts, mask_after, *refs):
    """Fused 7-layer stacked MLP on a (tm, Din) row tile.

    refs = x_ref, mask_ref, W_0..W_{L-1}, bias_stack_ref, out_ref
    Layer i: h = h @ W_i + bias_stack[i, :dout_i]; optional GELU; optional row-mask.
    Single lane-dense store of the concatenated decoder output.
    """
    n_layers = len(acts)
    x_ref = refs[0]
    m_ref = refs[1]
    w_refs = refs[2:2 + n_layers]
    b_ref = refs[2 + n_layers]
    o_ref = refs[3 + n_layers]

    h = x_ref[...]
    mask = m_ref[...]                       # (tm, 1)
    b_all = b_ref[...]                      # (L, max_dout), zero-padded
    for i in range(n_layers):
        w = w_refs[i][...]
        dout = w.shape[1]
        b = b_all[i:i + 1, :dout]           # (1, dout)
        if COMPUTE_DTYPE != jnp.float32:
            h = jnp.dot(h.astype(COMPUTE_DTYPE), w,
                        preferred_element_type=jnp.float32) + b
        else:
            h = jnp.dot(h, w, preferred_element_type=jnp.float32) + b
        if acts[i]:
            h = _gelu_exact(h)
        if mask_after[i]:
            h = h * mask
    o_ref[...] = h.astype(o_ref.dtype)


def _row_tile(M, target_tm, min_split=512):
    """Single full-slab tile for small row counts (no per-step overhead on v5e/v6e,
    and splitting tiny work across v7x TCs buys nothing). For large slabs, return a
    sublane-aligned tile <= target_tm giving >= 2 'parallel' grid steps."""
    if M <= min_split:
        return M                                           # full-dim block (always legal)
    return min(target_tm, ((((M + 1) // 2) + 7) // 8) * 8)  # multiple of 8


def fused_path(x2d, mask2d, Ws, b_stack, acts, mask_after, target_tm=1024):
    """One pallas_call running the fused encoder->init->decoder stack on a 2-D row slab.
    No padding / slicing copies: partial last block handled by Pallas (OOB writes dropped)."""
    M, Din = x2d.shape
    Dout = Ws[-1].shape[1]
    tm = _row_tile(M, target_tm)
    grid = (pl.cdiv(M, tm),)

    in_specs = [pl.BlockSpec((tm, Din), lambda i: (i, 0)),
                pl.BlockSpec((tm, 1), lambda i: (i, 0))]
    args = [x2d, mask2d]
    for W in Ws:
        din, dout = W.shape
        in_specs.append(pl.BlockSpec((din, dout), lambda i: (0, 0)))  # weight resident
        args.append(W)
    in_specs.append(pl.BlockSpec(b_stack.shape, lambda i: (0, 0)))
    args.append(b_stack)

    return pl.pallas_call(
        partial(_fused_path_kernel, tuple(acts), tuple(mask_after)),
        out_shape=jax.ShapeDtypeStruct((M, Dout), x2d.dtype),
        grid=grid,
        in_specs=in_specs,
        out_specs=pl.BlockSpec((tm, Dout), lambda i: (i, 0)),
        compiler_params=pltpu.CompilerParams(dimension_semantics=("parallel",)),
    )(*args)


# ----------------------------------------------------------------------------- params
def _init_linear(key, din, dout):
    kw, kb = jax.random.split(key)
    W = jax.random.normal(kw, (din, dout), jnp.float32) * 0.02
    b = jax.random.normal(kb, (dout,), jnp.float32) * 0.02
    return (W, b)


def _init_encoder(key, din, h):
    k1, k2, k3 = jax.random.split(key, 3)
    return [_init_linear(k1, din, h), _init_linear(k2, h, 2 * h), _init_linear(k3, 2 * h, h)]


def _init_decoder(key, h, dout):
    k1, k2, k3 = jax.random.split(key, 3)
    return [_init_linear(k1, h, 2 * h), _init_linear(k2, 2 * h, h), _init_linear(k3, h, dout)]


def init_params(key):
    ks = iter(jax.random.split(key, 32))
    p = {}
    # node encoders / decoders
    p['bbox_trans_enc'] = _init_encoder(next(ks), FEAT['trans'] + FEAT['dist'], X_DIM)
    p['bbox_size_enc'] = _init_encoder(next(ks), FEAT['size'], X_DIM)
    p['bbox_rot_enc'] = _init_encoder(next(ks), FEAT['rot'], X_DIM)
    p['class_enc'] = _init_encoder(next(ks), FEAT['cat'], X_DIM)
    p['objfeat_enc'] = _init_encoder(next(ks), FEAT['objfeat'], X_DIM)
    p['bbox_trans_dec'] = _init_decoder(next(ks), X_DIM, FEAT['trans'] + FEAT['dist'])
    p['bbox_size_dec'] = _init_decoder(next(ks), X_DIM, FEAT['size'])
    p['bbox_rot_dec'] = _init_decoder(next(ks), X_DIM, FEAT['rot'])
    p['class_dec'] = _init_decoder(next(ks), X_DIM, FEAT['cat'])
    p['objfeat_dec'] = _init_decoder(next(ks), X_DIM, FEAT['objfeat'])
    p['init_node'] = _init_linear(next(ks), X_DIM, X_DIM)
    # edge encoders / decoders
    p['edge_cat_enc'] = _init_encoder(next(ks), FEAT['edge_cat'], E_DIM)
    p['edge_attr_1_enc'] = _init_encoder(next(ks), FEAT['edge_dis'], E_DIM)
    p['edge_attr_2_enc'] = _init_encoder(next(ks), FEAT['edge_angle'], E_DIM)
    p['edge_attr_3_enc'] = _init_encoder(next(ks), FEAT['edge_angle_cls'], E_DIM)
    p['edge_attr_4_enc'] = _init_encoder(next(ks), FEAT['edge_par'], E_DIM)
    p['edge_cat_dec'] = _init_decoder(next(ks), E_DIM, FEAT['edge_cat'])
    p['edge_attr_1_dec'] = _init_decoder(next(ks), E_DIM, FEAT['edge_dis'])
    p['edge_attr_2_dec'] = _init_decoder(next(ks), E_DIM, FEAT['edge_angle'])
    p['edge_attr_3_dec'] = _init_decoder(next(ks), E_DIM, FEAT['edge_angle_cls'])
    p['edge_attr_4_dec'] = _init_decoder(next(ks), E_DIM, FEAT['edge_par'])
    p['init_edge'] = _init_linear(next(ks), E_DIM, E_DIM)
    # y MLPs
    p['mlp_in_y'] = [_init_linear(next(ks), Y_IN, Y_DIM), _init_linear(next(ks), Y_DIM, Y_DIM)]
    p['mlp_out_y'] = [_init_linear(next(ks), Y_DIM, Y_DIM), _init_linear(next(ks), Y_DIM, Y_OUT)]
    # time MLP (dead code with n_layers=0; kept only for parameter parity)
    p['time_mlp'] = [_init_linear(next(ks), X_DIM, X_DIM * 4),
                     _init_linear(next(ks), X_DIM * 4, X_DIM * 4)]
    return p


# --------------------------------------------------------------- fused (stacked) weights
def _block_diag(mats):
    rows = sum(m.shape[0] for m in mats)
    cols = sum(m.shape[1] for m in mats)
    out = jnp.zeros((rows, cols), mats[0].dtype)
    r = c = 0
    for m in mats:
        out = out.at[r:r + m.shape[0], c:c + m.shape[1]].set(m)
        r += m.shape[0]
        c += m.shape[1]
    return out


def _fuse_path_params(enc_list, init_lin, dec_list, dtype=jnp.float32):
    """Build the 7 stacked weights + packed bias array for one fused enc->init->dec path."""
    Ws, bs = [], []
    # encoder L1..L3: block-diag over heads (disjoint input slices)
    for li in range(3):
        Ws.append(_block_diag([e[li][0] for e in enc_list]).astype(dtype))
        bs.append(jnp.concatenate([e[li][1] for e in enc_list]))
    # init Linear applied to the sum of head outputs -> vstack folds the sum
    Wi, bi = init_lin
    Ws.append(jnp.concatenate([Wi] * len(enc_list), axis=0).astype(dtype))
    bs.append(bi)
    # decoder L1: all heads share the same input -> hstack; L2/L3 block-diag
    Ws.append(jnp.concatenate([d[0][0] for d in dec_list], axis=1).astype(dtype))
    bs.append(jnp.concatenate([d[0][1] for d in dec_list]))
    for li in (1, 2):
        Ws.append(_block_diag([d[li][0] for d in dec_list]).astype(dtype))
        bs.append(jnp.concatenate([d[li][1] for d in dec_list]))
    # pack all biases into one (L, max_dout) operand (zero-padded rows)
    width = max(b.shape[0] for b in bs)
    b_stack = jnp.zeros((len(bs), width), jnp.float32)
    for i, b in enumerate(bs):
        b_stack = b_stack.at[i, :b.shape[0]].set(b.astype(jnp.float32))
    return Ws, b_stack


def fuse_params(p, dtype=jnp.float32):
    f = {}
    f['node_Ws'], f['node_b'] = _fuse_path_params(
        [p['bbox_trans_enc'], p['bbox_size_enc'], p['bbox_rot_enc'],
         p['class_enc'], p['objfeat_enc']],
        p['init_node'],
        [p['bbox_trans_dec'], p['bbox_size_dec'], p['bbox_rot_dec'],
         p['class_dec'], p['objfeat_dec']],
        dtype=dtype)
    f['edge_Ws'], f['edge_b'] = _fuse_path_params(
        [p['edge_cat_enc'], p['edge_attr_1_enc'], p['edge_attr_2_enc'],
         p['edge_attr_3_enc'], p['edge_attr_4_enc']],
        p['init_edge'],
        [p['edge_cat_dec'], p['edge_attr_1_dec'], p['edge_attr_2_dec'],
         p['edge_attr_3_dec'], p['edge_attr_4_dec']],
        dtype=dtype)
    # y path: mlp_in_y (Lin,GELU,Lin,GELU) -> identity gnn -> mlp_out_y (Lin,GELU,Lin)
    f['y_layers'] = [p['mlp_in_y'][0], p['mlp_in_y'][1],
                     p['mlp_out_y'][0], p['mlp_out_y'][1]]
    return f


# ----------------------------------------------------------------------------- forward
def scene_graph_transformer_forward(fused, X, E, y, t, node_mask):
    bs, n, _ = X.shape
    node_mask = node_mask.astype(X.dtype)

    Xf = X.reshape(bs * n, X_IN)
    Ef = E.reshape(bs * n * n, E_IN)
    node_mask_rows = node_mask.reshape(bs * n, 1)
    edge_mask_rows = (node_mask[:, :, None] * node_mask[:, None, :]).reshape(bs * n * n, 1)

    # ---- node path: encoders + sum + init_node + mask + decoders + mask (1 call) ----
    out_X = fused_path(Xf, node_mask_rows, fused['node_Ws'], fused['node_b'],
                       PATH_ACTS, PATH_MASK, target_tm=1024).reshape(bs, n, X_IN)

    # ---- edge path: same fused stack over the (bs*n*n) edge rows (1 call) ----
    out_E = fused_path(Ef, edge_mask_rows, fused['edge_Ws'], fused['edge_b'],
                       PATH_ACTS, PATH_MASK, target_tm=2048).reshape(bs, n, n, E_IN)

    # ---- y path (bs rows): plain XLA dots, fused for free, no kernel launch ----
    h = y
    for i, (W, b) in enumerate(fused['y_layers']):
        h = h @ W + b
        if Y_ACTS[i]:
            h = _gelu_exact(h)
    out_y = h

    # TODO(synk): with n_layers=0 the gnn loop is identity and t / time_mlp are dead;
    #             they are skipped with no effect on outputs.
    return {"X": out_X, "E": out_E, "y": out_y}


# ----------------------------------------------------------------------------- main
if __name__ == "__main__":
    key = jax.random.PRNGKey(0)
    kp, kx, ke, ky, kt = jax.random.split(key, 5)

    params = init_params(kp)
    fused = fuse_params(params, dtype=COMPUTE_DTYPE)

    bs, n = 2, 8
    X = jax.random.normal(kx, (bs, n, X_IN), jnp.float32)
    E = jax.random.normal(ke, (bs, n, n, E_IN), jnp.float32)
    y = jax.random.normal(ky, (bs, Y_IN), jnp.float32)
    t = jax.random.uniform(kt, (bs, 1), jnp.float32)
    node_mask = jnp.array([[1, 1, 1, 1, 1, 1, 0, 0],
                           [1, 1, 1, 1, 1, 1, 1, 1]], jnp.float32)

    fwd = jax.jit(scene_graph_transformer_forward)
    out = fwd(fused, X, E, y, t, node_mask)
    out = jax.tree_util.tree_map(jax.block_until_ready, out)

    assert out["X"].shape == (bs, n, X_IN)
    assert out["E"].shape == (bs, n, n, E_IN)
    assert out["y"].shape == (bs, Y_OUT)
    assert all(bool(jnp.isfinite(v).all()) for v in out.values())
    # masked rows must be zero (node_mask[0, 6:] == 0)
    assert bool(jnp.all(out["X"][0, 6:] == 0.0))
    assert bool(jnp.all(out["E"][0, :, 6:] == 0.0)) and bool(jnp.all(out["E"][0, 6:, :] == 0.0))

    print("KERNEL_OK")
</pallas_src>

<mosaic_0001>
module attributes {stable_mosaic.version = 11 : i64} {
  func.func @_fused_path_kernel(%arg0: i32, %arg1: memref<128x23xf32, #tpu.memory_space<vmem>>, %arg2: memref<128x1xf32, #tpu.memory_space<vmem>>, %arg3: memref<23x160xf32, #tpu.memory_space<vmem>>, %arg4: memref<160x320xf32, #tpu.memory_space<vmem>>, %arg5: memref<320x160xf32, #tpu.memory_space<vmem>>, %arg6: memref<160x32xf32, #tpu.memory_space<vmem>>, %arg7: memref<32x320xf32, #tpu.memory_space<vmem>>, %arg8: memref<320x160xf32, #tpu.memory_space<vmem>>, %arg9: memref<160x23xf32, #tpu.memory_space<vmem>>, %arg10: memref<7x320xf32, #tpu.memory_space<vmem>>, %arg11: memref<128x23xf32, #tpu.memory_space<vmem>>) attributes {dimension_semantics = [#tpu.dimension_semantics<parallel>], iteration_bounds = array<i64: 1>, scalar_prefetch = 0 : i64, scratch_operands = 0 : i64, tpu.core_type = #tpu.core_type<tc>, window_params = [{transform_indices = @transform_0, window_bounds = array<i64: 128, 23>}, {transform_indices = @transform_1, window_bounds = array<i64: 128, 1>}, {pipeline_mode = #tpu.pipeline_mode<synchronous>, transform_indices = @transform_2, window_bounds = array<i64: 23, 160>}, {pipeline_mode = #tpu.pipeline_mode<synchronous>, transform_indices = @transform_3, window_bounds = array<i64: 160, 320>}, {pipeline_mode = #tpu.pipeline_mode<synchronous>, transform_indices = @transform_4, window_bounds = array<i64: 320, 160>}, {pipeline_mode = #tpu.pipeline_mode<synchronous>, transform_indices = @transform_5, window_bounds = array<i64: 160, 32>}, {pipeline_mode = #tpu.pipeline_mode<synchronous>, transform_indices = @transform_6, window_bounds = array<i64: 32, 320>}, {pipeline_mode = #tpu.pipeline_mode<synchronous>, transform_indices = @transform_7, window_bounds = array<i64: 320, 160>}, {pipeline_mode = #tpu.pipeline_mode<synchronous>, transform_indices = @transform_8, window_bounds = array<i64: 160, 23>}, {pipeline_mode = #tpu.pipeline_mode<synchronous>, transform_indices = @transform_9, window_bounds = array<i64: 7, 320>}, {transform_indices = @transform_10, window_bounds = array<i64: 128, 23>}]} {
    %c0 = arith.constant 0 : index
    %c0_0 = arith.constant 0 : index
    %0 = vector.load %arg1[%c0, %c0_0] : memref<128x23xf32, #tpu.memory_space<vmem>>, vector<128x23xf32>
    %c0_1 = arith.constant 0 : index
    %c0_2 = arith.constant 0 : index
    %1 = vector.load %arg2[%c0_1, %c0_2] : memref<128x1xf32, #tpu.memory_space<vmem>>, vector<128x1xf32>
    %c0_3 = arith.constant 0 : index
    %c0_4 = arith.constant 0 : index
    %2 = vector.load %arg10[%c0_3, %c0_4] : memref<7x320xf32, #tpu.memory_space<vmem>>, vector<7x320xf32>
    %c0_5 = arith.constant 0 : index
    %c0_6 = arith.constant 0 : index
    %3 = vector.load %arg3[%c0_5, %c0_6] : memref<23x160xf32, #tpu.memory_space<vmem>>, vector<23x160xf32>
    %4 = vector.extract_strided_slice %2 {offsets = [0, 0], sizes = [1, 160], strides = [1, 1]} : vector<7x320xf32> to vector<1x160xf32>
    %cst = arith.constant dense<0.000000e+00> : vector<128x160xf32>
    %5 = tpu.matmul %0, %3, %cst {dimension_numbers = #tpu.dot_dimension_numbers<[1], [0], [0], [1], [0, 0, 1, 1], [], []>} : vector<128x23xf32>, vector<23x160xf32>, vector<128x160xf32> -> vector<128x160xf32>
    %6 = vector.broadcast %4 : vector<1x160xf32> to vector<128x160xf32>
    %7 = arith.addf %5, %6 : vector<128x160xf32>
    %cst_7 = arith.constant 5.000000e-01 : f32
    %8 = vector.broadcast %cst_7 : f32 to vector<128x160xf32>
    %9 = arith.mulf %8, %7 : vector<128x160xf32>
    %cst_8 = arith.constant 0.707106769 : f32
    %10 = vector.broadcast %cst_8 : f32 to vector<128x160xf32>
    %11 = arith.mulf %7, %10 : vector<128x160xf32>
    %12 = math.erf %11 : vector<128x160xf32>
    %cst_9 = arith.constant 1.000000e+00 : f32
    %13 = vector.broadcast %cst_9 : f32 to vector<128x160xf32>
    %14 = arith.addf %13, %12 : vector<128x160xf32>
    %15 = arith.mulf %9, %14 : vector<128x160xf32>
    %c0_10 = arith.constant 0 : index
    %c0_11 = arith.constant 0 : index
    %16 = vector.load %arg4[%c0_10, %c0_11] : memref<160x320xf32, #tpu.memory_space<vmem>>, vector<160x320xf32>
    %17 = vector.extract_strided_slice %2 {offsets = [1, 0], sizes = [1, 320], strides = [1, 1]} : vector<7x320xf32> to vector<1x320xf32>
    %cst_12 = arith.constant dense<0.000000e+00> : vector<128x320xf32>
    %18 = tpu.matmul %15, %16, %cst_12 {dimension_numbers = #tpu.dot_dimension_numbers<[1], [0], [0], [1], [0, 0, 1, 1], [], []>} : vector<128x160xf32>, vector<160x320xf32>, vector<128x320xf32> -> vector<128x320xf32>
    %19 = vector.broadcast %17 : vector<1x320xf32> to vector<128x320xf32>
    %20 = arith.addf %18, %19 : vector<128x320xf32>
    %cst_13 = arith.constant 5.000000e-01 : f32
    %21 = vector.broadcast %cst_13 : f32 to vector<128x320xf32>
    %22 = arith.mulf %21, %20 : vector<128x320xf32>
    %cst_14 = arith.constant 0.707106769 : f32
    %23 = vector.broadcast %cst_14 : f32 to vector<128x320xf32>
    %24 = arith.mulf %20, %23 : vector<128x320xf32>
    %25 = math.erf %24 : vector<128x320xf32>
    %cst_15 = arith.constant 1.000000e+00 : f32
    %26 = vector.broadcast %cst_15 : f32 to vector<128x320xf32>
    %27 = arith.addf %26, %25 : vector<128x320xf32>
    %28 = arith.mulf %22, %27 : vector<128x320xf32>
    %c0_16 = arith.constant 0 : index
    %c0_17 = arith.constant 0 : index
    %29 = vector.load %arg5[%c0_16, %c0_17] : memref<320x160xf32, #tpu.memory_space<vmem>>, vector<320x160xf32>
    %30 = vector.extract_strided_slice %2 {offsets = [2, 0], sizes = [1, 160], strides = [1, 1]} : vector<7x320xf32> to vector<1x160xf32>
    %cst_18 = arith.constant dense<0.000000e+00> : vector<128x160xf32>
    %31 = tpu.matmul %28, %29, %cst_18 {dimension_numbers = #tpu.dot_dimension_numbers<[1], [0], [0], [1], [0, 0, 1, 1], [], []>} : vector<128x320xf32>, vector<320x160xf32>, vector<128x160xf32> -> vector<128x160xf32>
    %32 = vector.broadcast %30 : vector<1x160xf32> to vector<128x160xf32>
    %33 = arith.addf %31, %32 : vector<128x160xf32>
    %c0_19 = arith.constant 0 : index
    %c0_20 = arith.constant 0 : index
    %34 = vector.load %arg6[%c0_19, %c0_20] : memref<160x32xf32, #tpu.memory_space<vmem>>, vector<160x32xf32>
    %35 = vector.extract_strided_slice %2 {offsets = [3, 0], sizes = [1, 32], strides = [1, 1]} : vector<7x320xf32> to vector<1x32xf32>
    %cst_21 = arith.constant dense<0.000000e+00> : vector<128x32xf32>
    %36 = tpu.matmul %33, %34, %cst_21 {dimension_numbers = #tpu.dot_dimension_numbers<[1], [0], [0], [1], [0, 0, 1, 1], [], []>} : vector<128x160xf32>, vector<160x32xf32>, vector<128x32xf32> -> vector<128x32xf32>
    %37 = vector.broadcast %35 : vector<1x32xf32> to vector<128x32xf32>
    %38 = arith.addf %36, %37 : vector<128x32xf32>
    %39 = vector.broadcast %1 : vector<128x1xf32> to vector<128x32xf32>
    %40 = arith.mulf %38, %39 : vector<128x32xf32>
    %c0_22 = arith.constant 0 : index
    %c0_23 = arith.constant 0 : index
    %41 = vector.load %arg7[%c0_22, %c0_23] : memref<32x320xf32, #tpu.memory_space<vmem>>, vector<32x320xf32>
    %42 = vector.extract_strided_slice %2 {offsets = [4, 0], sizes = [1, 320], strides = [1, 1]} : vector<7x320xf32> to vector<1x320xf32>
    %cst_24 = arith.constant dense<0.000000e+00> : vector<128x320xf32>
    %43 = tpu.matmul %40, %41, %cst_24 {dimension_numbers = #tpu.dot_dimension_numbers<[1], [0], [0], [1], [0, 0, 1, 1], [], []>} : vector<128x32xf32>, vector<32x320xf32>, vector<128x320xf32> -> vector<128x320xf32>
    %44 = vector.broadcast %42 : vector<1x320xf32> to vector<128x320xf32>
    %45 = arith.addf %43, %44 : vector<128x320xf32>
    %cst_25 = arith.constant 5.000000e-01 : f32
    %46 = vector.broadcast %cst_25 : f32 to vector<128x320xf32>
    %47 = arith.mulf %46, %45 : vector<128x320xf32>
    %cst_26 = arith.constant 0.707106769 : f32
    %48 = vector.broadcast %cst_26 : f32 to vector<128x320xf32>
    %49 = arith.mulf %45, %48 : vector<128x320xf32>
    %50 = math.erf %49 : vector<128x320xf32>
    %cst_27 = arith.constant 1.000000e+00 : f32
    %51 = vector.broadcast %cst_27 : f32 to vector<128x320xf32>
    %52 = arith.addf %51, %50 : vector<128x320xf32>
    %53 = arith.mulf %47, %52 : vector<128x320xf32>
    %c0_28 = arith.constant 0 : index
    %c0_29 = arith.constant 0 : index
    %54 = vector.load %arg8[%c0_28, %c0_29] : memref<320x160xf32, #tpu.memory_space<vmem>>, vector<320x160xf32>
    %55 = vector.extract_strided_slice %2 {offsets = [5, 0], sizes = [1, 160], strides = [1, 1]} : vector<7x320xf32> to vector<1x160xf32>
    %cst_30 = arith.constant dense<0.000000e+00> : vector<128x160xf32>
    %56 = tpu.matmul %53, %54, %cst_30 {dimension_numbers = #tpu.dot_dimension_numbers<[1], [0], [0], [1], [0, 0, 1, 1], [], []>} : vector<128x320xf32>, vector<320x160xf32>, vector<128x160xf32> -> vector<128x160xf32>
    %57 = vector.broadcast %55 : vector<1x160xf32> to vector<128x160xf32>
    %58 = arith.addf %56, %57 : vector<128x160xf32>
    %cst_31 = arith.constant 5.000000e-01 : f32
    %59 = vector.broadcast %cst_31 : f32 to vector<128x160xf32>
    %60 = arith.mulf %59, %58 : vector<128x160xf32>
    %cst_32 = arith.constant 0.707106769 : f32
    %61 = vector.broadcast %cst_32 : f32 to vector<128x160xf32>
    %62 = arith.mulf %58, %61 : vector<128x160xf32>
    %63 = math.erf %62 : vector<128x160xf32>
    %cst_33 = arith.constant 1.000000e+00 : f32
    %64 = vector.broadcast %cst_33 : f32 to vector<128x160xf32>
    %65 = arith.addf %64, %63 : vector<128x160xf32>
    %66 = arith.mulf %60, %65 : vector<128x160xf32>
    %c0_34 = arith.constant 0 : index
    %c0_35 = arith.constant 0 : index
    %67 = vector.load %arg9[%c0_34, %c0_35] : memref<160x23xf32, #tpu.memory_space<vmem>>, vector<160x23xf32>
    %68 = vector.extract_strided_slice %2 {offsets = [6, 0], sizes = [1, 23], strides = [1, 1]} : vector<7x320xf32> to vector<1x23xf32>
    %cst_36 = arith.constant dense<0.000000e+00> : vector<128x23xf32>
    %69 = tpu.matmul %66, %67, %cst_36 {dimension_numbers = #tpu.dot_dimension_numbers<[1], [0], [0], [1], [0, 0, 1, 1], [], []>} : vector<128x160xf32>, vector<160x23xf32>, vector<128x23xf32> -> vector<128x23xf32>
    %70 = vector.broadcast %68 : vector<1x23xf32> to vector<128x23xf32>
    %71 = arith.addf %69, %70 : vector<128x23xf32>
    %72 = vector.broadcast %1 : vector<128x1xf32> to vector<128x23xf32>
    %73 = arith.mulf %71, %72 : vector<128x23xf32>
    %c0_37 = arith.constant 0 : index
    %c0_38 = arith.constant 0 : index
    %74 = vector.load %arg11[%c0_37, %c0_38] : memref<128x23xf32, #tpu.memory_space<vmem>>, vector<128x23xf32>
    tpu.vector_store %arg11[%c0_37, %c0_38], %73 {strides = array<i32>} : memref<128x23xf32, #tpu.memory_space<vmem>>, vector<128x23xf32>,
    return
  }
  func.func @transform_0(%arg0: i32) -> (i32, i32) {
    %c0_i32 = arith.constant 0 : i32
    %c0_i32_0 = arith.constant 0 : i32
    return %arg0, %c0_i32 : i32, i32
  }
  func.func @transform_1(%arg0: i32) -> (i32, i32) {
    %c0_i32 = arith.constant 0 : i32
    %c0_i32_0 = arith.constant 0 : i32
    return %arg0, %c0_i32 : i32, i32
  }
  func.func @transform_2(%arg0: i32) -> (i32, i32) {
    %c0_i32 = arith.constant 0 : i32
    %c0_i32_0 = arith.constant 0 : i32
    %c0_i32_1 = arith.constant 0 : i32
    return %c0_i32, %c0_i32_0 : i32, i32
  }
  func.func @transform_3(%arg0: i32) -> (i32, i32) {
    %c0_i32 = arith.constant 0 : i32
    %c0_i32_0 = arith.constant 0 : i32
    %c0_i32_1 = arith.constant 0 : i32
    return %c0_i32, %c0_i32_0 : i32, i32
  }
  func.func @transform_4(%arg0: i32) -> (i32, i32) {
    %c0_i32 = arith.constant 0 : i32
    %c0_i32_0 = arith.constant 0 : i32
    %c0_i32_1 = arith.constant 0 : i32
    return %c0_i32, %c0_i32_0 : i32, i32
  }
  func.func @transform_5(%arg0: i32) -> (i32, i32) {
    %c0_i32 = arith.constant 0 : i32
    %c0_i32_0 = arith.constant 0 : i32
    %c0_i32_1 = arith.constant 0 : i32
    return %c0_i32, %c0_i32_0 : i32, i32
  }
  func.func @transform_6(%arg0: i32) -> (i32, i32) {
    %c0_i32 = arith.constant 0 : i32
    %c0_i32_0 = arith.constant 0 : i32
    %c0_i32_1 = arith.constant 0 : i32
    return %c0_i32, %c0_i32_0 : i32, i32
  }
  func.func @transform_7(%arg0: i32) -> (i32, i32) {
    %c0_i32 = arith.constant 0 : i32
    %c0_i32_0 = arith.constant 0 : i32
    %c0_i32_1 = arith.constant 0 : i32
    return %c0_i32, %c0_i32_0 : i32, i32
  }
  func.func @transform_8(%arg0: i32) -> (i32, i32) {
    %c0_i32 = arith.constant 0 : i32
    %c0_i32_0 = arith.constant 0 : i32
    %c0_i32_1 = arith.constant 0 : i32
    return %c0_i32, %c0_i32_0 : i32, i32
  }
  func.func @transform_9(%arg0: i32) -> (i32, i32) {
    %c0_i32 = arith.constant 0 : i32
    %c0_i32_0 = arith.constant 0 : i32
    %c0_i32_1 = arith.constant 0 : i32
    return %c0_i32, %c0_i32_0 : i32, i32
  }
  func.func @transform_10(%arg0: i32) -> (i32, i32) {
    %c0_i32 = arith.constant 0 : i32
    %c0_i32_0 = arith.constant 0 : i32
    return %arg0, %c0_i32 : i32, i32
  }
}

module attributes {stable_mosaic.version = 11 : i64} {
  func.func @_fused_path_kernel(%arg0: i32, %arg1: memref<16x63xf32, #tpu.memory_space<vmem>>, %arg2: memref<16x1xf32, #tpu.memory_space<vmem>>, %arg3: memref<63x160xf32, #tpu.memory_space<vmem>>, %arg4: memref<160x320xf32, #tpu.memory_space<vmem>>, %arg5: memref<320x160xf32, #tpu.memory_space<vmem>>, %arg6: memref<160x32xf32, #tpu.memory_space<vmem>>, %arg7: memref<32x320xf32, #tpu.memory_space<vmem>>, %arg8: memref<320x160xf32, #tpu.memory_space<vmem>>, %arg9: memref<160x63xf32, #tpu.memory_space<vmem>>, %arg10: memref<7x320xf32, #tpu.memory_space<vmem>>, %arg11: memref<16x63xf32, #tpu.memory_space<vmem>>) attributes {dimension_semantics = [#tpu.dimension_semantics<parallel>], iteration_bounds = array<i64: 1>, scalar_prefetch = 0 : i64, scratch_operands = 0 : i64, tpu.core_type = #tpu.core_type<tc>, window_params = [{transform_indices = @transform_0, window_bounds = array<i64: 16, 63>}, {transform_indices = @transform_1, window_bounds = array<i64: 16, 1>}, {pipeline_mode = #tpu.pipeline_mode<synchronous>, transform_indices = @transform_2, window_bounds = array<i64: 63, 160>}, {pipeline_mode = #tpu.pipeline_mode<synchronous>, transform_indices = @transform_3, window_bounds = array<i64: 160, 320>}, {pipeline_mode = #tpu.pipeline_mode<synchronous>, transform_indices = @transform_4, window_bounds = array<i64: 320, 160>}, {pipeline_mode = #tpu.pipeline_mode<synchronous>, transform_indices = @transform_5, window_bounds = array<i64: 160, 32>}, {pipeline_mode = #tpu.pipeline_mode<synchronous>, transform_indices = @transform_6, window_bounds = array<i64: 32, 320>}, {pipeline_mode = #tpu.pipeline_mode<synchronous>, transform_indices = @transform_7, window_bounds = array<i64: 320, 160>}, {pipeline_mode = #tpu.pipeline_mode<synchronous>, transform_indices = @transform_8, window_bounds = array<i64: 160, 63>}, {pipeline_mode = #tpu.pipeline_mode<synchronous>, transform_indices = @transform_9, window_bounds = array<i64: 7, 320>}, {transform_indices = @transform_10, window_bounds = array<i64: 16, 63>}]} {
    %c0 = arith.constant 0 : index
    %c0_0 = arith.constant 0 : index
    %0 = vector.load %arg1[%c0, %c0_0] : memref<16x63xf32, #tpu.memory_space<vmem>>, vector<16x63xf32>
    %c0_1 = arith.constant 0 : index
    %c0_2 = arith.constant 0 : index
    %1 = vector.load %arg2[%c0_1, %c0_2] : memref<16x1xf32, #tpu.memory_space<vmem>>, vector<16x1xf32>
    %c0_3 = arith.constant 0 : index
    %c0_4 = arith.constant 0 : index
    %2 = vector.load %arg10[%c0_3, %c0_4] : memref<7x320xf32, #tpu.memory_space<vmem>>, vector<7x320xf32>
    %c0_5 = arith.constant 0 : index
    %c0_6 = arith.constant 0 : index
    %3 = vector.load %arg3[%c0_5, %c0_6] : memref<63x160xf32, #tpu.memory_space<vmem>>, vector<63x160xf32>
    %4 = vector.extract_strided_slice %2 {offsets = [0, 0], sizes = [1, 160], strides = [1, 1]} : vector<7x320xf32> to vector<1x160xf32>
    %cst = arith.constant dense<0.000000e+00> : vector<16x160xf32>
    %5 = tpu.matmul %0, %3, %cst {dimension_numbers = #tpu.dot_dimension_numbers<[1], [0], [0], [1], [0, 0, 1, 1], [], []>} : vector<16x63xf32>, vector<63x160xf32>, vector<16x160xf32> -> vector<16x160xf32>
    %6 = vector.broadcast %4 : vector<1x160xf32> to vector<16x160xf32>
    %7 = arith.addf %5, %6 : vector<16x160xf32>
    %cst_7 = arith.constant 5.000000e-01 : f32
    %8 = vector.broadcast %cst_7 : f32 to vector<16x160xf32>
    %9 = arith.mulf %8, %7 : vector<16x160xf32>
    %cst_8 = arith.constant 0.707106769 : f32
    %10 = vector.broadcast %cst_8 : f32 to vector<16x160xf32>
    %11 = arith.mulf %7, %10 : vector<16x160xf32>
    %12 = math.erf %11 : vector<16x160xf32>
    %cst_9 = arith.constant 1.000000e+00 : f32
    %13 = vector.broadcast %cst_9 : f32 to vector<16x160xf32>
    %14 = arith.addf %13, %12 : vector<16x160xf32>
    %15 = arith.mulf %9, %14 : vector<16x160xf32>
    %c0_10 = arith.constant 0 : index
    %c0_11 = arith.constant 0 : index
    %16 = vector.load %arg4[%c0_10, %c0_11] : memref<160x320xf32, #tpu.memory_space<vmem>>, vector<160x320xf32>
    %17 = vector.extract_strided_slice %2 {offsets = [1, 0], sizes = [1, 320], strides = [1, 1]} : vector<7x320xf32> to vector<1x320xf32>
    %cst_12 = arith.constant dense<0.000000e+00> : vector<16x320xf32>
    %18 = tpu.matmul %15, %16, %cst_12 {dimension_numbers = #tpu.dot_dimension_numbers<[1], [0], [0], [1], [0, 0, 1, 1], [], []>} : vector<16x160xf32>, vector<160x320xf32>, vector<16x320xf32> -> vector<16x320xf32>
    %19 = vector.broadcast %17 : vector<1x320xf32> to vector<16x320xf32>
    %20 = arith.addf %18, %19 : vector<16x320xf32>
    %cst_13 = arith.constant 5.000000e-01 : f32
    %21 = vector.broadcast %cst_13 : f32 to vector<16x320xf32>
    %22 = arith.mulf %21, %20 : vector<16x320xf32>
    %cst_14 = arith.constant 0.707106769 : f32
    %23 = vector.broadcast %cst_14 : f32 to vector<16x320xf32>
    %24 = arith.mulf %20, %23 : vector<16x320xf32>
    %25 = math.erf %24 : vector<16x320xf32>
    %cst_15 = arith.constant 1.000000e+00 : f32
    %26 = vector.broadcast %cst_15 : f32 to vector<16x320xf32>
    %27 = arith.addf %26, %25 : vector<16x320xf32>
    %28 = arith.mulf %22, %27 : vector<16x320xf32>
    %c0_16 = arith.constant 0 : index
    %c0_17 = arith.constant 0 : index
    %29 = vector.load %arg5[%c0_16, %c0_17] : memref<320x160xf32, #tpu.memory_space<vmem>>, vector<320x160xf32>
    %30 = vector.extract_strided_slice %2 {offsets = [2, 0], sizes = [1, 160], strides = [1, 1]} : vector<7x320xf32> to vector<1x160xf32>
    %cst_18 = arith.constant dense<0.000000e+00> : vector<16x160xf32>
    %31 = tpu.matmul %28, %29, %cst_18 {dimension_numbers = #tpu.dot_dimension_numbers<[1], [0], [0], [1], [0, 0, 1, 1], [], []>} : vector<16x320xf32>, vector<320x160xf32>, vector<16x160xf32> -> vector<16x160xf32>
    %32 = vector.broadcast %30 : vector<1x160xf32> to vector<16x160xf32>
    %33 = arith.addf %31, %32 : vector<16x160xf32>
    %c0_19 = arith.constant 0 : index
    %c0_20 = arith.constant 0 : index
    %34 = vector.load %arg6[%c0_19, %c0_20] : memref<160x32xf32, #tpu.memory_space<vmem>>, vector<160x32xf32>
    %35 = vector.extract_strided_slice %2 {offsets = [3, 0], sizes = [1, 32], strides = [1, 1]} : vector<7x320xf32> to vector<1x32xf32>
    %cst_21 = arith.constant dense<0.000000e+00> : vector<16x32xf32>
    %36 = tpu.matmul %33, %34, %cst_21 {dimension_numbers = #tpu.dot_dimension_numbers<[1], [0], [0], [1], [0, 0, 1, 1], [], []>} : vector<16x160xf32>, vector<160x32xf32>, vector<16x32xf32> -> vector<16x32xf32>
    %37 = vector.broadcast %35 : vector<1x32xf32> to vector<16x32xf32>
    %38 = arith.addf %36, %37 : vector<16x32xf32>
    %39 = vector.broadcast %1 : vector<16x1xf32> to vector<16x32xf32>
    %40 = arith.mulf %38, %39 : vector<16x32xf32>
    %c0_22 = arith.constant 0 : index
    %c0_23 = arith.constant 0 : index
    %41 = vector.load %arg7[%c0_22, %c0_23] : memref<32x320xf32, #tpu.memory_space<vmem>>, vector<32x320xf32>
    %42 = vector.extract_strided_slice %2 {offsets = [4, 0], sizes = [1, 320], strides = [1, 1]} : vector<7x320xf32> to vector<1x320xf32>
    %cst_24 = arith.constant dense<0.000000e+00> : vector<16x320xf32>
    %43 = tpu.matmul %40, %41, %cst_24 {dimension_numbers = #tpu.dot_dimension_numbers<[1], [0], [0], [1], [0, 0, 1, 1], [], []>} : vector<16x32xf32>, vector<32x320xf32>, vector<16x320xf32> -> vector<16x320xf32>
    %44 = vector.broadcast %42 : vector<1x320xf32> to vector<16x320xf32>
    %45 = arith.addf %43, %44 : vector<16x320xf32>
    %cst_25 = arith.constant 5.000000e-01 : f32
    %46 = vector.broadcast %cst_25 : f32 to vector<16x320xf32>
    %47 = arith.mulf %46, %45 : vector<16x320xf32>
    %cst_26 = arith.constant 0.707106769 : f32
    %48 = vector.broadcast %cst_26 : f32 to vector<16x320xf32>
    %49 = arith.mulf %45, %48 : vector<16x320xf32>
    %50 = math.erf %49 : vector<16x320xf32>
    %cst_27 = arith.constant 1.000000e+00 : f32
    %51 = vector.broadcast %cst_27 : f32 to vector<16x320xf32>
    %52 = arith.addf %51, %50 : vector<16x320xf32>
    %53 = arith.mulf %47, %52 : vector<16x320xf32>
    %c0_28 = arith.constant 0 : index
    %c0_29 = arith.constant 0 : index
    %54 = vector.load %arg8[%c0_28, %c0_29] : memref<320x160xf32, #tpu.memory_space<vmem>>, vector<320x160xf32>
    %55 = vector.extract_strided_slice %2 {offsets = [5, 0], sizes = [1, 160], strides = [1, 1]} : vector<7x320xf32> to vector<1x160xf32>
    %cst_30 = arith.constant dense<0.000000e+00> : vector<16x160xf32>
    %56 = tpu.matmul %53, %54, %cst_30 {dimension_numbers = #tpu.dot_dimension_numbers<[1], [0], [0], [1], [0, 0, 1, 1], [], []>} : vector<16x320xf32>, vector<320x160xf32>, vector<16x160xf32> -> vector<16x160xf32>
    %57 = vector.broadcast %55 : vector<1x160xf32> to vector<16x160xf32>
    %58 = arith.addf %56, %57 : vector<16x160xf32>
    %cst_31 = arith.constant 5.000000e-01 : f32
    %59 = vector.broadcast %cst_31 : f32 to vector<16x160xf32>
    %60 = arith.mulf %59, %58 : vector<16x160xf32>
    %cst_32 = arith.constant 0.707106769 : f32
    %61 = vector.broadcast %cst_32 : f32 to vector<16x160xf32>
    %62 = arith.mulf %58, %61 : vector<16x160xf32>
    %63 = math.erf %62 : vector<16x160xf32>
    %cst_33 = arith.constant 1.000000e+00 : f32
    %64 = vector.broadcast %cst_33 : f32 to vector<16x160xf32>
    %65 = arith.addf %64, %63 : vector<16x160xf32>
    %66 = arith.mulf %60, %65 : vector<16x160xf32>
    %c0_34 = arith.constant 0 : index
    %c0_35 = arith.constant 0 : index
    %67 = vector.load %arg9[%c0_34, %c0_35] : memref<160x63xf32, #tpu.memory_space<vmem>>, vector<160x63xf32>
    %68 = vector.extract_strided_slice %2 {offsets = [6, 0], sizes = [1, 63], strides = [1, 1]} : vector<7x320xf32> to vector<1x63xf32>
    %cst_36 = arith.constant dense<0.000000e+00> : vector<16x63xf32>
    %69 = tpu.matmul %66, %67, %cst_36 {dimension_numbers = #tpu.dot_dimension_numbers<[1], [0], [0], [1], [0, 0, 1, 1], [], []>} : vector<16x160xf32>, vector<160x63xf32>, vector<16x63xf32> -> vector<16x63xf32>
    %70 = vector.broadcast %68 : vector<1x63xf32> to vector<16x63xf32>
    %71 = arith.addf %69, %70 : vector<16x63xf32>
    %72 = vector.broadcast %1 : vector<16x1xf32> to vector<16x63xf32>
    %73 = arith.mulf %71, %72 : vector<16x63xf32>
    %c0_37 = arith.constant 0 : index
    %c0_38 = arith.constant 0 : index
    %74 = vector.load %arg11[%c0_37, %c0_38] : memref<16x63xf32, #tpu.memory_space<vmem>>, vector<16x63xf32>
    tpu.vector_store %arg11[%c0_37, %c0_38], %73 {strides = array<i32>} : memref<16x63xf32, #tpu.memory_space<vmem>>, vector<16x63xf32>,
    return
  }
  func.func @transform_0(%arg0: i32) -> (i32, i32) {
    %c0_i32 = arith.constant 0 : i32
    %c0_i32_0 = arith.constant 0 : i32
    return %arg0, %c0_i32 : i32, i32
  }
  func.func @transform_1(%arg0: i32) -> (i32, i32) {
    %c0_i32 = arith.constant 0 : i32
    %c0_i32_0 = arith.constant 0 : i32
    return %arg0, %c0_i32 : i32, i32
  }
  func.func @transform_2(%arg0: i32) -> (i32, i32) {
    %c0_i32 = arith.constant 0 : i32
    %c0_i32_0 = arith.constant 0 : i32
    %c0_i32_1 = arith.constant 0 : i32
    return %c0_i32, %c0_i32_0 : i32, i32
  }
  func.func @transform_3(%arg0: i32) -> (i32, i32) {
    %c0_i32 = arith.constant 0 : i32
    %c0_i32_0 = arith.constant 0 : i32
    %c0_i32_1 = arith.constant 0 : i32
    return %c0_i32, %c0_i32_0 : i32, i32
  }
  func.func @transform_4(%arg0: i32) -> (i32, i32) {
    %c0_i32 = arith.constant 0 : i32
    %c0_i32_0 = arith.constant 0 : i32
    %c0_i32_1 = arith.constant 0 : i32
    return %c0_i32, %c0_i32_0 : i32, i32
  }
  func.func @transform_5(%arg0: i32) -> (i32, i32) {
    %c0_i32 = arith.constant 0 : i32
    %c0_i32_0 = arith.constant 0 : i32
    %c0_i32_1 = arith.constant 0 : i32
    return %c0_i32, %c0_i32_0 : i32, i32
  }
  func.func @transform_6(%arg0: i32) -> (i32, i32) {
    %c0_i32 = arith.constant 0 : i32
    %c0_i32_0 = arith.constant 0 : i32
    %c0_i32_1 = arith.constant 0 : i32
    return %c0_i32, %c0_i32_0 : i32, i32
  }
  func.func @transform_7(%arg0: i32) -> (i32, i32) {
    %c0_i32 = arith.constant 0 : i32
    %c0_i32_0 = arith.constant 0 : i32
    %c0_i32_1 = arith.constant 0 : i32
    return %c0_i32, %c0_i32_0 : i32, i32
  }
  func.func @transform_8(%arg0: i32) -> (i32, i32) {
    %c0_i32 = arith.constant 0 : i32
    %c0_i32_0 = arith.constant 0 : i32
    %c0_i32_1 = arith.constant 0 : i32
    return %c0_i32, %c0_i32_0 : i32, i32
  }
  func.func @transform_9(%arg0: i32) -> (i32, i32) {
    %c0_i32 = arith.constant 0 : i32
    %c0_i32_0 = arith.constant 0 : i32
    %c0_i32_1 = arith.constant 0 : i32
    return %c0_i32, %c0_i32_0 : i32, i32
  }
  func.func @transform_10(%arg0: i32) -> (i32, i32) {
    %c0_i32 = arith.constant 0 : i32
    %c0_i32_0 = arith.constant 0 : i32
    return %arg0, %c0_i32 : i32, i32
  }
}

</mosaic_0001>

<bundles_post_ra>
// kernel: scene_graph_transformer_forward.2
= control target key start
LH: loop header
LB: loop body
LE: loop exit
PB: predicated region body
PF: predicated region fallthrough
CT: control target
= control target key end

     0   :  { %v1861_v7 = vmov 0.0   ;;  %v1862_v13 = vmov 0.0|0.0   ;;  %vm74_vm0 = vcmask 1046528   ;;  %vm1863_vm1 = vmmov 1   ;;  %s2933_s0 = inlined_call_operand.vmem [shape: f32[16,63], index: 0, kind: input, shape index: {}]   ;;  %s2934_s1 = inlined_call_operand.vmem [shape: f32[16,1], index: 1, kind: input, shape index: {}]   ;;  %s2935_s2 = inlined_call_operand.vmem [shape: f32[63,160], index: 2, kind: input, shape index: {}]   ;;  %s2936_s3 = inlined_call_operand.vmem [shape: f32[160,320], index: 3, kind: input, shape index: {}]   ;;  %s2937_s4 = inlined_call_operand.vmem [shape: f32[320,160], index: 4, kind: input, shape index: {}]   ;;  %s2938_s5 = inlined_call_operand.vmem [shape: f32[160,32], index: 5, kind: input, shape index: {}]   ;;  %s2939_s6 = inlined_call_operand.vmem [shape: f32[32,320], index: 6, kind: input, shape index: {}]   ;;  %s2940_s7 = inlined_call_operand.vmem [shape: f32[320,160], index: 7, kind: input, shape index: {}]   ;;  %s2941_s8 = inlined_call_operand.vmem [shape: f32[160,63], index: 8, kind: input, shape index: {}]   ;;  %s2942_s9 = inlined_call_operand.vmem [shape: f32[7,320], index: 9, kind: input, shape index: {}]   ;;  %s2943_s10 = inlined_call_operand.hbm [shape: f32[16,63], index: 10, kind: output, shape index: {}]  }
   0x1   :  { %v44_v0 = vld [vmem:[%s2935_s2 + $0x8] sm:$0xff]  ;;  %v46_v1 = vld [vmem:[%s2935_s2 + $0x18] sm:$0xff]  ;;  %v43_v2 = vld [vmem:[%s2935_s2] sm:$0xff]  ;;  %145 = vmatprep.mubr.f32.mxu1 %v1861_v7  ;;  %1505 = vmatprep.subr.bf16.mxu0 %v1862_v13  ;;  %vm67_vm3 = vcmask 515072  }
   0x2   :  { %v1447_v3 = vpack.c.bf16 %v46_v1, %v44_v0  ;;  %v45_v4 = vld [vmem:[%s2935_s2 + $0x10] sm:$0xff]  ;;  %v48_v5 = vld [vmem:[%s2935_s2 + $0x28] sm:$0xff]  ;;  %v50_v6 = vld [vmem:[%s2935_s2 + $0x38] sm:$0xff] }
   0x3   :  { %v1449_v8 = vpack.c.bf16 %v45_v4, %v43_v2  ;;  %v1451_v9 = vpack.c.bf16 %v50_v6, %v48_v5  ;;  %v47_v10 = vld [vmem:[%s2935_s2 + $0x20] sm:$0xff]  ;;  %v49_v11 = vld [vmem:[%s2935_s2 + $0x30] sm:$0xff]  ;;  %v52_v12 = vld [vmem:[%s2935_s2 + $0x48] sm:$0xff] }
   0x4   :  { %1448 = vmatprep.subr.bf16.mxu1 %v1447_v3  ;;  %v54_v14 = vld [vmem:[%s2935_s2 + $0x58] sm:$0xff]  ;;  %v1453_v15 = vpack.c.bf16 %v49_v11, %v47_v10  ;;  %v51_v17 = vld [vmem:[%s2935_s2 + $0x40] sm:$0xff]  ;;  %v53_v18 = vld [vmem:[%s2935_s2 + $0x50] sm:$0xff] }
   0x5   :  { %1450 = vmatpush1.bf16.msra.mxu1 %v1449_v8  ;;  %v1455_v16 = vpack.c.bf16 %v54_v14, %v52_v12  ;;  %v56_v19 = vld [vmem:[%s2935_s2 + $0x68] sm:$0xff]  ;;  %v58_v20 = vld [vmem:[%s2935_s2 + $0x78] sm:$0x7f]  ;;  %v180_v21 = vld [vmem:[%s2936_s3 + $0x10] sm:$0xff]  ;;  %v1457_v22 = vpack.c.bf16 %v53_v18, %v51_v17 }
   0x6   :  { %1452 = vmatprep.subr.bf16.mxu1 %v1451_v9  ;;  %vm1970_vm2 = vmpackc.low %vm74_vm0, %vm1863_vm1  ;;  %v183_v24 = vld [vmem:[%s2936_s3 + $0x28] sm:$0xff]  ;;  %v1459_v25 = vpack.c.bf16 %v58_v20, %v56_v19  ;;  %v55_v26 = vld [vmem:[%s2935_s2 + $0x60] sm:$0xff] }
   0x7   :  { %v57_v27 = vld [vmem:[%s2935_s2 + $0x70] sm:$0x7f]  ;;  %v1506_v28 = vpack.c.bf16 %v183_v24, %v180_v21  ;;  %v186_v29 = vld [vmem:[%s2936_s3 + $0x40] sm:$0xff]  ;;  %v179_v30 = vld [vmem:[%s2936_s3 + $0x8] sm:$0xff] }
   0x8   :  { %v182_v31 = vld [vmem:[%s2936_s3 + $0x20] sm:$0xff]  ;;  %v189_v32 = vld [vmem:[%s2936_s3 + $0x58] sm:$0xff]  ;;  %v1462_v34 = vpack.c.bf16 %v57_v27, %v55_v26  ;;  %v192_v35 = vld [vmem:[%s2936_s3 + $0x70] sm:$0xff] }
   0x9   :  { %1454 = vmatpush1.bf16.msra.mxu1 %v1453_v15  ;;  %1507 = vmatpush1.bf16.msra.mxu0 %v1506_v28  ;;  %v1509_v33 = vpack.c.bf16 %v189_v32, %v186_v29  ;;  %v195_v36 = vld [vmem:[%s2936_s3 + $0x88] sm:$0xff]  ;;  %v1465_v37 = vpack.c.bf16 %v182_v31, %v179_v30  ;;  %v178_v38 = vld [vmem:[%s2936_s3] sm:$0xff]  ;;  %v181_v39 = vld [vmem:[%s2936_s3 + $0x18] sm:$0xff] }
   0xa   :  { %1456 = vmatprep.subr.bf16.mxu1 %v1455_v16  ;;  %1508 = vmatprep.subr.bf16.mxu0 %v1862_v13  ;;  %v185_v40 = vld [vmem:[%s2936_s3 + $0x38] sm:$0xff]  ;;  %v188_v41 = vld [vmem:[%s2936_s3 + $0x50] sm:$0xff]  ;;  %v36_v42 = vld [vmem:[%s2933_s0] sm:$0xff]  ;;  %v1512_v43 = vpack.c.bf16 %v195_v36, %v192_v35  ;;  %v1467_v44 = vpack.c.bf16 %v181_v39, %v178_v38 }
   0xb   :  { %v198_v45 = vld [vmem:[%s2936_s3 + $0xa0] sm:$0xff]  ;;  %v201_v46 = vld [vmem:[%s2936_s3 + $0xb8] sm:$0xff] }
   0xd   :  { %1458 = vmatpush1.bf16.msra.mxu1 %v1457_v22  ;;  %1510 = vmatpush1.bf16.msra.mxu0 %v1509_v33 }
   0xe   :  { %1461 = vmatprep.subr.msk.bf16.mxu1 %vm1970_vm2, %v1459_v25  ;;  %1511 = vmatprep.subr.bf16.mxu0 %v1862_v13 }
  0x11   :  { %1464 = vmatpush1.bf16.msk.msra.mxu1 %vm1970_vm2, %v1462_v34 }
  0x12   :  { %15 = vsyncpa [#allocation3], 0  ;;  %1466 = vmatprep.subr.bf16.mxu1 %v1465_v37  ;;  %v1469_v47 = vpack.c.bf16 %v188_v41, %v185_v40  ;;  %v184_v48 = vld [vmem:[%s2936_s3 + $0x30] sm:$0xff]  ;;  %v187_v49 = vld [vmem:[%s2936_s3 + $0x48] sm:$0xff]  ;;  %1513 = vmatpush1.bf16.msra.mxu0 %v1512_v43  ;;  %v1515_v52 = vpack.c.bf16 %v201_v46, %v198_v45  ;;  %vm250_vm4 = vcmask 261120   ;;  %vm527_vm5 = vcmask 523264  }
  0x13   :  { %v191_v50 = vld [vmem:[%s2936_s3 + $0x68] sm:$0xff]  ;;  %v194_v51 = vld [vmem:[%s2936_s3 + $0x80] sm:$0xff]  ;;  %v1471_v54 = vpack.c.bf16 %v187_v49, %v184_v48  ;;  %v204_v55 = vld [vmem:[%s2936_s3 + $0xd0] sm:$0xff]  ;;  %1514 = vmatprep.subr.bf16.mxu0 %v1862_v13 }
  0x14   :  { %1412 = vmatmul.mubr.msk.f32.vlgmr.msra.gmra.mrb[0].mxu1 %vm67_vm3, %v36_v42  ;;  %v37_v53 = vld [vmem:[%s2933_s0 + $0x8] sm:$0xff]  ;;  %v1473_v57 = vpack.c.bf16 %v194_v51, %v191_v50  ;;  %v190_v58 = vld [vmem:[%s2936_s3 + $0x60] sm:$0xff]  ;;  %v193_v59 = vld [vmem:[%s2936_s3 + $0x78] sm:$0xff] }
  0x15   :  { %151 = vmatprep.mubr.f32.mxu1 %v1861_v7  ;;  %1468 = vmatpush1.bf16.msra.mxu1 %v1467_v44  ;;  %v207_v56 = vld [vmem:[%s2936_s3 + $0xe8] sm:$0xff]  ;;  %v197_v60 = vld [vmem:[%s2936_s3 + $0x98] sm:$0xff]  ;;  %v200_v61 = vld [vmem:[%s2936_s3 + $0xb0] sm:$0xff]  ;;  %v1475_v63 = vpack.c.bf16 %v193_v59, %v190_v58 }
  0x16   :  { %1470 = vmatprep.subr.bf16.mxu1 %v1469_v47  ;;  %1516 = vmatpush1.bf16.msra.mxu0 %v1515_v52  ;;  %v1518_v62 = vpack.c.bf16 %v207_v56, %v204_v55  ;;  %v1477_v0 = vpack.c.bf16 %v200_v61, %v197_v60  ;;  %v196_v1 = vld [vmem:[%s2936_s3 + $0x90] sm:$0xff]  ;;  %v199_v2 = vld [vmem:[%s2936_s3 + $0xa8] sm:$0xff]  ;;  %v206_v4 = vld [vmem:[%s2936_s3 + $0xe0] sm:$0xff]  ;;  %v59_v60 = vlaneseq }
  0x17   :  { %1517 = vmatprep.subr.bf16.mxu0 %v1862_v13  ;;  %v203_v3 = vld [vmem:[%s2936_s3 + $0xc8] sm:$0xff]  ;;  %v1479_v5 = vpack.c.bf16 %v199_v2, %v196_v1  ;;  %v202_v8 = vld [vmem:[%s2936_s3 + $0xc0] sm:$0xff]  ;;  %v205_v9 = vld [vmem:[%s2936_s3 + $0xd8] sm:$0xff] }
  0x18   :  { %1413 = vmatmul.mubr.msk.f32.gmra.mrb[2].mxu1 %vm67_vm3, %v37_v53  ;;  %v1481_v6 = vpack.c.bf16 %v206_v4, %v203_v3  ;;  %v1483_v10 = vpack.c.bf16 %v205_v9, %v202_v8  ;;  %v209_v11 = vld [vmem:[%s2936_s3 + $0xf8] sm:$0xff]  ;;  %v212_v12 = vld [vmem:[%s2936_s3 + $0x110] sm:$0xff]  ;;  %v211_v16 = vld [vmem:[%s2936_s3 + $0x108] sm:$0xff]  ;;  %v2186_v61 = vshrl.u32 %v59_v60, 7 }
  0x19   :  { %1472 = vmatpush1.bf16.msra.mxu1 %v1471_v54  ;;  %v1485_v14 = vpack.c.bf16 %v212_v12, %v209_v11  ;;  %v208_v15 = vld [vmem:[%s2936_s3 + $0xf0] sm:$0xff]  ;;  %v210_v17 = vld [vmem:[%s2936_s3 + $0x100] sm:$0xff]  ;;  %v213_v19 = vld [vmem:[%s2936_s3 + $0x118] sm:$0xff] }
  0x1a   :  { %1474 = vmatprep.subr.bf16.mxu1 %v1473_v57  ;;  %1519 = vmatpush1.bf16.msra.mxu0 %v1518_v62  ;;  %v1487_v18 = vpack.c.bf16 %v211_v16, %v208_v15  ;;  %v1521_v20 = vpack.c.bf16 %v213_v19, %v210_v17  ;;  %v215_v21 = vld [vmem:[%s2936_s3 + $0x128] sm:$0xff]  ;;  %v218_v22 = vld [vmem:[%s2936_s3 + $0x140] sm:$0xff]  ;;  %v217_v25 = vld [vmem:[%s2936_s3 + $0x138] sm:$0xff]  ;;  %v61_v62 = vsub.s32 0, %v2186_v61 }
  0x1b   :  { %1520 = vmatprep.subr.bf16.mxu0 %v1862_v13  ;;  %v1489_v23 = vpack.c.bf16 %v218_v22, %v215_v21  ;;  %v214_v24 = vld [vmem:[%s2936_s3 + $0x120] sm:$0xff]  ;;  %v216_v26 = vld [vmem:[%s2936_s3 + $0x130] sm:$0xff]  ;;  %v219_v28 = vld [vmem:[%s2936_s3 + $0x148] sm:$0xff] }
  0x1c   :  { %v1491_v27 = vpack.c.bf16 %v217_v25, %v214_v24  ;;  %v1524_v29 = vpack.c.bf16 %v219_v28, %v216_v26  ;;  %v221_v30 = vld [vmem:[%s2936_s3 + $0x158] sm:$0xff]  ;;  %v224_v31 = vld [vmem:[%s2936_s3 + $0x170] sm:$0xff]  ;;  %v223_v34 = vld [vmem:[%s2936_s3 + $0x168] sm:$0xff] }
  0x1d   :  { %1476 = vmatpush1.bf16.msra.mxu1 %v1475_v63  ;;  %v1493_v32 = vpack.c.bf16 %v224_v31, %v221_v30  ;;  %v220_v33 = vld [vmem:[%s2936_s3 + $0x150] sm:$0xff]  ;;  %v222_v35 = vld [vmem:[%s2936_s3 + $0x160] sm:$0xff]  ;;  %v225_v37 = vld [vmem:[%s2936_s3 + $0x178] sm:$0xff] }
  0x1e   :  { %1478 = vmatprep.subr.bf16.mxu1 %v1477_v0  ;;  %1522 = vmatpush1.bf16.msra.mxu0 %v1521_v20  ;;  %v1495_v36 = vpack.c.bf16 %v223_v34, %v220_v33  ;;  %v1527_v38 = vpack.c.bf16 %v225_v37, %v222_v35  ;;  %v227_v39 = vld [vmem:[%s2936_s3 + $0x188] sm:$0xff]  ;;  %v230_v40 = vld [vmem:[%s2936_s3 + $0x1a0] sm:$0xff]  ;;  %v229_v43 = vld [vmem:[%s2936_s3 + $0x198] sm:$0xff] }
  0x1f   :  { %1523 = vmatprep.subr.bf16.mxu0 %v1862_v13  ;;  %v1497_v41 = vpack.c.bf16 %v230_v40, %v227_v39  ;;  %v226_v42 = vld [vmem:[%s2936_s3 + $0x180] sm:$0xff]  ;;  %v228_v44 = vld [vmem:[%s2936_s3 + $0x190] sm:$0xff]  ;;  %v231_v46 = vld [vmem:[%s2936_s3 + $0x1a8] sm:$0xff] }
  0x20   :  { %v1499_v45 = vpack.c.bf16 %v229_v43, %v226_v42  ;;  %v1530_v47 = vpack.c.bf16 %v231_v46, %v228_v44  ;;  %v233_v48 = vld [vmem:[%s2936_s3 + $0x1b8] sm:$0xff]  ;;  %v236_v49 = vld [vmem:[%s2936_s3 + $0x1d0] sm:$0xff]  ;;  %v235_v52 = vld [vmem:[%s2936_s3 + $0x1c8] sm:$0xff] }
  0x21   :  { %1480 = vmatpush1.bf16.msra.mxu1 %v1479_v5  ;;  %v1501_v50 = vpack.c.bf16 %v236_v49, %v233_v48  ;;  %v232_v51 = vld [vmem:[%s2936_s3 + $0x1b0] sm:$0xff]  ;;  %v234_v53 = vld [vmem:[%s2936_s3 + $0x1c0] sm:$0xff]  ;;  %v237_v55 = vld [vmem:[%s2936_s3 + $0x1d8] sm:$0xff] }
  0x22   :  { %1482 = vmatprep.subr.bf16.mxu1 %v1481_v6  ;;  %1525 = vmatpush1.bf16.msra.mxu0 %v1524_v29  ;;  %v1503_v54 = vpack.c.bf16 %v235_v52, %v232_v51  ;;  %v1533_v56 = vpack.c.bf16 %v237_v55, %v234_v53  ;;  %v440_v57 = vld [vmem:[%s2937_s4 + $0x8] sm:$0xff]  ;;  %v442_v58 = vld [vmem:[%s2937_s4 + $0x18] sm:$0xff]  ;;  %v2192_v63 = vld [vmem:[%s2942_s9] sm:$0x7f] }
  0x23   :  { %1526 = vmatprep.subr.bf16.mxu0 %v1862_v13  ;;  %v1535_v59 = vpack.c.bf16 %v442_v58, %v440_v57  ;;  %v2197_v0 = vld [vmem:[%s2942_s9 + $0x8] sm:$0x7f]  ;;  %v62_v1 = vrot.slane %v2192_v63, %v61_v62  ;;  %v439_v20 = vld [vmem:[%s2937_s4] sm:$0xff]  ;;  %v441_v21 = vld [vmem:[%s2937_s4 + $0x10] sm:$0xff] }
  0x24   :  { %v66_v2 = vrot.slane %v2197_v0, %v61_v62  ;;  %v444_v24 = vld [vmem:[%s2937_s4 + $0x28] sm:$0xff]  ;;  %v446_v25 = vld [vmem:[%s2937_s4 + $0x38] sm:$0xff]  ;;  %v1537_v29 = vpack.c.bf16 %v441_v21, %v439_v20  ;;  %v443_v34 = vld [vmem:[%s2937_s4 + $0x20] sm:$0xff] }
  0x25   :  { %1484 = vmatpush1.bf16.msra.mxu1 %v1483_v10  ;;  %v1539_v33 = vpack.c.bf16 %v446_v25, %v444_v24  ;;  %v445_v35 = vld [vmem:[%s2937_s4 + $0x30] sm:$0xff]  ;;  %v450_v39 = vld [vmem:[%s2937_s4 + $0x58] sm:$0xff]  ;;  %v451_v51 = vld [vmem:[%s2937_s4 + $0x60] sm:$0xff] }
  0x26   :  { %1486 = vmatprep.subr.bf16.mxu1 %v1485_v14  ;;  %1528 = vmatpush1.bf16.msra.mxu0 %v1527_v38  ;;  %v448_v38 = vld [vmem:[%s2937_s4 + $0x48] sm:$0xff]  ;;  %v1541_v42 = vpack.c.bf16 %v445_v35, %v443_v34  ;;  %v449_v46 = vld [vmem:[%s2937_s4 + $0x50] sm:$0xff]  ;;  %v454_v48 = vld [vmem:[%s2937_s4 + $0x78] sm:$0xff] }
  0x27   :  { %1529 = vmatprep.subr.bf16.mxu0 %v1862_v13  ;;  %v1543_v44 = vpack.c.bf16 %v450_v39, %v448_v38  ;;  %v453_v52 = vld [vmem:[%s2937_s4 + $0x70] sm:$0xff]  ;;  %v456_v53 = vld [vmem:[%s2937_s4 + $0x88] sm:$0xff]  ;;  %v455_v57 = vld [vmem:[%s2937_s4 + $0x80] sm:$0xff] }
  0x28   :  { %v1549_v55 = vpack.c.bf16 %v453_v52, %v451_v51  ;;  %v457_v58 = vld [vmem:[%s2937_s4 + $0x90] sm:$0xff]  ;;  %v462_v60 = vld [vmem:[%s2937_s4 + $0xb8] sm:$0xff]  ;;  %v476_v24 = vld [vmem:[%s2937_s4 + $0x128] sm:$0xff] }
  0x29   :  { %1488 = vmatpush1.bf16.msra.mxu1 %v1487_v18  ;;  %v1553_v62 = vpack.c.bf16 %v457_v58, %v455_v57  ;;  %v478_v25 = vld [vmem:[%s2937_s4 + $0x138] sm:$0xff]  ;;  %v479_v34 = vld [vmem:[%s2937_s4 + $0x140] sm:$0xff]  ;;  %v481_v35 = vld [vmem:[%s2937_s4 + $0x150] sm:$0xff] }
  0x2a   :  { %1490 = vmatprep.subr.bf16.mxu1 %v1489_v23  ;;  %1531 = vmatpush1.bf16.msra.mxu0 %v1530_v47  ;;  %v452_v47 = vld [vmem:[%s2937_s4 + $0x68] sm:$0xff]  ;;  %v486_v38 = vld [vmem:[%s2937_s4 + $0x178] sm:$0xff]  ;;  %v491_v52 = vld [vmem:[%s2937_s4 + $0x1a0] sm:$0xff] }
  0x2b   :  { %1532 = vmatprep.subr.bf16.mxu0 %v1862_v13  ;;  %v495_v58 = vld [vmem:[%s2937_s4 + $0x1c0] sm:$0xff] }
  0x2d   :  { %1492 = vmatpush1.bf16.msra.mxu1 %v1491_v27 }
  0x2e   :  { %1494 = vmatprep.subr.bf16.mxu1 %v1493_v32  ;;  %1534 = vmatpush1.bf16.msra.mxu0 %v1533_v56 }
  0x2f   :  { %1615 = vmatprep.subr.bf16.mxu0 %v1862_v13 }
  0x31   :  { %1496 = vmatpush1.bf16.msra.mxu1 %v1495_v36 }
  0x32   :  { %1498 = vmatprep.subr.bf16.mxu1 %v1497_v41 }
  0x35   :  { %1500 = vmatpush1.bf16.msra.mxu1 %v1499_v45  ;;  %v447_v45 = vld [vmem:[%s2937_s4 + $0x40] sm:$0xff] }
  0x36   :  { %1502 = vmatprep.subr.bf16.mxu1 %v1501_v50  ;;  %v1545_v49 = vpack.c.bf16 %v449_v46, %v447_v45  ;;  %v1547_v50 = vpack.c.bf16 %v454_v48, %v452_v47  ;;  %v487_v46 = vld [vmem:[%s2937_s4 + $0x180] sm:$0xff]  ;;  %v489_v47 = vld [vmem:[%s2937_s4 + $0x190] sm:$0xff] }
  0x37   :  { %v1585_v48 = vpack.c.bf16 %v489_v47, %v487_v46 }
  0x39   :  { %1504 = vmatpush1.bf16.msra.mxu1 %v1503_v54  ;;  %v458_v54 = vld [vmem:[%s2937_s4 + $0x98] sm:$0xff] }
  0x3a   :  { %1536 = vmatprep.subr.bf16.mxu1 %v1535_v59  ;;  %v1551_v56 = vpack.c.bf16 %v458_v54, %v456_v53  ;;  %v460_v59 = vld [vmem:[%s2937_s4 + $0xa8] sm:$0xff]  ;;  %v493_v53 = vld [vmem:[%s2937_s4 + $0x1b0] sm:$0xff] }
  0x3b   :  { %v1589_v54 = vpack.c.bf16 %v493_v53, %v491_v52 }
  0xe7   :  { %v147_v3 = vpop.f32.mrb[0].mxu1 }
  0xe8   :  { %v148_v4 = vadd.f32 %v147_v3, %v62_v1  ;;  %v149_v5 = vpop.f32.mrb[1].mxu1  ;;  %v461_v3 = vld [vmem:[%s2937_s4 + $0xb0] sm:$0xff] }
  0xe9   :  { %v150_v6 = vadd.f32 %v149_v5, %v66_v2  ;;  %v466_v5 = vld [vmem:[%s2937_s4 + $0xd8] sm:$0xff] }
  0xea   :  { %v162_v8 = vmul.f32 0.70710677, %v148_v4  ;;  %v158_v26 = vmul.f32 0.5, %v148_v4  ;;  %v464_v4 = vld [vmem:[%s2937_s4 + $0xc8] sm:$0xff] }
  0xeb   :  { %v163_v9 = vmul.f32 0.70710677, %v150_v6  ;;  %v153_v10 = vpop.f32.mrb[2].mxu1  ;;  %v159_v22 = vmul.f32 0.5, %v150_v6 }
  0xec   :  { %1795 = verf.f32 %v162_v8  ;;  %v154_v11 = vadd.f32 %v153_v10, %v62_v1  ;;  %v155_v12 = vpop.f32.mrb[3].mxu1  ;;  %v1555_v1 = vpack.c.bf16 %v462_v60, %v460_v59  ;;  %v1559_v8 = vpack.c.bf16 %v466_v5, %v464_v4  ;;  %v465_v10 = vld [vmem:[%s2937_s4 + $0xd0] sm:$0xff] }
  0xed   :  { %1797 = verf.f32 %v163_v9  ;;  %v156_v14 = vadd.f32 %v155_v12, %v66_v2  ;;  %v459_v2 = vld [vmem:[%s2937_s4 + $0xa0] sm:$0xff]  ;;  %v470_v12 = vld [vmem:[%s2937_s4 + $0xf8] sm:$0xff]  ;;  %v497_v59 = vld [vmem:[%s2937_s4 + $0x1d0] sm:$0xff] }
  0xee   :  { %v164_v15 = vmul.f32 0.70710677, %v154_v11  ;;  %v160_v40 = vmul.f32 0.5, %v154_v11  ;;  %v1557_v6 = vpack.c.bf16 %v461_v3, %v459_v2  ;;  %v463_v9 = vld [vmem:[%s2937_s4 + $0xc0] sm:$0xff]  ;;  %v468_v11 = vld [vmem:[%s2937_s4 + $0xe8] sm:$0xff]  ;;  %v1593_v60 = vpack.c.bf16 %v497_v59, %v495_v58  ;;  %v501_v4 = vld [vmem:[%s2937_s4 + $0x1f0] sm:$0xff] }
  0xef   :  { %v165_v16 = vmul.f32 0.70710677, %v156_v14  ;;  %v161_v36 = vmul.f32 0.5, %v156_v14  ;;  %v1561_v14 = vpack.c.bf16 %v465_v10, %v463_v9  ;;  %v499_v3 = vld [vmem:[%s2937_s4 + $0x1e0] sm:$0xff] }
  0xf0   :  { %1799 = verf.f32 %v164_v15  ;;  %v1563_v15 = vpack.c.bf16 %v470_v12, %v468_v11  ;;  %v1597_v5 = vpack.c.bf16 %v501_v4, %v499_v3  ;;  %v688_v10 = vld [vmem:[%s2938_s5] sm:$0xff]  ;;  %v689_v11 = vld [vmem:[%s2938_s5 + $0x8] sm:$0xff]  ;;  %v690_v12 = vld [vmem:[%s2938_s5 + $0x10] sm:$0xff] }
  0xf1   :  { %1801 = verf.f32 %v165_v16  ;;  %v467_v16 = vld [vmem:[%s2937_s4 + $0xe0] sm:$0xff] }
  0xf2   :  { %v503_v4 = vld [vmem:[%s2937_s4 + $0x200] sm:$0xff] }
  0xf6   :  { %v1796_v17 = vpop.eup %1795 }
  0xf7   :  { %v1798_v18 = vpop.eup %1797  ;;  %v170_v19 = vadd.f32 1.0, %v1796_v17  ;;  %v469_v17 = vld [vmem:[%s2937_s4 + $0xf0] sm:$0xff] }
  0xf8   :  { %v171_v23 = vadd.f32 1.0, %v1798_v18  ;;  %v472_v18 = vld [vmem:[%s2937_s4 + $0x108] sm:$0xff]  ;;  %v1565_v20 = vpack.c.bf16 %v469_v17, %v467_v16  ;;  %v692_v17 = vld [vmem:[%s2938_s5 + $0x20] sm:$0xff] }
  0xf9   :  { %v174_v31 = vmul.f32 %v170_v19, %v158_v26  ;;  %v474_v19 = vld [vmem:[%s2937_s4 + $0x118] sm:$0xff] }
  0xfa   :  { %v1800_v27 = vpop.eup %1799  ;;  %v175_v28 = vmul.f32 %v171_v23, %v159_v22  ;;  %v1567_v21 = vpack.c.bf16 %v474_v19, %v472_v18  ;;  %v471_v22 = vld [vmem:[%s2937_s4 + $0x100] sm:$0xff]  ;;  %v473_v23 = vld [vmem:[%s2937_s4 + $0x110] sm:$0xff]  ;;  %v693_v18 = vld [vmem:[%s2938_s5 + $0x28] sm:$0xff] }
  0xfb   :  { %v1802_v30 = vpop.eup %1801  ;;  %v172_v32 = vadd.f32 1.0, %v1800_v27  ;;  %v1569_v26 = vpack.c.bf16 %v473_v23, %v471_v22  ;;  %v1571_v27 = vpack.c.bf16 %v478_v25, %v476_v24  ;;  %v1622_v19 = vpack.c.bf16 %v693_v18, %v692_v17  ;;  %v696_v23 = vld [vmem:[%s2938_s5 + $0x40] sm:$0xff]  ;;  %v697_v24 = vld [vmem:[%s2938_s5 + $0x48] sm:$0xff] }
  0xfc   :  { %v173_v37 = vadd.f32 1.0, %v1802_v30  ;;  %1414 = vmatprep.mubr.msk.f32.mxu1 %vm250_vm4, %v175_v28  ;;  %1416 = vmatprep.mubr.msk.f32.mxu0 %vm250_vm4, %v175_v28  ;;  %v475_v28 = vld [vmem:[%s2937_s4 + $0x120] sm:$0xff]  ;;  %v480_v30 = vld [vmem:[%s2937_s4 + $0x148] sm:$0xff]  ;;  %v1628_v25 = vpack.c.bf16 %v697_v24, %v696_v23 }
  0xfd   :  { %322 = vmatmul.mubr.f32.vlgmr.msra.gmra.mrb[4].mxu1 %v174_v31  ;;  %399 = vmatmul.mubr.f32.vlgmr.msra.gmra.mrb[0].mxu0 %v174_v31  ;;  %v176_v43 = vmul.f32 %v172_v32, %v160_v40  ;;  %v482_v31 = vld [vmem:[%s2937_s4 + $0x158] sm:$0xff]  ;;  %v483_v40 = vld [vmem:[%s2937_s4 + $0x160] sm:$0xff] }
  0xfe   :  { %v177_v41 = vmul.f32 %v173_v37, %v161_v36  ;;  %1538 = vmatpush1.bf16.msra.mxu1 %v1537_v29  ;;  %v477_v29 = vld [vmem:[%s2937_s4 + $0x130] sm:$0xff]  ;;  %v1577_v36 = vpack.c.bf16 %v481_v35, %v479_v34  ;;  %v484_v37 = vld [vmem:[%s2937_s4 + $0x168] sm:$0xff]  ;;  %v704_v35 = vld [vmem:[%s2938_s5 + $0x80] sm:$0xff] }
  0xff   :  { %1540 = vmatprep.subr.bf16.mxu1 %v1539_v33  ;;  %v1573_v32 = vpack.c.bf16 %v477_v29, %v475_v28  ;;  %v1575_v33 = vpack.c.bf16 %v482_v31, %v480_v30  ;;  %v1579_v39 = vpack.c.bf16 %v486_v38, %v484_v37  ;;  %v700_v29 = vld [vmem:[%s2938_s5 + $0x60] sm:$0xff]  ;;  %v701_v30 = vld [vmem:[%s2938_s5 + $0x68] sm:$0xff]  ;;  %v240_v38 = vsub.s32 1, %v2186_v61 }
 0x100   :  { %1415 = vmatprep.mubr.msk.f32.mxu1 %vm250_vm4, %v177_v41  ;;  %1417 = vmatprep.mubr.msk.f32.mxu0 %vm250_vm4, %v177_v41  ;;  %v485_v41 = vld [vmem:[%s2937_s4 + $0x170] sm:$0xff]  ;;  %v1634_v31 = vpack.c.bf16 %v701_v30, %v700_v29 }
 0x101   :  { %328 = vmatmul.mubr.f32.gmra.mrb[6].mxu1 %v176_v43  ;;  %404 = vmatmul.mubr.f32.gmra.mrb[2].mxu0 %v176_v43  ;;  %v488_v43 = vld [vmem:[%s2937_s4 + $0x188] sm:$0xff] }
 0x102   :  { %1542 = vmatpush1.bf16.msra.mxu1 %v1541_v42  ;;  %v1581_v42 = vpack.c.bf16 %v485_v41, %v483_v40  ;;  %v245_v40 = vrot.slane %v2197_v0, %v240_v38 }
 0x103   :  { %1544 = vmatprep.subr.bf16.mxu1 %v1543_v44  ;;  %v490_v44 = vld [vmem:[%s2937_s4 + $0x198] sm:$0xff] }
 0x104   :  { %v1583_v45 = vpack.c.bf16 %v490_v44, %v488_v43 }
 0x106   :  { %1546 = vmatpush1.bf16.msra.mxu1 %v1545_v49  ;;  %v492_v49 = vld [vmem:[%s2937_s4 + $0x1a8] sm:$0xff] }
 0x107   :  { %1548 = vmatprep.subr.bf16.mxu1 %v1547_v50  ;;  %v494_v50 = vld [vmem:[%s2937_s4 + $0x1b8] sm:$0xff] }
 0x108   :  { %v1587_v51 = vpack.c.bf16 %v494_v50, %v492_v49 }
 0x10a   :  { %1550 = vmatpush1.bf16.msra.mxu1 %v1549_v55  ;;  %v496_v55 = vld [vmem:[%s2937_s4 + $0x1c8] sm:$0xff] }
 0x10b   :  { %1552 = vmatprep.subr.bf16.mxu1 %v1551_v56  ;;  %v498_v56 = vld [vmem:[%s2937_s4 + $0x1d8] sm:$0xff] }
 0x10c   :  { %v1591_v57 = vpack.c.bf16 %v498_v56, %v496_v55 }
 0x10e   :  { %1554 = vmatpush1.bf16.msra.mxu1 %v1553_v62  ;;  %v500_v62 = vld [vmem:[%s2937_s4 + $0x1e8] sm:$0xff] }
 0x10f   :  { %1556 = vmatprep.subr.bf16.mxu1 %v1555_v1  ;;  %v502_v1 = vld [vmem:[%s2937_s4 + $0x1f8] sm:$0xff] }
 0x110   :  { %v1595_v2 = vpack.c.bf16 %v502_v1, %v500_v62 }
 0x112   :  { %1558 = vmatpush1.bf16.msra.mxu1 %v1557_v6  ;;  %v504_v6 = vld [vmem:[%s2937_s4 + $0x208] sm:$0xff] }
 0x113   :  { %1560 = vmatprep.subr.bf16.mxu1 %v1559_v8  ;;  %v506_v8 = vld [vmem:[%s2937_s4 + $0x218] sm:$0xff] }
 0x114   :  { %v1599_v9 = vpack.c.bf16 %v506_v8, %v504_v6 }
 0x116   :  { %1562 = vmatpush1.bf16.msra.mxu1 %v1561_v14  ;;  %v1616_v14 = vpack.c.bf16 %v689_v11, %v688_v10  ;;  %v510_v10 = vld [vmem:[%s2937_s4 + $0x238] sm:$0xff] }
 0x117   :  { %1564 = vmatprep.subr.bf16.mxu1 %v1563_v15  ;;  %v691_v15 = vld [vmem:[%s2938_s5 + $0x18] sm:$0xff] }
 0x118   :  { %1617 = vmatpush1.bf16.msra.mxu0 %v1616_v14  ;;  %v1619_v16 = vpack.c.bf16 %v691_v15, %v690_v12 }
 0x119   :  { %1618 = vmatprep.subr.bf16.mxu0 %v1862_v13 }
 0x11a   :  { %1566 = vmatpush1.bf16.msra.mxu1 %v1565_v20  ;;  %v694_v20 = vld [vmem:[%s2938_s5 + $0x30] sm:$0xff] }
 0x11b   :  { %1568 = vmatprep.subr.bf16.mxu1 %v1567_v21  ;;  %v695_v21 = vld [vmem:[%s2938_s5 + $0x38] sm:$0xff] }
 0x11c   :  { %1620 = vmatpush1.bf16.msra.mxu0 %v1619_v16  ;;  %v1625_v22 = vpack.c.bf16 %v695_v21, %v694_v20  ;;  %v507_v21 = vld [vmem:[%s2937_s4 + $0x220] sm:$0xff] }
 0x11d   :  { %1621 = vmatprep.subr.bf16.mxu0 %v1862_v13 }
 0x11e   :  { %1570 = vmatpush1.bf16.msra.mxu1 %v1569_v26  ;;  %v698_v26 = vld [vmem:[%s2938_s5 + $0x50] sm:$0xff] }
 0x11f   :  { %1572 = vmatprep.subr.bf16.mxu1 %v1571_v27  ;;  %v699_v27 = vld [vmem:[%s2938_s5 + $0x58] sm:$0xff] }
 0x120   :  { %1623 = vmatpush1.bf16.msra.mxu0 %v1622_v19  ;;  %v1631_v28 = vpack.c.bf16 %v699_v27, %v698_v26  ;;  %v514_v26 = vld [vmem:[%s2937_s4 + $0x258] sm:$0xff] }
 0x121   :  { %1624 = vmatprep.subr.bf16.mxu0 %v1862_v13 }
 0x122   :  { %1574 = vmatpush1.bf16.msra.mxu1 %v1573_v32  ;;  %v702_v32 = vld [vmem:[%s2938_s5 + $0x70] sm:$0xff] }
 0x123   :  { %1576 = vmatprep.subr.bf16.mxu1 %v1575_v33  ;;  %v703_v33 = vld [vmem:[%s2938_s5 + $0x78] sm:$0xff] }
 0x124   :  { %1626 = vmatpush1.bf16.msra.mxu0 %v1625_v22  ;;  %v1637_v34 = vpack.c.bf16 %v703_v33, %v702_v32  ;;  %v509_v22 = vld [vmem:[%s2937_s4 + $0x230] sm:$0xff]  ;;  %v511_v32 = vld [vmem:[%s2937_s4 + $0x240] sm:$0xff] }
 0x125   :  { %1627 = vmatprep.subr.bf16.mxu0 %v1862_v13  ;;  %v1605_v29 = vpack.c.bf16 %v509_v22, %v507_v21  ;;  %v513_v33 = vld [vmem:[%s2937_s4 + $0x250] sm:$0xff]  ;;  %v710_v22 = vsub.s32 3, %v2186_v61 }
 0x126   :  { %1578 = vmatpush1.bf16.msra.mxu1 %v1577_v36  ;;  %v705_v36 = vld [vmem:[%s2938_s5 + $0x88] sm:$0xff] }
 0x127   :  { %1580 = vmatprep.subr.bf16.mxu1 %v1579_v39  ;;  %v1640_v37 = vpack.c.bf16 %v705_v36, %v704_v35  ;;  %v241_v39 = vrot.slane %v2192_v63, %v240_v38  ;;  %v518_v35 = vld [vmem:[%s2937_s4 + $0x278] sm:$0xff]  ;;  %v1609_v36 = vpack.c.bf16 %v513_v33, %v511_v32 }
 0x128   :  { %1629 = vmatpush1.bf16.msra.mxu0 %v1628_v25  ;;  %v512_v25 = vld [vmem:[%s2937_s4 + $0x248] sm:$0xff]  ;;  %v1020_v33 = vld [vmem:[%s2940_s7 + $0x18] sm:$0xff] }
 0x129   :  { %1630 = vmatprep.subr.bf16.mxu0 %v1862_v13 }
 0x12a   :  { %1582 = vmatpush1.bf16.msra.mxu1 %v1581_v42 }
 0x12b   :  { %1584 = vmatprep.subr.bf16.mxu1 %v1583_v45 }
 0x12c   :  { %1632 = vmatpush1.bf16.msra.mxu0 %v1631_v28 }
 0x12d   :  { %1633 = vmatprep.subr.bf16.mxu0 %v1862_v13 }
 0x12e   :  { %1586 = vmatpush1.bf16.msra.mxu1 %v1585_v48 }
 0x12f   :  { %1588 = vmatprep.subr.bf16.mxu1 %v1587_v51  ;;  %v2466_v51 = vld [vmem:[%s2942_s9 + $0x10] sm:$0x7f] }
 0x130   :  { %1635 = vmatpush1.bf16.msra.mxu0 %v1634_v31  ;;  %v1607_v31 = vpack.c.bf16 %v514_v26, %v512_v25  ;;  %v813_v26 = vld [vmem:[%s2939_s6 + $0x40] sm:$0xff] }
 0x131   :  { %1636 = vmatprep.subr.bf16.mxu0 %v1862_v13 }
 0x132   :  { %1590 = vmatpush1.bf16.msra.mxu1 %v1589_v54 }
 0x133   :  { %1592 = vmatprep.subr.bf16.mxu1 %v1591_v57  ;;  %v249_v57 = vrot.slane %v2466_v51, %v240_v38  ;;  %v515_v38 = vld [vmem:[%s2937_s4 + $0x260] sm:$0xff] }
 0x134   :  { %1638 = vmatpush1.bf16.msra.mxu0 %v1637_v34  ;;  %v516_v34 = vld [vmem:[%s2937_s4 + $0x268] sm:$0xff] }
 0x135   :  { %1639 = vmatprep.subr.bf16.mxu0 %v1862_v13 }
 0x136   :  { %1594 = vmatpush1.bf16.msra.mxu1 %v1593_v60 }
 0x137   :  { %1596 = vmatprep.subr.bf16.mxu1 %v1595_v2 }
 0x138   :  { %1641 = vmatpush1.bf16.msra.mxu0 %v1640_v37  ;;  %v1611_v37 = vpack.c.bf16 %v518_v35, %v516_v34 }
 0x139   :  { %1642 = vmatprep.subr.bf16.mxu0 %v1862_v13 }
 0x13a   :  { %1598 = vmatpush1.bf16.msra.mxu1 %v1597_v5  ;;  %v505_v5 = vld [vmem:[%s2937_s4 + $0x210] sm:$0xff] }
 0x13b   :  { %1600 = vmatprep.subr.bf16.mxu1 %v1599_v9  ;;  %v508_v9 = vld [vmem:[%s2937_s4 + $0x228] sm:$0xff]  ;;  %v1601_v16 = vpack.c.bf16 %v505_v5, %v503_v4 }
 0x13c   :  { %v1603_v20 = vpack.c.bf16 %v510_v10, %v508_v9 }
 0x1d0   :  { %v323_v41 = vpop.f32.mrb[4].mxu1  ;;  %v400_v42 = vpop.f32.mrb[0].mxu0 }
 0x1d1   :  { %v324_v43 = vadd.f32 %v323_v41, %v241_v39  ;;  %v325_v44 = vpop.f32.mrb[5].mxu1  ;;  %v402_v45 = vpop.f32.mrb[1].mxu0  ;;  %v401_v59 = vadd.f32 %v400_v42, %v249_v57 }
 0x1d2   :  { %v326_v46 = vadd.f32 %v325_v44, %v245_v40 }
 0x1d3   :  { %v415_v47 = vmul.f32 0.70710677, %v324_v43  ;;  %v417_v62 = vmul.f32 0.70710677, %v401_v59  ;;  %v409_v12 = vmul.f32 0.5, %v324_v43  ;;  %v411_v44 = vmul.f32 0.5, %v401_v59 }
 0x1d4   :  { %v416_v48 = vmul.f32 0.70710677, %v326_v46  ;;  %v329_v49 = vpop.f32.mrb[6].mxu1  ;;  %v405_v50 = vpop.f32.mrb[2].mxu0  ;;  %v410_v6 = vmul.f32 0.5, %v326_v46  ;;  %v521_v59 = vsub.s32 2, %v2186_v61 }
 0x1d5   :  { %1803 = verf.f32 %v415_v47  ;;  %v330_v52 = vadd.f32 %v329_v49, %v241_v39  ;;  %v331_v53 = vpop.f32.mrb[7].mxu1  ;;  %v407_v54 = vpop.f32.mrb[3].mxu0  ;;  %v406_v1 = vadd.f32 %v405_v50, %v249_v57  ;;  %v517_v39 = vld [vmem:[%s2937_s4 + $0x270] sm:$0xff]  ;;  %v707_v50 = vld [vmem:[%s2938_s5 + $0x98] sm:$0xff] }
 0x1d6   :  { %v332_v55 = vadd.f32 %v331_v53, %v245_v40  ;;  %1805 = verf.f32 %v416_v48  ;;  %v1613_v41 = vpack.c.bf16 %v517_v39, %v515_v38  ;;  %v706_v49 = vld [vmem:[%s2938_s5 + $0x90] sm:$0xff]  ;;  %v38_v53 = vld [vmem:[%s2934_s1] sm:$0xff]  ;;  %v806_v54 = vld [vmem:[%s2939_s6 + $0x8] sm:$0xff] }
 0x1d7   :  { %v418_v56 = vmul.f32 0.70710677, %v330_v52  ;;  %v420_v14 = vmul.f32 0.70710677, %v406_v1  ;;  %v412_v27 = vmul.f32 0.5, %v330_v52  ;;  %v414_v47 = vmul.f32 0.5, %v406_v1 }
 0x1d8   :  { %v419_v58 = vmul.f32 0.70710677, %v332_v55  ;;  %v413_v23 = vmul.f32 0.5, %v332_v55  ;;  %v1643_v52 = vpack.c.bf16 %v707_v50, %v706_v49  ;;  %v1864_v55 = vmov 0   ;;  %v805_v1 = vld [vmem:[%s2939_s6] sm:$0xff] }
 0x1d9   :  { %1807 = verf.f32 %v418_v56  ;;  %1794 = vset.pattern.permute.xlu0 %v1864_v55  ;;  %v809_v56 = vld [vmem:[%s2939_s6 + $0x20] sm:$0xff]  ;;  %v1032_v55 = vld [vmem:[%s2940_s7 + $0x78] sm:$0xff] }
 0x1da   :  { %1809 = verf.f32 %v419_v58  ;;  %1644 = vmatpush1.bf16.msra.mxu0 %v1643_v52  ;;  %795 = vperm.xlu0 %1794, %v38_v53   ;;  %v1645_v57 = vpack.c.bf16 %v809_v56, %v806_v54  ;;  %v39_v58 = vld [vmem:[%s2934_s1 + $0x8] sm:$0xff]  ;;  %v1017_v39 = vld [vmem:[%s2940_s7] sm:$0xff]  ;;  %v1027_v53 = vld [vmem:[%s2940_s7 + $0x50] sm:$0xff] }
 0x1db   :  { %1811 = verf.f32 %v417_v62  ;;  %v522_v62 = vrot.slane %v2192_v63, %v521_v59  ;;  %v1025_v52 = vld [vmem:[%s2940_s7 + $0x40] sm:$0xff]  ;;  %v1030_v54 = vld [vmem:[%s2940_s7 + $0x68] sm:$0xff] }
 0x1dc   :  { %1813 = verf.f32 %v420_v14  ;;  %1646 = vmatprep.subr.bf16.mxu0 %v1645_v57  ;;  %v815_v14 = vld [vmem:[%s2939_s6 + $0x50] sm:$0xff]  ;;  %v1671_v56 = vpack.c.bf16 %v1027_v53, %v1025_v52  ;;  %v1673_v57 = vpack.c.bf16 %v1032_v55, %v1030_v54  ;;  %v1068_v52 = vld [vmem:[%s2940_s7 + $0x198] sm:$0xff]  ;;  %v1065_v54 = vld [vmem:[%s2940_s7 + $0x180] sm:$0xff] }
 0x1dd   :  { %v1067_v55 = vld [vmem:[%s2940_s7 + $0x190] sm:$0xff] }
 0x1de   :  { %800 = vperm.xlu0 %1794, %v39_v58   ;;  %v1029_v58 = vld [vmem:[%s2940_s7 + $0x60] sm:$0xff] }
 0x1df   :  { %v1804_v60 = vpop.eup %1803 }
 0x1e0   :  { %v1806_v2 = vpop.eup %1805  ;;  %v427_v3 = vadd.f32 1.0, %v1804_v60  ;;  %v526_v60 = vrot.slane %v2197_v0, %v521_v59  ;;  %v1031_v59 = vld [vmem:[%s2940_s7 + $0x70] sm:$0xff] }
 0x1e1   :  { %v428_v8 = vadd.f32 1.0, %v1806_v2  ;;  %v808_v2 = vld [vmem:[%s2939_s6 + $0x18] sm:$0xff] }
 0x1e2   :  { %v433_v18 = vmul.f32 %v427_v3, %v409_v12  ;;  %v812_v12 = vld [vmem:[%s2939_s6 + $0x38] sm:$0xff] }
 0x1e3   :  { %v1808_v11 = vpop.eup %1807  ;;  %v434_v15 = vmul.f32 %v428_v8, %v410_v6  ;;  %v1647_v6 = vpack.c.bf16 %v808_v2, %v805_v1  ;;  %v1675_v1 = vpack.c.bf16 %v1031_v59, %v1029_v58  ;;  %v1072_v58 = vld [vmem:[%s2940_s7 + $0x1b8] sm:$0xff] }
 0x1e4   :  { %v1810_v17 = vpop.eup %1809  ;;  %v430_v19 = vadd.f32 1.0, %v1808_v11 }
 0x1e5   :  { %v431_v24 = vadd.f32 1.0, %v1810_v17  ;;  %598 = vmatprep.mubr.f32.mxu1 %v434_v15  ;;  %v1812_v40 = vpop.eup %1811  ;;  %v1649_v15 = vpack.c.bf16 %v815_v14, %v812_v12  ;;  %v814_v17 = vld [vmem:[%s2939_s6 + $0x48] sm:$0xff]  ;;  %v1044_v12 = vld [vmem:[%s2940_s7 + $0xd8] sm:$0xff] }
 0x1e6   :  { %599 = vmatmul.mubr.f32.vlgmr.msra.gmra.mrb[8].mxu1 %v433_v18  ;;  %v436_v30 = vmul.f32 %v430_v19, %v412_v27  ;;  %v429_v42 = vadd.f32 1.0, %v1812_v40  ;;  %v1814_v43 = vpop.eup %1813  ;;  %v807_v19 = vld [vmem:[%s2939_s6 + $0x10] sm:$0xff]  ;;  %v816_v27 = vld [vmem:[%s2939_s6 + $0x58] sm:$0xff] }
 0x1e7   :  { %1602 = vmatpush1.bf16.msra.mxu1 %v1601_v16  ;;  %v437_v28 = vmul.f32 %v431_v24, %v413_v23  ;;  %v432_v46 = vadd.f32 1.0, %v1814_v43  ;;  %v811_v16 = vld [vmem:[%s2939_s6 + $0x30] sm:$0xff]  ;;  %v711_v23 = vrot.slane %v2192_v63, %v710_v22  ;;  %v1018_v63 = vld [vmem:[%s2940_s7 + $0x8] sm:$0xff]  ;;  %v1045_v22 = vld [vmem:[%s2940_s7 + $0xe0] sm:$0xff] }
 0x1e8   :  { %1604 = vmatprep.subr.bf16.mxu1 %v1603_v20  ;;  %v435_v45 = vmul.f32 %v429_v42, %v411_v44  ;;  %v1651_v18 = vpack.c.bf16 %v814_v17, %v811_v16  ;;  %v810_v20 = vld [vmem:[%s2939_s6 + $0x28] sm:$0xff]  ;;  %v1661_v38 = vpack.c.bf16 %v1020_v33, %v1018_v63  ;;  %v1019_v40 = vld [vmem:[%s2940_s7 + $0x10] sm:$0xff]  ;;  %v1024_v42 = vld [vmem:[%s2940_s7 + $0x38] sm:$0xff] }
 0x1e9   :  { %604 = vmatprep.mubr.f32.mxu1 %v437_v28  ;;  %v438_v48 = vmul.f32 %v432_v46, %v414_v47  ;;  %v1653_v21 = vpack.c.bf16 %v810_v20, %v807_v19  ;;  %v1663_v43 = vpack.c.bf16 %v1019_v40, %v1017_v39  ;;  %v1023_v46 = vld [vmem:[%s2940_s7 + $0x30] sm:$0xff]  ;;  %v1026_v47 = vld [vmem:[%s2940_s7 + $0x48] sm:$0xff]  ;;  %v1041_v16 = vld [vmem:[%s2940_s7 + $0xc0] sm:$0xff] }
 0x1ea   :  { %605 = vmatmul.mubr.f32.gmra.mrb[10].mxu1 %v436_v30  ;;  %v1043_v17 = vld [vmem:[%s2940_s7 + $0xd0] sm:$0xff]  ;;  %v1048_v19 = vld [vmem:[%s2940_s7 + $0xf8] sm:$0xff] }
 0x1eb   :  { %1606 = vmatpush1.bf16.msra.mxu1 %v1605_v29  ;;  %675 = vmatprep.mubr.f32.mxu1 %v1861_v7  ;;  %v1687_v20 = vpack.c.bf16 %v1043_v17, %v1041_v16  ;;  %v1084_v16 = vld [vmem:[%s2940_s7 + $0x218] sm:$0xff] }
 0x1ec   :  { %1608 = vmatprep.subr.bf16.mxu1 %v1607_v31  ;;  %v1657_v31 = vpack.c.bf16 %v816_v27, %v813_v26  ;;  %v1052_v26 = vld [vmem:[%s2940_s7 + $0x118] sm:$0xff] }
 0x1ef   :  { %1610 = vmatpush1.bf16.msra.mxu1 %v1609_v36 }
 0x1f0   :  { %1612 = vmatprep.subr.bf16.mxu1 %v1611_v37 }
 0x1f3   :  { %1614 = vmatpush1.bf16.msra.mxu1 %v1613_v41  ;;  %v1022_v41 = vld [vmem:[%s2940_s7 + $0x28] sm:$0xff] }
 0x1f4   :  { %1741 = vmatprep.subr.bf16.mxu1 %v1862_v13  ;;  %v1665_v44 = vpack.c.bf16 %v1024_v42, %v1022_v41  ;;  %v1057_v41 = vld [vmem:[%s2940_s7 + $0x140] sm:$0xff]  ;;  %v1059_v42 = vld [vmem:[%s2940_s7 + $0x150] sm:$0xff] }
 0x1f6   :  { %1418 = vmatmul.mubr.msk.f32.vlgmr.msra.gmra.mrb[8].mxu1 %vm527_vm5, %v435_v45  ;;  %v1021_v45 = vld [vmem:[%s2940_s7 + $0x20] sm:$0xff] }
 0x1f7   :  { %681 = vmatprep.mubr.f32.mxu1 %v1861_v7  ;;  %v1667_v49 = vpack.c.bf16 %v1023_v46, %v1021_v45  ;;  %v1064_v45 = vld [vmem:[%s2940_s7 + $0x178] sm:$0xff] }
 0x1fa   :  { %1419 = vmatmul.mubr.msk.f32.gmra.mrb[10].mxu1 %vm527_vm5, %v438_v48  ;;  %v1028_v48 = vld [vmem:[%s2940_s7 + $0x58] sm:$0xff] }
 0x1fb   :  { %v1669_v50 = vpack.c.bf16 %v1028_v48, %v1026_v47  ;;  %v1061_v47 = vld [vmem:[%s2940_s7 + $0x160] sm:$0xff]  ;;  %v1063_v48 = vld [vmem:[%s2940_s7 + $0x170] sm:$0xff] }
 0x259   :  { %v2566_v24 = vpop.permute.xlu0 %795 }
 0x25d   :  { %v2582_v36 = vpop.permute.xlu0 %800 }
 0x2c9   :  { %v677_v3 = vpop.f32.mrb[8].mxu1 }
 0x2ca   :  { %v679_v4 = vpop.f32.mrb[9].mxu1  ;;  %v1771_v8 = vadd.f32 %v677_v3, %v522_v62  ;;  %v1033_v3 = vld [vmem:[%s2940_s7 + $0x80] sm:$0xff] }
 0x2cb   :  { %v1772_v5 = vadd.f32 %v679_v4, %v526_v60  ;;  %v1035_v4 = vld [vmem:[%s2940_s7 + $0x90] sm:$0xff] }
 0x2cd   :  { %v683_v9 = vpop.f32.mrb[10].mxu1  ;;  %1420 = vmatprep.mubr.msk.f32.mxu0 %vm250_vm4, %v1772_v5  ;;  %v1038_v5 = vld [vmem:[%s2940_s7 + $0xa8] sm:$0xff] }
 0x2ce   :  { %v685_v10 = vpop.f32.mrb[11].mxu1  ;;  %783 = vmatmul.mubr.f32.vlgmr.msra.gmra.mrb[4].mxu0 %v1771_v8  ;;  %v1773_v11 = vadd.f32 %v683_v9, %v522_v62  ;;  %v1036_v62 = vld [vmem:[%s2940_s7 + $0x98] sm:$0xff]  ;;  %v1679_v8 = vpack.c.bf16 %v1035_v4, %v1033_v3 }
 0x2cf   :  { %v1774_v0 = vadd.f32 %v685_v10, %v526_v60  ;;  %1648 = vmatpush1.bf16.msra.mxu0 %v1647_v6  ;;  %v1034_v60 = vld [vmem:[%s2940_s7 + $0x88] sm:$0xff]  ;;  %v1040_v6 = vld [vmem:[%s2940_s7 + $0xb8] sm:$0xff]  ;;  %v1037_v10 = vld [vmem:[%s2940_s7 + $0xa0] sm:$0xff] }
 0x2d0   :  { %1650 = vmatprep.subr.bf16.mxu0 %v1649_v15  ;;  %v1677_v2 = vpack.c.bf16 %v1036_v62, %v1034_v60  ;;  %v1681_v9 = vpack.c.bf16 %v1040_v6, %v1038_v5  ;;  %v1069_v60 = vld [vmem:[%s2940_s7 + $0x1a0] sm:$0xff]  ;;  %v1071_v62 = vld [vmem:[%s2940_s7 + $0x1b0] sm:$0xff]  ;;  %v1076_v3 = vld [vmem:[%s2940_s7 + $0x1d8] sm:$0xff] }
 0x2d1   :  { %1421 = vmatprep.mubr.msk.f32.mxu0 %vm250_vm4, %v1774_v0  ;;  %v1039_v0 = vld [vmem:[%s2940_s7 + $0xb0] sm:$0xff]  ;;  %v1073_v5 = vld [vmem:[%s2940_s7 + $0x1c0] sm:$0xff] }
 0x2d2   :  { %788 = vmatmul.mubr.f32.gmra.mrb[6].mxu0 %v1773_v11  ;;  %v1042_v11 = vld [vmem:[%s2940_s7 + $0xc8] sm:$0xff]  ;;  %v1683_v14 = vpack.c.bf16 %v1039_v0, %v1037_v10  ;;  %v1075_v6 = vld [vmem:[%s2940_s7 + $0x1d0] sm:$0xff]  ;;  %v1080_v10 = vld [vmem:[%s2940_s7 + $0x1f8] sm:$0xff] }
 0x2d3   :  { %899 = vmatprep.mubr.f32.mxu0 %v1861_v7  ;;  %1652 = vmatpush1.bf16.msra.mxu0 %v1651_v18  ;;  %v1685_v15 = vpack.c.bf16 %v1044_v12, %v1042_v11  ;;  %v1046_v18 = vld [vmem:[%s2940_s7 + $0xe8] sm:$0xff]  ;;  %v1077_v11 = vld [vmem:[%s2940_s7 + $0x1e0] sm:$0xff]  ;;  %v1079_v12 = vld [vmem:[%s2940_s7 + $0x1f0] sm:$0xff] }
 0x2d4   :  { %1654 = vmatprep.subr.bf16.mxu0 %v1653_v21 }
 0x3a1   :  { %v784_v25 = vpop.f32.mrb[4].mxu0 }
 0x3a2   :  { %v785_v28 = vadd.f32 %v784_v25, %v711_v23  ;;  %v786_v29 = vpop.f32.mrb[5].mxu0  ;;  %v1050_v25 = vld [vmem:[%s2940_s7 + $0x108] sm:$0xff] }
 0x3a3   :  { %v1049_v29 = vld [vmem:[%s2940_s7 + $0x100] sm:$0xff] }
 0x3a4   :  { %v803_v30 = vmul.f32 %v2566_v24, %v785_v28  ;;  %v1693_v28 = vpack.c.bf16 %v1052_v26, %v1050_v25  ;;  %v1289_v25 = vld [vmem:[%s2941_s8 + $0x20] sm:$0xff]  ;;  %v1290_v26 = vld [vmem:[%s2941_s8 + $0x28] sm:$0xff] }
 0x3a5   :  { %v789_v32 = vpop.f32.mrb[6].mxu0 }
 0x3a6   :  { %v790_v34 = vadd.f32 %v789_v32, %v711_v23  ;;  %v791_v35 = vpop.f32.mrb[7].mxu0  ;;  %1422 = vmatmul.mubr.msk.f32.vlgmr.msra.gmra.mrb[8].mxu0 %vm250_vm4, %v803_v30  ;;  %v1047_v23 = vld [vmem:[%s2940_s7 + $0xf0] sm:$0xff]  ;;  %v1056_v32 = vld [vmem:[%s2940_s7 + $0x138] sm:$0xff] }
 0x3a7   :  { %1656 = vmatpush3.bf16.msra.mxu0 %v1653_v21  ;;  %905 = vmatprep.mubr.f32.mxu0 %v1861_v7  ;;  %v1689_v21 = vpack.c.bf16 %v1048_v19, %v1046_v18  ;;  %v1691_v27 = vpack.c.bf16 %v1047_v23, %v1045_v22  ;;  %v1055_v35 = vld [vmem:[%s2940_s7 + $0x130] sm:$0xff]  ;;  %v1285_v18 = vld [vmem:[%s2941_s8] sm:$0xff]  ;;  %v1286_v19 = vld [vmem:[%s2941_s8 + $0x8] sm:$0xff] }
 0x3a8   :  { %v804_v37 = vmul.f32 %v2582_v36, %v790_v34  ;;  %1658 = vmatprep.subr.bf16.mxu0 %v1657_v31  ;;  %v1053_v34 = vld [vmem:[%s2940_s7 + $0x120] sm:$0xff]  ;;  %v1288_v22 = vld [vmem:[%s2941_s8 + $0x18] sm:$0xff] }
 0x3a9   :  { %v1699_v39 = vpack.c.bf16 %v1055_v35, %v1053_v34  ;;  %v2820_v34 = vld [vmem:[%s2942_s9] sm:$0x7f] }
 0x3aa   :  { %1423 = vmatmul.mubr.msk.f32.gmra.mrb[10].mxu0 %vm250_vm4, %v804_v37 }
 0x3ab   :  { %1660 = vmatpush3.bf16.msra.mxu0 %v1657_v31  ;;  %1444 = vmatprep.mubr.msk.f32.mxu0 %vm250_vm4, %v803_v30  ;;  %v1051_v30 = vld [vmem:[%s2940_s7 + $0x110] sm:$0xff]  ;;  %v1054_v31 = vld [vmem:[%s2940_s7 + $0x128] sm:$0xff] }
 0x3ac   :  { %1662 = vmatprep.subr.bf16.mxu0 %v1661_v38  ;;  %v1695_v63 = vpack.c.bf16 %v1051_v30, %v1049_v29  ;;  %v1697_v33 = vpack.c.bf16 %v1056_v32, %v1054_v31  ;;  %v1060_v38 = vld [vmem:[%s2940_s7 + $0x158] sm:$0xff]  ;;  %v1293_v31 = vld [vmem:[%s2941_s8 + $0x40] sm:$0xff]  ;;  %v1294_v32 = vld [vmem:[%s2941_s8 + $0x48] sm:$0xff] }
 0x3ad   :  { %v1292_v29 = vld [vmem:[%s2941_s8 + $0x38] sm:$0xff] }
 0x3ae   :  { %1445 = vmatmul.mubr.msk.f32.vlgmr.msra.gmra.mrb[12].mxu0 %vm250_vm4, %v804_v37  ;;  %v1058_v37 = vld [vmem:[%s2940_s7 + $0x148] sm:$0xff] }
 0x3af   :  { %1664 = vmatpush1.bf16.msra.mxu0 %v1663_v43  ;;  %v1701_v40 = vpack.c.bf16 %v1060_v38, %v1058_v37  ;;  %v1703_v43 = vpack.c.bf16 %v1059_v42, %v1057_v41  ;;  %v2826_v37 = vld [vmem:[%s2942_s9 + $0x8] sm:$0x7f] }
 0x3b0   :  { %1666 = vmatprep.subr.bf16.mxu0 %v1665_v44  ;;  %v1062_v44 = vld [vmem:[%s2940_s7 + $0x168] sm:$0xff] }
 0x3b1   :  { %v1705_v46 = vpack.c.bf16 %v1064_v45, %v1062_v44 }
 0x3b3   :  { %1668 = vmatpush1.bf16.msra.mxu0 %v1667_v49  ;;  %v1707_v49 = vpack.c.bf16 %v1063_v48, %v1061_v47 }
 0x3b4   :  { %1670 = vmatprep.subr.bf16.mxu0 %v1669_v50  ;;  %v1066_v50 = vld [vmem:[%s2940_s7 + $0x188] sm:$0xff] }
 0x3b5   :  { %v1709_v53 = vpack.c.bf16 %v1068_v52, %v1066_v50 }
 0x3b7   :  { %1672 = vmatpush1.bf16.msra.mxu0 %v1671_v56  ;;  %v1711_v56 = vpack.c.bf16 %v1067_v55, %v1065_v54 }
 0x3b8   :  { %1674 = vmatprep.subr.bf16.mxu0 %v1673_v57  ;;  %v1070_v57 = vld [vmem:[%s2940_s7 + $0x1a8] sm:$0xff] }
 0x3b9   :  { %v1713_v59 = vpack.c.bf16 %v1072_v58, %v1070_v57 }
 0x3bb   :  { %1676 = vmatpush1.bf16.msra.mxu0 %v1675_v1  ;;  %v1715_v1 = vpack.c.bf16 %v1071_v62, %v1069_v60  ;;  %v1081_v62 = vld [vmem:[%s2940_s7 + $0x200] sm:$0xff] }
 0x3bc   :  { %1678 = vmatprep.subr.bf16.mxu0 %v1677_v2  ;;  %v1074_v2 = vld [vmem:[%s2940_s7 + $0x1c8] sm:$0xff] }
 0x3bd   :  { %v1717_v4 = vpack.c.bf16 %v1076_v3, %v1074_v2  ;;  %v1086_v3 = vld [vmem:[%s2940_s7 + $0x228] sm:$0xff] }
 0x3bf   :  { %1680 = vmatpush1.bf16.msra.mxu0 %v1679_v8  ;;  %v1719_v8 = vpack.c.bf16 %v1075_v6, %v1073_v5 }
 0x3c0   :  { %1682 = vmatprep.subr.bf16.mxu0 %v1681_v9  ;;  %v1078_v9 = vld [vmem:[%s2940_s7 + $0x1e8] sm:$0xff] }
 0x3c1   :  { %v1721_v0 = vpack.c.bf16 %v1080_v10, %v1078_v9 }
 0x3c3   :  { %1684 = vmatpush1.bf16.msra.mxu0 %v1683_v14  ;;  %v1723_v14 = vpack.c.bf16 %v1079_v12, %v1077_v11 }
 0x3c4   :  { %1686 = vmatprep.subr.bf16.mxu0 %v1685_v15  ;;  %v1082_v15 = vld [vmem:[%s2940_s7 + $0x208] sm:$0xff] }
 0x3c5   :  { %v1725_v17 = vpack.c.bf16 %v1084_v16, %v1082_v15  ;;  %v1085_v15 = vld [vmem:[%s2940_s7 + $0x220] sm:$0xff]  ;;  %v1087_v16 = vld [vmem:[%s2940_s7 + $0x230] sm:$0xff] }
 0x3c7   :  { %1688 = vmatpush1.bf16.msra.mxu0 %v1687_v20  ;;  %v1287_v20 = vld [vmem:[%s2941_s8 + $0x10] sm:$0xff] }
 0x3c8   :  { %1690 = vmatprep.subr.bf16.mxu0 %v1689_v21  ;;  %v1742_v21 = vpack.c.bf16 %v1286_v19, %v1285_v18  ;;  %v1745_v23 = vpack.c.bf16 %v1288_v22, %v1287_v20  ;;  %v1090_v19 = vld [vmem:[%s2940_s7 + $0x248] sm:$0xff]  ;;  %v1092_v20 = vld [vmem:[%s2940_s7 + $0x258] sm:$0xff] }
 0x3ca   :  { %1743 = vmatpush1.bf16.msra.mxu1 %v1742_v21 }
 0x3cb   :  { %1692 = vmatpush1.bf16.msra.mxu0 %v1691_v27  ;;  %1744 = vmatprep.subr.bf16.mxu1 %v1862_v13  ;;  %v1748_v27 = vpack.c.bf16 %v1290_v26, %v1289_v25  ;;  %v1733_v26 = vpack.c.bf16 %v1092_v20, %v1090_v19 }
 0x3cc   :  { %1694 = vmatprep.subr.bf16.mxu0 %v1693_v28  ;;  %v1291_v28 = vld [vmem:[%s2941_s8 + $0x30] sm:$0xff] }
 0x3cd   :  { %v1751_v30 = vpack.c.bf16 %v1292_v29, %v1291_v28  ;;  %v1091_v28 = vld [vmem:[%s2940_s7 + $0x250] sm:$0xff]  ;;  %v1094_v29 = vld [vmem:[%s2940_s7 + $0x268] sm:$0xff] }
 0x3ce   :  { %1746 = vmatpush1.bf16.msra.mxu1 %v1745_v23  ;;  %v1731_v23 = vpack.c.bf16 %v1087_v16, %v1085_v15 }
 0x3cf   :  { %1696 = vmatpush1.bf16.msra.mxu0 %v1695_v63  ;;  %1747 = vmatprep.subr.bf16.mxu1 %v1862_v13  ;;  %v1754_v63 = vpack.c.bf16 %v1294_v32, %v1293_v31 }
 0x3d0   :  { %1698 = vmatprep.subr.bf16.mxu0 %v1697_v33  ;;  %v819_v33 = vsub.s32 4, %v2186_v61 }
 0x3d2   :  { %1749 = vmatpush1.bf16.msra.mxu1 %v1748_v27  ;;  %v820_v35 = vrot.slane %v2820_v34, %v819_v33  ;;  %v824_v38 = vrot.slane %v2826_v37, %v819_v33  ;;  %v828_v50 = vrot.slane %v2466_v51, %v819_v33  ;;  %v1089_v27 = vld [vmem:[%s2940_s7 + $0x240] sm:$0xff]  ;;  %v1095_v33 = vld [vmem:[%s2940_s7 + $0x270] sm:$0xff] }
 0x3d3   :  { %1700 = vmatpush1.bf16.msra.mxu0 %v1699_v39  ;;  %1750 = vmatprep.subr.bf16.mxu1 %v1862_v13  ;;  %v1735_v31 = vpack.c.bf16 %v1091_v28, %v1089_v27 }
 0x3d4   :  { %1702 = vmatprep.subr.bf16.mxu0 %v1701_v40 }
 0x3d6   :  { %1752 = vmatpush1.bf16.msra.mxu1 %v1751_v30  ;;  %v1096_v30 = vld [vmem:[%s2940_s7 + $0x278] sm:$0xff] }
 0x3d7   :  { %1704 = vmatpush1.bf16.msra.mxu0 %v1703_v43  ;;  %1753 = vmatprep.subr.bf16.mxu1 %v1862_v13  ;;  %v1737_v32 = vpack.c.bf16 %v1096_v30, %v1094_v29  ;;  %v1307_v30 = vsub.s32 6, %v2186_v61 }
 0x3d8   :  { %1706 = vmatprep.subr.bf16.mxu0 %v1705_v46 }
 0x3da   :  { %1755 = vmatpush1.bf16.msra.mxu1 %v1754_v63  ;;  %v1093_v63 = vld [vmem:[%s2940_s7 + $0x260] sm:$0xff] }
 0x3db   :  { %1708 = vmatpush1.bf16.msra.mxu0 %v1707_v49  ;;  %1756 = vmatprep.subr.bf16.mxu1 %v1862_v13 }
 0x3dc   :  { %1710 = vmatprep.subr.bf16.mxu0 %v1709_v53 }
 0x3df   :  { %1712 = vmatpush1.bf16.msra.mxu0 %v1711_v56 }
 0x3e0   :  { %1714 = vmatprep.subr.bf16.mxu0 %v1713_v59 }
 0x3e3   :  { %1716 = vmatpush1.bf16.msra.mxu0 %v1715_v1  ;;  %v1083_v1 = vld [vmem:[%s2940_s7 + $0x210] sm:$0xff] }
 0x3e4   :  { %1718 = vmatprep.subr.bf16.mxu0 %v1717_v4  ;;  %v1088_v4 = vld [vmem:[%s2940_s7 + $0x238] sm:$0xff]  ;;  %v1727_v10 = vpack.c.bf16 %v1083_v1, %v1081_v62  ;;  %v1099_v62 = vsub.s32 5, %v2186_v61 }
 0x3e6   :  { %v1100_v1 = vrot.slane %v2820_v34, %v1099_v62 }
 0x3e7   :  { %1720 = vmatpush1.bf16.msra.mxu0 %v1719_v8 }
 0x3e8   :  { %1722 = vmatprep.subr.bf16.mxu0 %v1721_v0 }
 0x3eb   :  { %1724 = vmatpush1.bf16.msra.mxu0 %v1723_v14  ;;  %v1729_v14 = vpack.c.bf16 %v1088_v4, %v1086_v3 }
 0x3ec   :  { %1726 = vmatprep.subr.bf16.mxu0 %v1725_v17 }
 0x479   :  { %v901_v39 = vpop.f32.mrb[8].mxu0 }
 0x47a   :  { %v902_v40 = vadd.f32 %v901_v39, %v820_v35  ;;  %v903_v41 = vpop.f32.mrb[9].mxu0 }
 0x47b   :  { %v904_v42 = vadd.f32 %v903_v41, %v824_v38 }
 0x47c   :  { %v993_v43 = vmul.f32 0.70710677, %v902_v40  ;;  %v987_v5 = vmul.f32 0.5, %v902_v40 }
 0x47d   :  { %v994_v44 = vmul.f32 0.70710677, %v904_v42  ;;  %v907_v45 = vpop.f32.mrb[10].mxu0  ;;  %v988_v51 = vmul.f32 0.5, %v904_v42 }
 0x47e   :  { %1815 = verf.f32 %v993_v43  ;;  %v908_v46 = vadd.f32 %v907_v45, %v820_v35  ;;  %v909_v47 = vpop.f32.mrb[11].mxu0 }
 0x47f   :  { %1817 = verf.f32 %v994_v44  ;;  %v910_v48 = vadd.f32 %v909_v47, %v824_v38  ;;  %v1739_v38 = vpack.c.bf16 %v1095_v33, %v1093_v63  ;;  %v1296_v47 = vld [vmem:[%s2941_s8 + $0x58] sm:$0xff] }
 0x480   :  { %v996_v49 = vmul.f32 0.70710677, %v908_v46  ;;  %v990_v21 = vmul.f32 0.5, %v908_v46  ;;  %v1295_v46 = vld [vmem:[%s2941_s8 + $0x50] sm:$0xff] }
 0x481   :  { %v997_v52 = vmul.f32 0.70710677, %v910_v48  ;;  %v1446_v53 = vpop.f32.mrb[12].mxu0  ;;  %v991_v17 = vmul.f32 0.5, %v910_v48  ;;  %v1757_v48 = vpack.c.bf16 %v1296_v47, %v1295_v46 }
 0x482   :  { %1819 = verf.f32 %v996_v49  ;;  %v978_v54 = vpop.f32.mrb[13].mxu0  ;;  %v984_v57 = vadd.f32 %v1446_v53, %v828_v50  ;;  %v1297_v49 = vld [vmem:[%s2941_s8 + $0x60] sm:$0xff]  ;;  %v1300_v53 = vld [vmem:[%s2941_s8 + $0x78] sm:$0xff] }
 0x483   :  { %1821 = verf.f32 %v997_v52  ;;  %v979_v55 = vadd.f32 %v978_v54, %v828_v50  ;;  %1758 = vmatpush1.bf16.msra.mxu1 %v1757_v48  ;;  %v1299_v52 = vld [vmem:[%s2941_s8 + $0x70] sm:$0xff] }
 0x484   :  { %v998_v8 = vmul.f32 0.70710677, %v984_v57  ;;  %v992_v44 = vmul.f32 0.5, %v984_v57  ;;  %1759 = vmatprep.subr.bf16.mxu1 %v1862_v13  ;;  %v1763_v54 = vpack.c.bf16 %v1300_v53, %v1299_v52 }
 0x485   :  { %v995_v58 = vmul.f32 0.70710677, %v979_v55  ;;  %v989_v41 = vmul.f32 0.5, %v979_v55  ;;  %v1301_v55 = vld [vmem:[%s2941_s8 + $0x80] sm:$0xff] }
 0x487   :  { %1823 = verf.f32 %v995_v58  ;;  %v1303_v58 = vld [vmem:[%s2941_s8 + $0x90] sm:$0xff] }
 0x488   :  { %v1816_v56 = vpop.eup %1815  ;;  %1825 = verf.f32 %v998_v8 }
 0x489   :  { %v1818_v59 = vpop.eup %1817  ;;  %v1005_v60 = vadd.f32 1.0, %v1816_v56  ;;  %v1302_v56 = vld [vmem:[%s2941_s8 + $0x88] sm:$0xff] }
 0x48a   :  { %v1006_v2 = vadd.f32 1.0, %v1818_v59  ;;  %v1766_v57 = vpack.c.bf16 %v1302_v56, %v1301_v55  ;;  %v1304_v59 = vld [vmem:[%s2941_s8 + $0x98] sm:$0xff] }
 0x48b   :  { %v1011_v11 = vmul.f32 %v1005_v60, %v987_v5  ;;  %v1769_v60 = vpack.c.bf16 %v1304_v59, %v1303_v58 }
 0x48c   :  { %v1820_v6 = vpop.eup %1819  ;;  %v1012_v9 = vmul.f32 %v1006_v2, %v988_v51  ;;  %v1104_v51 = vrot.slane %v2826_v37, %v1099_v62 }
 0x48d   :  { %v1822_v0 = vpop.eup %1821  ;;  %v1008_v12 = vadd.f32 1.0, %v1820_v6 }
 0x48e   :  { %v1009_v18 = vadd.f32 1.0, %v1822_v0  ;;  %1175 = vmatprep.mubr.f32.mxu0 %v1012_v9 }
 0x48f   :  { %1176 = vmatmul.mubr.f32.vlgmr.msra.gmra.mrb[14].mxu0 %v1011_v11  ;;  %v1014_v25 = vmul.f32 %v1008_v12, %v990_v21 }
 0x490   :  { %1728 = vmatpush1.bf16.msra.mxu0 %v1727_v10  ;;  %v1015_v22 = vmul.f32 %v1009_v18, %v991_v17 }
 0x491   :  { %1730 = vmatprep.subr.bf16.mxu0 %v1729_v14  ;;  %v1824_v35 = vpop.eup %1823 }
 0x492   :  { %1181 = vmatprep.mubr.f32.mxu0 %v1015_v22  ;;  %v1007_v39 = vadd.f32 1.0, %v1824_v35  ;;  %v1826_v40 = vpop.eup %1825 }
 0x493   :  { %1182 = vmatmul.mubr.f32.gmra.mrb[16].mxu0 %v1014_v25  ;;  %v1010_v42 = vadd.f32 1.0, %v1826_v40 }
 0x494   :  { %1732 = vmatpush1.bf16.msra.mxu0 %v1731_v23  ;;  %1252 = vmatprep.mubr.f32.mxu0 %v1861_v7  ;;  %v1013_v43 = vmul.f32 %v1007_v39, %v989_v41 }
 0x495   :  { %1734 = vmatprep.subr.bf16.mxu0 %v1733_v26  ;;  %v1016_v45 = vmul.f32 %v1010_v42, %v992_v44 }
 0x498   :  { %1736 = vmatpush1.bf16.msra.mxu0 %v1735_v31  ;;  %v1308_v31 = vrot.slane %v2820_v34, %v1307_v30 }
 0x499   :  { %1738 = vmatprep.subr.bf16.mxu0 %v1737_v32 }
 0x49c   :  { %1740 = vmatpush1.bf16.msra.mxu0 %v1739_v38 }
 0x49f   :  { %1426 = vmatmul.mubr.msk.f32.vlgmr.msra.gmra.mrb[14].mxu0 %vm527_vm5, %v1013_v43 }
 0x4a0   :  { %1258 = vmatprep.mubr.f32.mxu0 %v1861_v7  ;;  %v1298_v7 = vld [vmem:[%s2941_s8 + $0x68] sm:$0xff]  ;;  %s1865_s8 = smov [#allocation2]  }
 0x4a1   :  { %v1760_v50 = vpack.c.bf16 %v1298_v7, %v1297_v49  ;;  %s1399_s27 = sshll.u32 %s1865_s8, 4  ;;  %s1400_s27 = int_to_ptr.vmem [resolvable:$true] %s1399_s27 }
 0x4a2   :  { %s1837_s28 = scalar_lea.vmem %s1400_s27, 256  ;;  %p1842_p1 = scmp.lt.s32.totalorder %s1400_s27, %s1400_s27 }
 0x4a3   :  { %1427 = vmatmul.mubr.msk.f32.gmra.mrb[16].mxu0 %vm527_vm5, %v1016_v45  ;;  %1761 = vmatpush1.bf16.msra.mxu1 %v1760_v50  ;;  %p1838_p0 = scmp.ne.s32.totalorder %s1400_s27, %s1837_s28  ;;  %p1843_p2 = scmp.lt.s32.totalorder %s1837_s28, %s1837_s28 }
 0x4a4   :  { %1762 = vmatprep.subr.bf16.mxu1 %v1862_v13 }
 0x4a5   :  { %p1844_p3 = por %p1843_p2, %p1842_p1 }
 0x4a7   :  { %1764 = vmatpush1.bf16.msra.mxu1 %v1763_v54  ;;  %p1845_p4 = pnand %p1844_p3, %p1838_p0 }
 0x4a8   :  { %1765 = vmatprep.subr.bf16.mxu1 %v1862_v13 }
 0x4ab   :  { %1767 = vmatpush1.bf16.msra.mxu1 %v1766_v57 }
 0x4ac   :  { %1768 = vmatprep.subr.bf16.mxu1 %v1862_v13 }
 0x4af   :  { %1770 = vmatpush1.bf16.msra.mxu1 %v1769_v60 }
 0x572   :  { %v1254_v2 = vpop.f32.mrb[14].mxu0 }
 0x573   :  { %v1775_v3 = vadd.f32 %v1254_v2, %v1100_v1  ;;  %v1256_v4 = vpop.f32.mrb[15].mxu0 }
 0x574   :  { %v1776_v13 = vadd.f32 %v1256_v4, %v1104_v51 }
 0x575   :  { %v1269_v5 = vmul.f32 0.70710677, %v1775_v3  ;;  %v1265_v18 = vmul.f32 0.5, %v1775_v3 }
 0x576   :  { %v1270_v6 = vmul.f32 0.70710677, %v1776_v13  ;;  %v1260_v8 = vpop.f32.mrb[16].mxu0  ;;  %v1266_v37 = vmul.f32 0.5, %v1776_v13 }
 0x577   :  { %1827 = verf.f32 %v1269_v5  ;;  %v1777_v9 = vadd.f32 %v1260_v8, %v1100_v1  ;;  %v1262_v10 = vpop.f32.mrb[17].mxu0 }
 0x578   :  { %1829 = verf.f32 %v1270_v6  ;;  %v1778_v0 = vadd.f32 %v1262_v10, %v1104_v51 }
 0x579   :  { %v1271_v11 = vmul.f32 0.70710677, %v1777_v9  ;;  %v1267_v27 = vmul.f32 0.5, %v1777_v9 }
 0x57a   :  { %v1272_v12 = vmul.f32 0.70710677, %v1778_v0  ;;  %v1268_v25 = vmul.f32 0.5, %v1778_v0 }
 0x57b   :  { %1831 = verf.f32 %v1271_v11 }
 0x57c   :  { %1833 = verf.f32 %v1272_v12 }
 0x581   :  { %v1828_v14 = vpop.eup %1827 }
 0x582   :  { %v1830_v15 = vpop.eup %1829  ;;  %v1277_v16 = vadd.f32 1.0, %v1828_v14 }
 0x583   :  { %v1278_v17 = vadd.f32 1.0, %v1830_v15 }
 0x584   :  { %v1281_v22 = vmul.f32 %v1277_v16, %v1265_v18 }
 0x585   :  { %v1832_v19 = vpop.eup %1831  ;;  %v1282_v20 = vmul.f32 %v1278_v17, %v1266_v37 }
 0x586   :  { %v1834_v21 = vpop.eup %1833  ;;  %v1279_v23 = vadd.f32 1.0, %v1832_v19 }
 0x587   :  { %v1280_v26 = vadd.f32 1.0, %v1834_v21  ;;  %1428 = vmatprep.mubr.msk.f32.mxu1 %vm250_vm4, %v1282_v20 }
 0x588   :  { %1380 = vmatmul.mubr.f32.vlgmr.msra.gmra.mrb[12].mxu1 %v1281_v22  ;;  %v1283_v29 = vmul.f32 %v1279_v23, %v1267_v27 }
 0x589   :  { %v1284_v28 = vmul.f32 %v1280_v26, %v1268_v25 }
 0x58b   :  { %1429 = vmatprep.mubr.msk.f32.mxu1 %vm250_vm4, %v1284_v28 }
 0x58c   :  { %1385 = vmatmul.mubr.f32.gmra.mrb[14].mxu1 %v1283_v29 }
 0x65b   :  { %v1381_v32 = vpop.f32.mrb[12].mxu1 }
 0x65c   :  { %v1382_v63 = vadd.f32 %v1381_v32, %v1308_v31  ;;  %v1383_v33 = vpop.f32.mrb[13].mxu1 }
 0x65e   :  { %v1390_v35 = vmul.f32 %v1382_v63, %v2566_v24 }
 0x65f   :  { %v1386_v38 = vpop.f32.mrb[14].mxu1 }
 0x660   :  { %1392 = vst.msk [vmem:[#allocation2] sm:$0xff] %vm67_vm3, %v1390_v35  ;;  %v1387_v39 = vadd.f32 %v1386_v38, %v1308_v31  ;;  %v1388_v40 = vpop.f32.mrb[15].mxu1 }
 0x662   :  { %v1391_v41 = vmul.f32 %v1387_v39, %v2582_v36 }
 0x664   :  { %1393 = vst.msk [vmem:[#allocation2 + $0x8] sm:$0xff] %vm67_vm3, %v1391_v41 }
 0x665   :  { %1848 = shalt.err (!%p1845_p4)
}
 0x666   :  { %s1849_s0 = scalar_lea.hbm %s2943_s10, 256 }
 0x667   :  { %p1850_p5 = scmp.ne.s32.totalorder %s2943_s10, %s1849_s0  ;;  %p1853_p6 = scmp.lt.u32.totalorder %s1849_s0, %s2943_s10 }
 0x669   :  { %p1855_p7 = pnand %p1853_p6, %p1850_p5 }
 0x66b   :  { %1858 = shalt.err (!%p1855_p7)
}
 0x66c   :  { %s1866_s9 = smov 128   ;;  %s1867_s7 = smov 8  }
 0x66d   :  { %1405 = dma.vmem_to_hbm [thread:$0]  %s1400_s27, 256, %s2943_s10, [#allocation3], %s1866_s9, %s1866_s9, %s1867_s7  }
 0x66e   :  { %1859 = dma.done.wait [#allocation3], 256  }
 0x66f   :  { %1860 = vsyncadd [#allocation3], 4294967040 }
 0x670   :  { %1409 = vsyncpa [#allocation3], 1 }

// kernel: scene_graph_transformer_forward.3
= control target key start
LH: loop header
LB: loop body
LE: loop exit
PB: predicated region body
PF: predicated region fallthrough
CT: control target
= control target key end

     0   :  { %v6603_v5 = vmov 0.0   ;;  %vm134_vm0 = vcmask 1046528   ;;  %v6605_v8 = vmov 0.0|0.0   ;;  %vm85_vm1 = vcmask 187392   ;;  %s6592_s0 = inlined_call_operand.vmem [shape: f32[128,23], index: 0, kind: input, shape index: {}]   ;;  %s6593_s1 = inlined_call_operand.vmem [shape: f32[128,1], index: 1, kind: input, shape index: {}]   ;;  %s6594_s2 = inlined_call_operand.vmem [shape: f32[23,160], index: 2, kind: input, shape index: {}]   ;;  %s6595_s3 = inlined_call_operand.vmem [shape: f32[160,320], index: 3, kind: input, shape index: {}]   ;;  %s6596_s4 = inlined_call_operand.vmem [shape: f32[320,160], index: 4, kind: input, shape index: {}]   ;;  %s6597_s5 = inlined_call_operand.vmem [shape: f32[160,32], index: 5, kind: input, shape index: {}]   ;;  %s6598_s6 = inlined_call_operand.vmem [shape: f32[32,320], index: 6, kind: input, shape index: {}]   ;;  %s6599_s7 = inlined_call_operand.vmem [shape: f32[320,160], index: 7, kind: input, shape index: {}]   ;;  %s6600_s8 = inlined_call_operand.vmem [shape: f32[160,23], index: 8, kind: input, shape index: {}]   ;;  %s6601_s9 = inlined_call_operand.vmem [shape: f32[7,320], index: 9, kind: input, shape index: {}]   ;;  %s6602_s10 = inlined_call_operand.hbm [shape: f32[128,23], index: 10, kind: output, shape index: {}]  }
   0x1   :  { %v72_v0 = vld [vmem:[%s6594_s2 + $0x8] sm:$0xff]  ;;  %v74_v1 = vld [vmem:[%s6594_s2 + $0x18] sm:$0xff]  ;;  %v71_v2 = vld [vmem:[%s6594_s2] sm:$0xff]  ;;  %205 = vmatprep.mubr.f32.mxu1 %v6603_v5  ;;  %3644 = vmatprep.subr.bf16.mxu0 %v6605_v8 }
   0x2   :  { %v3600_v3 = vpack.c.bf16 %v74_v1, %v72_v0  ;;  %v73_v4 = vld [vmem:[%s6594_s2 + $0x10] sm:$0xff]  ;;  %v76_v7 = vld [vmem:[%s6594_s2 + $0x28] sm:$0x7f]  ;;  %v75_v9 = vld [vmem:[%s6594_s2 + $0x20] sm:$0x7f] }
   0x3   :  { %v3602_v6 = vpack.c.bf16 %v73_v4, %v71_v2  ;;  %v36_v10 = vld [vmem:[%s6592_s0] sm:$0xff]  ;;  %v463_v11 = vld [vmem:[%s6595_s3 + $0x8] sm:$0xff]  ;;  %v465_v15 = vld [vmem:[%s6595_s3 + $0x18] sm:$0xff] }
   0x4   :  { %3601 = vmatprep.subr.bf16.mxu1 %v3600_v3  ;;  %v466_v12 = vld [vmem:[%s6595_s3 + $0x20] sm:$0xff]  ;;  %v469_v16 = vld [vmem:[%s6595_s3 + $0x38] sm:$0xff]  ;;  %v472_v18 = vld [vmem:[%s6595_s3 + $0x50] sm:$0xff] }
   0x5   :  { %3603 = vmatpush1.bf16.msra.mxu1 %v3602_v6  ;;  %v3604_v13 = vpack.c.bf16 %v466_v12, %v463_v11  ;;  %v462_v14 = vld [vmem:[%s6595_s3] sm:$0xff]  ;;  %v468_v19 = vld [vmem:[%s6595_s3 + $0x30] sm:$0xff]  ;;  %v471_v20 = vld [vmem:[%s6595_s3 + $0x48] sm:$0xff]  ;;  %v3608_v22 = vpack.c.bf16 %v472_v18, %v469_v16 }
   0x6   :  { %3402 = vmatprep.subr.msk.mxu1 %vm134_vm0, %v76_v7  ;;  %v3606_v17 = vpack.c.bf16 %v465_v15, %v462_v14  ;;  %v37_v21 = vld [vmem:[%s6592_s0 + $0x8] sm:$0xff]  ;;  %v478_v24 = vld [vmem:[%s6595_s3 + $0x80] sm:$0xff]  ;;  %v3610_v25 = vpack.c.bf16 %v471_v20, %v468_v19  ;;  %v477_v28 = vld [vmem:[%s6595_s3 + $0x78] sm:$0xff] }
   0x7   :  { %v475_v23 = vld [vmem:[%s6595_s3 + $0x68] sm:$0xff]  ;;  %v474_v27 = vld [vmem:[%s6595_s3 + $0x60] sm:$0xff]  ;;  %v481_v29 = vld [vmem:[%s6595_s3 + $0x98] sm:$0xff] }
   0x8   :  { %v3612_v26 = vpack.c.bf16 %v478_v24, %v475_v23  ;;  %v484_v30 = vld [vmem:[%s6595_s3 + $0xb0] sm:$0xff]  ;;  %v467_v32 = vld [vmem:[%s6595_s3 + $0x28] sm:$0xff]  ;;  %v470_v35 = vld [vmem:[%s6595_s3 + $0x40] sm:$0xff]  ;;  %v3614_v36 = vpack.c.bf16 %v477_v28, %v474_v27 }
   0x9   :  { %3403 = vmatpush1.msk.msra.mxu1 %vm134_vm0, %v75_v9  ;;  %v464_v31 = vld [vmem:[%s6595_s3 + $0x10] sm:$0xff]  ;;  %v473_v37 = vld [vmem:[%s6595_s3 + $0x58] sm:$0xff]  ;;  %v3616_v38 = vpack.c.bf16 %v484_v30, %v481_v29  ;;  %v483_v40 = vld [vmem:[%s6595_s3 + $0xa8] sm:$0xff] }
   0xa   :  { %3404 = vmatmul.mubr.msk.f32.vlgmr.msra.gmra.mrb[0].mxu1 %vm85_vm1, %v36_v10  ;;  %3605 = vmatprep.subr.bf16.mxu1 %v3604_v13  ;;  %v38_v33 = vld [vmem:[%s6592_s0 + $0x10] sm:$0xff]  ;;  %v3645_v34 = vpack.c.bf16 %v467_v32, %v464_v31  ;;  %v487_v41 = vld [vmem:[%s6595_s3 + $0xc8] sm:$0xff]  ;;  %v3648_v42 = vpack.c.bf16 %v473_v37, %v470_v35  ;;  %v490_v43 = vld [vmem:[%s6595_s3 + $0xe0] sm:$0xff] }
   0xb   :  { %211 = vmatprep.mubr.f32.mxu1 %v6603_v5  ;;  %3607 = vmatpush1.bf16.msra.mxu1 %v3606_v17  ;;  %v480_v39 = vld [vmem:[%s6595_s3 + $0x90] sm:$0xff]  ;;  %v479_v45 = vld [vmem:[%s6595_s3 + $0x88] sm:$0xff]  ;;  %v39_v46 = vld [vmem:[%s6592_s0 + $0x18] sm:$0xff]  ;;  %v3620_v49 = vpack.c.bf16 %v490_v43, %v487_v41 }
   0xc   :  { %3609 = vmatprep.subr.bf16.mxu1 %v3608_v22  ;;  %3646 = vmatpush1.bf16.msra.mxu0 %v3645_v34  ;;  %v476_v44 = vld [vmem:[%s6595_s3 + $0x70] sm:$0xff]  ;;  %v3618_v47 = vpack.c.bf16 %v483_v40, %v480_v39  ;;  %v486_v48 = vld [vmem:[%s6595_s3 + $0xc0] sm:$0xff]  ;;  %v489_v50 = vld [vmem:[%s6595_s3 + $0xd8] sm:$0xff] }
   0xd   :  { %3647 = vmatprep.subr.bf16.mxu0 %v6605_v8  ;;  %v493_v51 = vld [vmem:[%s6595_s3 + $0xf8] sm:$0xff]  ;;  %v3651_v52 = vpack.c.bf16 %v479_v45, %v476_v44 }
   0xe   :  { %3405 = vmatmul.mubr.msk.f32.gmra.mrb[2].mxu1 %vm85_vm1, %v37_v21 }
   0xf   :  { %217 = vmatprep.mubr.f32.mxu1 %v6603_v5  ;;  %3611 = vmatpush1.bf16.msra.mxu1 %v3610_v25 }
  0x10   :  { %3613 = vmatprep.subr.bf16.mxu1 %v3612_v26  ;;  %3649 = vmatpush1.bf16.msra.mxu0 %v3648_v42 }
  0x12   :  { %3406 = vmatmul.mubr.msk.f32.gmra.mrb[4].mxu1 %vm85_vm1, %v38_v33 }
  0x13   :  { %223 = vmatprep.mubr.f32.mxu1 %v6603_v5  ;;  %3615 = vmatpush1.bf16.msra.mxu1 %v3614_v36 }
  0x14   :  { %3617 = vmatprep.subr.bf16.mxu1 %v3616_v38 }
  0x15   :  { %15 = vsyncpa [#allocation3], 0  ;;  %v496_v53 = vld [vmem:[%s6595_s3 + $0x110] sm:$0xff]  ;;  %3650 = vmatprep.subr.bf16.mxu0 %v6605_v8  ;;  %v482_v54 = vld [vmem:[%s6595_s3 + $0xa0] sm:$0xff]  ;;  %v3622_v57 = vpack.c.bf16 %v489_v50, %v486_v48  ;;  %vm534_vm2 = vcmask 261120   ;;  %vm1217_vm3 = vcmask 523264  }
  0x16   :  { %3407 = vmatmul.mubr.msk.f32.gmra.mrb[6].mxu1 %vm85_vm1, %v39_v46  ;;  %v485_v55 = vld [vmem:[%s6595_s3 + $0xb8] sm:$0xff]  ;;  %v40_v56 = vld [vmem:[%s6592_s0 + $0x20] sm:$0xff]  ;;  %v3624_v58 = vpack.c.bf16 %v496_v53, %v493_v51  ;;  %v492_v59 = vld [vmem:[%s6595_s3 + $0xf0] sm:$0xff]  ;;  %3652 = vmatpush1.bf16.msra.mxu0 %v3651_v52 }
  0x17   :  { %229 = vmatprep.mubr.f32.mxu1 %v6603_v5  ;;  %3619 = vmatpush1.bf16.msra.mxu1 %v3618_v47  ;;  %v495_v60 = vld [vmem:[%s6595_s3 + $0x108] sm:$0xff]  ;;  %v3654_v61 = vpack.c.bf16 %v485_v55, %v482_v54  ;;  %v502_v63 = vld [vmem:[%s6595_s3 + $0x140] sm:$0xff]  ;;  %v488_v0 = vld [vmem:[%s6595_s3 + $0xd0] sm:$0xff] }
  0x18   :  { %3621 = vmatprep.subr.bf16.mxu1 %v3620_v49  ;;  %v499_v62 = vld [vmem:[%s6595_s3 + $0x128] sm:$0xff]  ;;  %3653 = vmatprep.subr.bf16.mxu0 %v6605_v8  ;;  %v3626_v3 = vpack.c.bf16 %v495_v60, %v492_v59  ;;  %v498_v6 = vld [vmem:[%s6595_s3 + $0x120] sm:$0xff]  ;;  %v501_v7 = vld [vmem:[%s6595_s3 + $0x138] sm:$0xff] }
  0x19   :  { %v491_v1 = vld [vmem:[%s6595_s3 + $0xe8] sm:$0xff]  ;;  %v3628_v4 = vpack.c.bf16 %v502_v63, %v499_v62  ;;  %v42_v10 = vld [vmem:[%s6592_s0 + $0x30] sm:$0xff]  ;;  %v3630_v11 = vpack.c.bf16 %v501_v7, %v498_v6  ;;  %v43_v12 = vld [vmem:[%s6592_s0 + $0x38] sm:$0xff] }
  0x1a   :  { %3408 = vmatmul.mubr.msk.f32.gmra.mrb[8].mxu1 %vm85_vm1, %v40_v56  ;;  %v41_v2 = vld [vmem:[%s6592_s0 + $0x28] sm:$0xff]  ;;  %3655 = vmatpush1.bf16.msra.mxu0 %v3654_v61  ;;  %v3657_v9 = vpack.c.bf16 %v491_v1, %v488_v0  ;;  %v44_v13 = vld [vmem:[%s6592_s0 + $0x40] sm:$0xff]  ;;  %v46_v15 = vld [vmem:[%s6592_s0 + $0x50] sm:$0xff] }
  0x1b   :  { %235 = vmatprep.mubr.f32.mxu1 %v6603_v5  ;;  %3623 = vmatpush1.bf16.msra.mxu1 %v3622_v57  ;;  %v45_v14 = vld [vmem:[%s6592_s0 + $0x48] sm:$0xff]  ;;  %v47_v16 = vld [vmem:[%s6592_s0 + $0x58] sm:$0xff]  ;;  %v48_v17 = vld [vmem:[%s6592_s0 + $0x60] sm:$0xff]  ;;  %v77_v57 = vlaneseq }
  0x1c   :  { %3625 = vmatprep.subr.bf16.mxu1 %v3624_v58  ;;  %3656 = vmatprep.subr.bf16.mxu0 %v6605_v8  ;;  %v49_v18 = vld [vmem:[%s6592_s0 + $0x68] sm:$0xff]  ;;  %v50_v19 = vld [vmem:[%s6592_s0 + $0x70] sm:$0xff]  ;;  %v51_v20 = vld [vmem:[%s6592_s0 + $0x78] sm:$0xff] }
  0x1d   :  { %v494_v21 = vld [vmem:[%s6595_s3 + $0x100] sm:$0xff]  ;;  %v497_v22 = vld [vmem:[%s6595_s3 + $0x118] sm:$0xff]  ;;  %v500_v24 = vld [vmem:[%s6595_s3 + $0x130] sm:$0xff]  ;;  %v4751_v58 = vshrl.u32 %v77_v57, 7 }
  0x1e   :  { %3409 = vmatmul.mubr.msk.f32.gmra.mrb[10].mxu1 %vm85_vm1, %v41_v2  ;;  %3658 = vmatpush1.bf16.msra.mxu0 %v3657_v9  ;;  %v3660_v23 = vpack.c.bf16 %v497_v22, %v494_v21  ;;  %v503_v25 = vld [vmem:[%s6595_s3 + $0x148] sm:$0xff]  ;;  %v505_v27 = vld [vmem:[%s6595_s3 + $0x158] sm:$0xff]  ;;  %v508_v28 = vld [vmem:[%s6595_s3 + $0x170] sm:$0xff] }
  0x1f   :  { %241 = vmatprep.mubr.f32.mxu1 %v6603_v5  ;;  %3627 = vmatpush1.bf16.msra.mxu1 %v3626_v3  ;;  %v3663_v26 = vpack.c.bf16 %v503_v25, %v500_v24  ;;  %v3632_v29 = vpack.c.bf16 %v508_v28, %v505_v27  ;;  %v504_v30 = vld [vmem:[%s6595_s3 + $0x150] sm:$0xff]  ;;  %v507_v31 = vld [vmem:[%s6595_s3 + $0x168] sm:$0xff]  ;;  %v506_v32 = vld [vmem:[%s6595_s3 + $0x160] sm:$0xff]  ;;  %v79_v59 = vsub.s32 0, %v4751_v58 }
  0x20   :  { %3629 = vmatprep.subr.bf16.mxu1 %v3628_v4  ;;  %3659 = vmatprep.subr.bf16.mxu0 %v6605_v8  ;;  %v3634_v33 = vpack.c.bf16 %v507_v31, %v504_v30  ;;  %v509_v34 = vld [vmem:[%s6595_s3 + $0x178] sm:$0xff]  ;;  %v511_v36 = vld [vmem:[%s6595_s3 + $0x188] sm:$0xff]  ;;  %v514_v37 = vld [vmem:[%s6595_s3 + $0x1a0] sm:$0xff] }
  0x21   :  { %v3666_v35 = vpack.c.bf16 %v509_v34, %v506_v32  ;;  %v3636_v38 = vpack.c.bf16 %v514_v37, %v511_v36  ;;  %v510_v39 = vld [vmem:[%s6595_s3 + $0x180] sm:$0xff]  ;;  %v513_v40 = vld [vmem:[%s6595_s3 + $0x198] sm:$0xff]  ;;  %v512_v41 = vld [vmem:[%s6595_s3 + $0x190] sm:$0xff] }
  0x22   :  { %3410 = vmatmul.mubr.msk.f32.gmra.mrb[12].mxu1 %vm85_vm1, %v42_v10  ;;  %3661 = vmatpush1.bf16.msra.mxu0 %v3660_v23  ;;  %v3638_v42 = vpack.c.bf16 %v513_v40, %v510_v39  ;;  %v515_v43 = vld [vmem:[%s6595_s3 + $0x1a8] sm:$0xff]  ;;  %v517_v45 = vld [vmem:[%s6595_s3 + $0x1b8] sm:$0xff]  ;;  %v520_v46 = vld [vmem:[%s6595_s3 + $0x1d0] sm:$0xff] }
  0x23   :  { %247 = vmatprep.mubr.f32.mxu1 %v6603_v5  ;;  %3631 = vmatpush1.bf16.msra.mxu1 %v3630_v11  ;;  %v3669_v44 = vpack.c.bf16 %v515_v43, %v512_v41  ;;  %v3640_v47 = vpack.c.bf16 %v520_v46, %v517_v45  ;;  %v516_v48 = vld [vmem:[%s6595_s3 + $0x1b0] sm:$0xff]  ;;  %v519_v49 = vld [vmem:[%s6595_s3 + $0x1c8] sm:$0xff]  ;;  %v518_v50 = vld [vmem:[%s6595_s3 + $0x1c0] sm:$0xff] }
  0x24   :  { %3662 = vmatprep.subr.bf16.mxu0 %v6605_v8  ;;  %3633 = vmatprep.subr.bf16.mxu1 %v3632_v29  ;;  %v3642_v51 = vpack.c.bf16 %v519_v49, %v516_v48  ;;  %v521_v52 = vld [vmem:[%s6595_s3 + $0x1d8] sm:$0xff]  ;;  %v1130_v54 = vld [vmem:[%s6596_s4 + $0x8] sm:$0xff]  ;;  %v4757_v60 = vld [vmem:[%s6601_s9] sm:$0x7f] }
  0x25   :  { %v3672_v53 = vpack.c.bf16 %v521_v52, %v518_v50  ;;  %v1132_v55 = vld [vmem:[%s6596_s4 + $0x18] sm:$0xff]  ;;  %v4762_v61 = vld [vmem:[%s6601_s9 + $0x8] sm:$0x7f]  ;;  %v4765_v62 = vrot.slane %v4757_v60, %v79_v59  ;;  %v1129_v30 = vld [vmem:[%s6596_s4] sm:$0xff] }
  0x26   :  { %3411 = vmatmul.mubr.msk.f32.gmra.mrb[14].mxu1 %vm85_vm1, %v43_v12  ;;  %3664 = vmatpush1.bf16.msra.mxu0 %v3663_v26  ;;  %v3674_v56 = vpack.c.bf16 %v1132_v55, %v1130_v54  ;;  %v4768_v63 = vrot.slane %v4762_v61, %v79_v59  ;;  %v1131_v31 = vld [vmem:[%s6596_s4 + $0x10] sm:$0xff]  ;;  %v1134_v36 = vld [vmem:[%s6596_s4 + $0x28] sm:$0xff]  ;;  %v1136_v37 = vld [vmem:[%s6596_s4 + $0x38] sm:$0xff] }
  0x27   :  { %253 = vmatprep.mubr.f32.mxu1 %v6603_v5  ;;  %3665 = vmatprep.subr.bf16.mxu0 %v6605_v8  ;;  %v3676_v43 = vpack.c.bf16 %v1131_v31, %v1129_v30  ;;  %v3678_v49 = vpack.c.bf16 %v1136_v37, %v1134_v36  ;;  %v1133_v50 = vld [vmem:[%s6596_s4 + $0x20] sm:$0xff]  ;;  %v1140_v57 = vld [vmem:[%s6596_s4 + $0x58] sm:$0xff]  ;;  %v1143_v37 = vld [vmem:[%s6596_s4 + $0x70] sm:$0xff] }
  0x28   :  { %3635 = vmatpush1.bf16.msra.mxu1 %v3634_v33  ;;  %v1141_v36 = vld [vmem:[%s6596_s4 + $0x60] sm:$0xff] }
  0x29   :  { %3637 = vmatprep.subr.bf16.mxu1 %v3636_v38 }
  0x2a   :  { %3412 = vmatmul.mubr.msk.f32.gmra.mrb[16].mxu1 %vm85_vm1, %v44_v13  ;;  %3667 = vmatpush1.bf16.msra.mxu0 %v3666_v35 }
  0x2b   :  { %259 = vmatprep.mubr.f32.mxu1 %v6603_v5  ;;  %3668 = vmatprep.subr.bf16.mxu0 %v6605_v8 }
  0x2c   :  { %3639 = vmatpush1.bf16.msra.mxu1 %v3638_v42 }
  0x2d   :  { %3641 = vmatprep.subr.bf16.mxu1 %v3640_v47 }
  0x2e   :  { %3413 = vmatmul.mubr.msk.f32.gmra.mrb[18].mxu1 %vm85_vm1, %v45_v14  ;;  %3670 = vmatpush1.bf16.msra.mxu0 %v3669_v44 }
  0x2f   :  { %265 = vmatprep.mubr.f32.mxu1 %v6603_v5  ;;  %3671 = vmatprep.subr.bf16.mxu0 %v6605_v8 }
  0x30   :  { %3643 = vmatpush1.bf16.msra.mxu1 %v3642_v51  ;;  %v1135_v51 = vld [vmem:[%s6596_s4 + $0x30] sm:$0xff] }
  0x31   :  { %3675 = vmatprep.subr.bf16.mxu1 %v3674_v56  ;;  %v1138_v56 = vld [vmem:[%s6596_s4 + $0x48] sm:$0xff] }
  0x32   :  { %3414 = vmatmul.mubr.msk.f32.gmra.mrb[20].mxu1 %vm85_vm1, %v46_v15  ;;  %3673 = vmatpush1.bf16.msra.mxu0 %v3672_v53 }
  0x33   :  { %271 = vmatprep.mubr.f32.mxu1 %v6603_v5  ;;  %3754 = vmatprep.subr.bf16.mxu0 %v6605_v8 }
  0x36   :  { %3415 = vmatmul.mubr.msk.f32.gmra.mrb[22].mxu1 %vm85_vm1, %v47_v16 }
  0x37   :  { %277 = vmatprep.mubr.f32.mxu1 %v6603_v5 }
  0x3a   :  { %3416 = vmatmul.mubr.msk.f32.gmra.mrb[24].mxu1 %vm85_vm1, %v48_v17 }
  0x3b   :  { %283 = vmatprep.mubr.f32.mxu1 %v6603_v5 }
  0x3e   :  { %3417 = vmatmul.mubr.msk.f32.gmra.mrb[26].mxu1 %vm85_vm1, %v49_v18 }
  0x3f   :  { %289 = vmatprep.mubr.f32.mxu1 %v6603_v5 }
  0x42   :  { %3418 = vmatmul.mubr.msk.f32.gmra.mrb[28].mxu1 %vm85_vm1, %v50_v19 }
  0x43   :  { %295 = vmatprep.mubr.f32.mxu1 %v6603_v5 }
  0x46   :  { %3419 = vmatmul.mubr.msk.f32.gmra.mrb[30].mxu1 %vm85_vm1, %v51_v20 }
  0xdd   :  { %v207_v0 = vpop.f32.mrb[0].mxu1 }
  0xde   :  { %v208_v1 = vadd.f32 %v207_v0, %v4765_v62  ;;  %v209_v2 = vpop.f32.mrb[1].mxu1 }
  0xdf   :  { %v210_v3 = vadd.f32 %v209_v2, %v4768_v63 }
  0xe0   :  { %v334_v4 = vmul.f32 0.70710677, %v208_v1  ;;  %v302_v38 = vmul.f32 0.5, %v208_v1 }
  0xe1   :  { %v335_v6 = vmul.f32 0.70710677, %v210_v3  ;;  %v213_v7 = vpop.f32.mrb[2].mxu1  ;;  %v303_v32 = vmul.f32 0.5, %v210_v3 }
  0xe2   :  { %4046 = verf.f32 %v334_v4  ;;  %v214_v9 = vadd.f32 %v213_v7, %v4765_v62  ;;  %v215_v10 = vpop.f32.mrb[3].mxu1  ;;  %v3680_v4 = vpack.c.bf16 %v1135_v51, %v1133_v50 }
  0xe3   :  { %4048 = verf.f32 %v335_v6  ;;  %v216_v11 = vadd.f32 %v215_v10, %v4768_v63 }
  0xe4   :  { %v336_v12 = vmul.f32 0.70710677, %v214_v9  ;;  %v304_v59 = vmul.f32 0.5, %v214_v9  ;;  %v3682_v9 = vpack.c.bf16 %v1140_v57, %v1138_v56  ;;  %v1145_v56 = vld [vmem:[%s6596_s4 + $0x80] sm:$0xff]  ;;  %v1147_v57 = vld [vmem:[%s6596_s4 + $0x90] sm:$0xff] }
  0xe5   :  { %v337_v13 = vmul.f32 0.70710677, %v216_v11  ;;  %v219_v14 = vpop.f32.mrb[4].mxu1  ;;  %v305_v52 = vmul.f32 0.5, %v216_v11 }
  0xe6   :  { %4050 = verf.f32 %v336_v12  ;;  %v4775_v15 = vadd.f32 %v219_v14, %v4765_v62  ;;  %v221_v16 = vpop.f32.mrb[5].mxu1  ;;  %v1139_v14 = vld [vmem:[%s6596_s4 + $0x50] sm:$0xff] }
  0xe7   :  { %4052 = verf.f32 %v337_v13  ;;  %v4778_v17 = vadd.f32 %v221_v16, %v4768_v63  ;;  %v1137_v13 = vld [vmem:[%s6596_s4 + $0x40] sm:$0xff] }
  0xe8   :  { %v338_v18 = vmul.f32 0.70710677, %v4775_v15 }
  0xe9   :  { %v339_v19 = vmul.f32 0.70710677, %v4778_v17  ;;  %v225_v20 = vpop.f32.mrb[6].mxu1  ;;  %v307_v16 = vmul.f32 0.5, %v4778_v17  ;;  %v306_v17 = vmul.f32 0.5, %v4775_v15 }
  0xea   :  { %4054 = verf.f32 %v338_v18  ;;  %v4783_v21 = vadd.f32 %v225_v20, %v4765_v62  ;;  %v227_v22 = vpop.f32.mrb[7].mxu1 }
  0xeb   :  { %4056 = verf.f32 %v339_v19  ;;  %v4786_v23 = vadd.f32 %v227_v22, %v4768_v63  ;;  %v1142_v22 = vld [vmem:[%s6596_s4 + $0x68] sm:$0xff] }
  0xec   :  { %v4047_v24 = vpop.eup %4046  ;;  %v340_v25 = vmul.f32 0.70710677, %v4783_v21 }
  0xed   :  { %v4049_v26 = vpop.eup %4048  ;;  %v398_v27 = vadd.f32 1.0, %v4047_v24  ;;  %v341_v28 = vmul.f32 0.70710677, %v4786_v23  ;;  %v231_v29 = vpop.f32.mrb[8].mxu1  ;;  %v1144_v24 = vld [vmem:[%s6596_s4 + $0x78] sm:$0xff] }
  0xee   :  { %v399_v33 = vadd.f32 1.0, %v4049_v26  ;;  %4058 = verf.f32 %v340_v25  ;;  %v4797_v34 = vadd.f32 %v231_v29, %v4765_v62  ;;  %v233_v35 = vpop.f32.mrb[9].mxu1  ;;  %v3684_v29 = vpack.c.bf16 %v1139_v14, %v1137_v13 }
  0xef   :  { %4060 = verf.f32 %v341_v28  ;;  %v4806_v39 = vadd.f32 %v233_v35, %v4768_v63  ;;  %v430_v45 = vmul.f32 %v398_v27, %v302_v38  ;;  %v3686_v15 = vpack.c.bf16 %v1144_v24, %v1142_v22  ;;  %v1149_v22 = vld [vmem:[%s6596_s4 + $0xa0] sm:$0xff]  ;;  %v1151_v24 = vld [vmem:[%s6596_s4 + $0xb0] sm:$0xff] }
  0xf0   :  { %v4051_v40 = vpop.eup %4050  ;;  %v431_v41 = vmul.f32 %v399_v33, %v303_v32  ;;  %v342_v42 = vmul.f32 0.70710677, %v4797_v34  ;;  %v309_v38 = vmul.f32 0.5, %v4786_v23  ;;  %v308_v23 = vmul.f32 0.5, %v4783_v21 }
  0xf1   :  { %v4053_v44 = vpop.eup %4052  ;;  %v400_v46 = vadd.f32 1.0, %v4051_v40  ;;  %v343_v47 = vmul.f32 0.70710677, %v4806_v39  ;;  %v237_v48 = vpop.f32.mrb[10].mxu1 }
  0xf2   :  { %v401_v53 = vadd.f32 1.0, %v4053_v44  ;;  %4062 = verf.f32 %v342_v42  ;;  %v4817_v54 = vadd.f32 %v237_v48, %v4765_v62  ;;  %v239_v55 = vpop.f32.mrb[11].mxu1  ;;  %3420 = vmatprep.mubr.msk.f32.mxu1 %vm534_vm2, %v431_v41  ;;  %3436 = vmatprep.mubr.msk.f32.mxu0 %vm534_vm2, %v431_v41  ;;  %v1148_v44 = vld [vmem:[%s6596_s4 + $0x98] sm:$0xff] }
  0xf3   :  { %4064 = verf.f32 %v343_v47  ;;  %v4828_v0 = vadd.f32 %v239_v55, %v4768_v63  ;;  %648 = vmatmul.mubr.f32.vlgmr.msra.gmra.mrb[32].mxu1 %v430_v45  ;;  %809 = vmatmul.mubr.f32.vlgmr.msra.gmra.mrb[0].mxu0 %v430_v45  ;;  %v432_v12 = vmul.f32 %v400_v46, %v304_v59  ;;  %v311_v59 = vmul.f32 0.5, %v4806_v39 }
  0xf4   :  { %v4055_v1 = vpop.eup %4054  ;;  %v433_v2 = vmul.f32 %v401_v53, %v305_v52  ;;  %v344_v3 = vmul.f32 0.70710677, %v4817_v54  ;;  %3677 = vmatpush1.bf16.msra.mxu1 %v3676_v43  ;;  %v1146_v43 = vld [vmem:[%s6596_s4 + $0x88] sm:$0xff]  ;;  %v310_v39 = vmul.f32 0.5, %v4797_v34 }
  0xf5   :  { %v4057_v6 = vpop.eup %4056  ;;  %v402_v7 = vadd.f32 1.0, %v4055_v1  ;;  %v345_v10 = vmul.f32 0.70710677, %v4828_v0  ;;  %v243_v11 = vpop.f32.mrb[12].mxu1  ;;  %3679 = vmatprep.subr.bf16.mxu1 %v3678_v49  ;;  %v3688_v49 = vpack.c.bf16 %v1143_v37, %v1141_v36  ;;  %v3690_v21 = vpack.c.bf16 %v1148_v44, %v1146_v43  ;;  %v1153_v43 = vld [vmem:[%s6596_s4 + $0xc0] sm:$0xff]  ;;  %v1155_v44 = vld [vmem:[%s6596_s4 + $0xd0] sm:$0xff] }
  0xf6   :  { %v403_v18 = vadd.f32 1.0, %v4057_v6  ;;  %4066 = verf.f32 %v344_v3  ;;  %v4840_v19 = vadd.f32 %v243_v11, %v4765_v62  ;;  %v245_v20 = vpop.f32.mrb[13].mxu1  ;;  %3421 = vmatprep.mubr.msk.f32.mxu1 %vm534_vm2, %v433_v2  ;;  %3437 = vmatprep.mubr.msk.f32.mxu0 %vm534_vm2, %v433_v2  ;;  %v1152_v6 = vld [vmem:[%s6596_s4 + $0xb8] sm:$0xff] }
  0xf7   :  { %4068 = verf.f32 %v345_v10  ;;  %v4852_v25 = vadd.f32 %v245_v20, %v4768_v63  ;;  %654 = vmatmul.mubr.f32.gmra.mrb[34].mxu1 %v432_v12  ;;  %814 = vmatmul.mubr.f32.gmra.mrb[2].mxu0 %v432_v12  ;;  %v434_v35 = vmul.f32 %v402_v7, %v306_v17  ;;  %v313_v17 = vmul.f32 0.5, %v4828_v0 }
  0xf8   :  { %v4059_v26 = vpop.eup %4058  ;;  %v435_v27 = vmul.f32 %v403_v18, %v307_v16  ;;  %v346_v28 = vmul.f32 0.70710677, %v4840_v19  ;;  %3681 = vmatpush1.bf16.msra.mxu1 %v3680_v4  ;;  %v1150_v4 = vld [vmem:[%s6596_s4 + $0xa8] sm:$0xff]  ;;  %v312_v0 = vmul.f32 0.5, %v4817_v54 }
  0xf9   :  { %v4061_v30 = vpop.eup %4060  ;;  %v404_v31 = vadd.f32 1.0, %v4059_v26  ;;  %v347_v32 = vmul.f32 0.70710677, %v4852_v25  ;;  %v249_v33 = vpop.f32.mrb[14].mxu1  ;;  %3683 = vmatprep.subr.bf16.mxu1 %v3682_v9  ;;  %v3692_v9 = vpack.c.bf16 %v1147_v57, %v1145_v56  ;;  %v3694_v34 = vpack.c.bf16 %v1152_v6, %v1150_v4  ;;  %v1157_v4 = vld [vmem:[%s6596_s4 + $0xe0] sm:$0xff]  ;;  %v1159_v6 = vld [vmem:[%s6596_s4 + $0xf0] sm:$0xff] }
  0xfa   :  { %v405_v40 = vadd.f32 1.0, %v4061_v30  ;;  %4070 = verf.f32 %v346_v28  ;;  %v4864_v41 = vadd.f32 %v249_v33, %v4765_v62  ;;  %v251_v42 = vpop.f32.mrb[15].mxu1  ;;  %3422 = vmatprep.mubr.msk.f32.mxu1 %vm534_vm2, %v435_v27  ;;  %3438 = vmatprep.mubr.msk.f32.mxu0 %vm534_vm2, %v435_v27  ;;  %v1156_v30 = vld [vmem:[%s6596_s4 + $0xd8] sm:$0xff] }
  0xfb   :  { %4072 = verf.f32 %v347_v32  ;;  %v4876_v45 = vadd.f32 %v251_v42, %v4768_v63  ;;  %660 = vmatmul.mubr.f32.gmra.mrb[36].mxu1 %v434_v35  ;;  %819 = vmatmul.mubr.f32.gmra.mrb[4].mxu0 %v434_v35  ;;  %v436_v55 = vmul.f32 %v404_v31, %v308_v23  ;;  %v315_v23 = vmul.f32 0.5, %v4852_v25 }
  0xfc   :  { %v4063_v46 = vpop.eup %4062  ;;  %v437_v47 = vmul.f32 %v405_v40, %v309_v38  ;;  %v348_v48 = vmul.f32 0.70710677, %v4864_v41  ;;  %3685 = vmatpush1.bf16.msra.mxu1 %v3684_v29  ;;  %v1154_v29 = vld [vmem:[%s6596_s4 + $0xc8] sm:$0xff]  ;;  %v314_v25 = vmul.f32 0.5, %v4840_v19 }
  0xfd   :  { %v4065_v50 = vpop.eup %4064  ;;  %v406_v51 = vadd.f32 1.0, %v4063_v46  ;;  %v349_v52 = vmul.f32 0.70710677, %v4876_v45  ;;  %v255_v53 = vpop.f32.mrb[16].mxu1  ;;  %3687 = vmatprep.subr.bf16.mxu1 %v3686_v15  ;;  %v3696_v15 = vpack.c.bf16 %v1151_v24, %v1149_v22  ;;  %v3698_v54 = vpack.c.bf16 %v1156_v30, %v1154_v29  ;;  %v1161_v29 = vld [vmem:[%s6596_s4 + $0x100] sm:$0xff]  ;;  %v1163_v30 = vld [vmem:[%s6596_s4 + $0x110] sm:$0xff] }
  0xfe   :  { %v407_v1 = vadd.f32 1.0, %v4065_v50  ;;  %4074 = verf.f32 %v348_v48  ;;  %v4888_v2 = vadd.f32 %v255_v53, %v4765_v62  ;;  %v257_v3 = vpop.f32.mrb[17].mxu1  ;;  %3423 = vmatprep.mubr.msk.f32.mxu1 %vm534_vm2, %v437_v47  ;;  %3439 = vmatprep.mubr.msk.f32.mxu0 %vm534_vm2, %v437_v47  ;;  %v1160_v50 = vld [vmem:[%s6596_s4 + $0xf8] sm:$0xff] }
  0xff   :  { %4076 = verf.f32 %v349_v52  ;;  %v4900_v7 = vadd.f32 %v257_v3, %v4768_v63  ;;  %666 = vmatmul.mubr.f32.gmra.mrb[38].mxu1 %v436_v55  ;;  %824 = vmatmul.mubr.f32.gmra.mrb[6].mxu0 %v436_v55  ;;  %v438_v20 = vmul.f32 %v406_v51, %v310_v39  ;;  %v317_v39 = vmul.f32 0.5, %v4876_v45 }
 0x100   :  { %v4067_v10 = vpop.eup %4066  ;;  %v439_v11 = vmul.f32 %v407_v1, %v311_v59  ;;  %v350_v12 = vmul.f32 0.70710677, %v4888_v2  ;;  %3689 = vmatpush1.bf16.msra.mxu1 %v3688_v49  ;;  %v1158_v49 = vld [vmem:[%s6596_s4 + $0xe8] sm:$0xff]  ;;  %v316_v45 = vmul.f32 0.5, %v4864_v41 }
 0x101   :  { %v4069_v13 = vpop.eup %4068  ;;  %v408_v14 = vadd.f32 1.0, %v4067_v10  ;;  %v351_v16 = vmul.f32 0.70710677, %v4900_v7  ;;  %v261_v18 = vpop.f32.mrb[18].mxu1  ;;  %3691 = vmatprep.subr.bf16.mxu1 %v3690_v21  ;;  %v3700_v21 = vpack.c.bf16 %v1155_v44, %v1153_v43  ;;  %v3702_v19 = vpack.c.bf16 %v1160_v50, %v1158_v49  ;;  %v1165_v49 = vld [vmem:[%s6596_s4 + $0x120] sm:$0xff]  ;;  %v1167_v50 = vld [vmem:[%s6596_s4 + $0x130] sm:$0xff] }
 0x102   :  { %v409_v26 = vadd.f32 1.0, %v4069_v13  ;;  %4078 = verf.f32 %v350_v12  ;;  %v4912_v27 = vadd.f32 %v261_v18, %v4765_v62  ;;  %v263_v28 = vpop.f32.mrb[19].mxu1  ;;  %3424 = vmatprep.mubr.msk.f32.mxu1 %vm534_vm2, %v439_v11  ;;  %3440 = vmatprep.mubr.msk.f32.mxu0 %vm534_vm2, %v439_v11  ;;  %v1164_v13 = vld [vmem:[%s6596_s4 + $0x118] sm:$0xff] }
 0x103   :  { %4080 = verf.f32 %v351_v16  ;;  %v4924_v31 = vadd.f32 %v263_v28, %v4768_v63  ;;  %672 = vmatmul.mubr.f32.gmra.mrb[40].mxu1 %v438_v20  ;;  %829 = vmatmul.mubr.f32.gmra.mrb[8].mxu0 %v438_v20  ;;  %v440_v42 = vmul.f32 %v408_v14, %v312_v0  ;;  %v319_v0 = vmul.f32 0.5, %v4900_v7 }
 0x104   :  { %v4071_v32 = vpop.eup %4070  ;;  %v441_v33 = vmul.f32 %v409_v26, %v313_v17  ;;  %v352_v35 = vmul.f32 0.70710677, %v4912_v27  ;;  %3693 = vmatpush1.bf16.msra.mxu1 %v3692_v9  ;;  %v1162_v9 = vld [vmem:[%s6596_s4 + $0x108] sm:$0xff]  ;;  %v318_v7 = vmul.f32 0.5, %v4888_v2 }
 0x105   :  { %v4073_v36 = vpop.eup %4072  ;;  %v410_v37 = vadd.f32 1.0, %v4071_v32  ;;  %v353_v38 = vmul.f32 0.70710677, %v4924_v31  ;;  %v267_v40 = vpop.f32.mrb[20].mxu1  ;;  %3695 = vmatprep.subr.bf16.mxu1 %v3694_v34  ;;  %v3704_v34 = vpack.c.bf16 %v1159_v6, %v1157_v4  ;;  %v3706_v41 = vpack.c.bf16 %v1164_v13, %v1162_v9  ;;  %v1169_v9 = vld [vmem:[%s6596_s4 + $0x140] sm:$0xff]  ;;  %v1171_v13 = vld [vmem:[%s6596_s4 + $0x150] sm:$0xff] }
 0x106   :  { %v411_v46 = vadd.f32 1.0, %v4073_v36  ;;  %4082 = verf.f32 %v352_v35  ;;  %v4936_v47 = vadd.f32 %v267_v40, %v4765_v62  ;;  %v269_v48 = vpop.f32.mrb[21].mxu1  ;;  %3425 = vmatprep.mubr.msk.f32.mxu1 %vm534_vm2, %v441_v33  ;;  %3441 = vmatprep.mubr.msk.f32.mxu0 %vm534_vm2, %v441_v33  ;;  %v1168_v36 = vld [vmem:[%s6596_s4 + $0x138] sm:$0xff] }
 0x107   :  { %4084 = verf.f32 %v353_v38  ;;  %v4948_v51 = vadd.f32 %v269_v48, %v4768_v63  ;;  %678 = vmatmul.mubr.f32.gmra.mrb[42].mxu1 %v440_v42  ;;  %834 = vmatmul.mubr.f32.gmra.mrb[10].mxu0 %v440_v42  ;;  %v442_v3 = vmul.f32 %v410_v37, %v314_v25  ;;  %v321_v25 = vmul.f32 0.5, %v4924_v31 }
 0x108   :  { %v4075_v52 = vpop.eup %4074  ;;  %v443_v53 = vmul.f32 %v411_v46, %v315_v23  ;;  %v354_v55 = vmul.f32 0.70710677, %v4936_v47  ;;  %3697 = vmatpush1.bf16.msra.mxu1 %v3696_v15  ;;  %v1166_v15 = vld [vmem:[%s6596_s4 + $0x128] sm:$0xff]  ;;  %v320_v31 = vmul.f32 0.5, %v4912_v27 }
 0x109   :  { %v4077_v56 = vpop.eup %4076  ;;  %v412_v57 = vadd.f32 1.0, %v4075_v52  ;;  %v355_v59 = vmul.f32 0.70710677, %v4948_v51  ;;  %v273_v1 = vpop.f32.mrb[22].mxu1  ;;  %3699 = vmatprep.subr.bf16.mxu1 %v3698_v54  ;;  %v3708_v54 = vpack.c.bf16 %v1163_v30, %v1161_v29  ;;  %v3710_v2 = vpack.c.bf16 %v1168_v36, %v1166_v15 }
 0x10a   :  { %v413_v10 = vadd.f32 1.0, %v4077_v56  ;;  %4086 = verf.f32 %v354_v55  ;;  %v4960_v11 = vadd.f32 %v273_v1, %v4765_v62  ;;  %v275_v12 = vpop.f32.mrb[23].mxu1  ;;  %3426 = vmatprep.mubr.msk.f32.mxu1 %vm534_vm2, %v443_v53  ;;  %3442 = vmatprep.mubr.msk.f32.mxu0 %vm534_vm2, %v443_v53  ;;  %v1172_v56 = vld [vmem:[%s6596_s4 + $0x158] sm:$0xff] }
 0x10b   :  { %4088 = verf.f32 %v355_v59  ;;  %v4972_v14 = vadd.f32 %v275_v12, %v4768_v63  ;;  %684 = vmatmul.mubr.f32.gmra.mrb[44].mxu1 %v442_v3  ;;  %839 = vmatmul.mubr.f32.gmra.mrb[12].mxu0 %v442_v3  ;;  %v444_v28 = vmul.f32 %v412_v57, %v316_v45  ;;  %v323_v45 = vmul.f32 0.5, %v4948_v51 }
 0x10c   :  { %v4079_v16 = vpop.eup %4078  ;;  %v445_v18 = vmul.f32 %v413_v10, %v317_v39  ;;  %v356_v20 = vmul.f32 0.70710677, %v4960_v11  ;;  %3701 = vmatpush1.bf16.msra.mxu1 %v3700_v21  ;;  %v1170_v21 = vld [vmem:[%s6596_s4 + $0x148] sm:$0xff]  ;;  %v324_v36 = vmul.f32 0.5, %v4960_v11 }
 0x10d   :  { %v4081_v22 = vpop.eup %4080  ;;  %v414_v24 = vadd.f32 1.0, %v4079_v16  ;;  %v357_v17 = vmul.f32 0.70710677, %v4972_v14  ;;  %v279_v26 = vpop.f32.mrb[24].mxu1  ;;  %3703 = vmatprep.subr.bf16.mxu1 %v3702_v19  ;;  %v3712_v19 = vpack.c.bf16 %v1167_v50, %v1165_v49  ;;  %v3714_v27 = vpack.c.bf16 %v1172_v56, %v1170_v21 }
 0x10e   :  { %v415_v32 = vadd.f32 1.0, %v4081_v22  ;;  %4090 = verf.f32 %v356_v20  ;;  %v4984_v33 = vadd.f32 %v279_v26, %v4765_v62  ;;  %v281_v35 = vpop.f32.mrb[25].mxu1  ;;  %3427 = vmatprep.mubr.msk.f32.mxu1 %vm534_vm2, %v445_v18  ;;  %3443 = vmatprep.mubr.msk.f32.mxu0 %vm534_vm2, %v445_v18  ;;  %v3716_v26 = vpack.c.bf16 %v1171_v13, %v1169_v9  ;;  %v1174_v9 = vld [vmem:[%s6596_s4 + $0x168] sm:$0xff]  ;;  %v1176_v13 = vld [vmem:[%s6596_s4 + $0x178] sm:$0xff] }
 0x10f   :  { %4092 = verf.f32 %v357_v17  ;;  %v4996_v37 = vadd.f32 %v281_v35, %v4768_v63  ;;  %690 = vmatmul.mubr.f32.gmra.mrb[46].mxu1 %v444_v28  ;;  %844 = vmatmul.mubr.f32.gmra.mrb[14].mxu0 %v444_v28  ;;  %v446_v48 = vmul.f32 %v414_v24, %v318_v7 }
 0x110   :  { %v4083_v38 = vpop.eup %4082  ;;  %v447_v40 = vmul.f32 %v415_v32, %v319_v0  ;;  %v358_v42 = vmul.f32 0.70710677, %v4984_v33  ;;  %3705 = vmatpush1.bf16.msra.mxu1 %v3704_v34  ;;  %v322_v34 = vmul.f32 0.5, %v4936_v47  ;;  %v325_v32 = vmul.f32 0.5, %v4972_v14 }
 0x111   :  { %v4085_v43 = vpop.eup %4084  ;;  %v416_v44 = vadd.f32 1.0, %v4083_v38  ;;  %v359_v23 = vmul.f32 0.70710677, %v4996_v37  ;;  %v285_v46 = vpop.f32.mrb[26].mxu1  ;;  %3707 = vmatprep.subr.bf16.mxu1 %v3706_v41 }
 0x112   :  { %v417_v52 = vadd.f32 1.0, %v4085_v43  ;;  %4094 = verf.f32 %v358_v42  ;;  %v5008_v53 = vadd.f32 %v285_v46, %v4765_v62  ;;  %v287_v55 = vpop.f32.mrb[27].mxu1  ;;  %3428 = vmatprep.mubr.msk.f32.mxu1 %vm534_vm2, %v447_v40  ;;  %3444 = vmatprep.mubr.msk.f32.mxu0 %vm534_vm2, %v447_v40 }
 0x113   :  { %4096 = verf.f32 %v359_v23  ;;  %v5020_v57 = vadd.f32 %v287_v55, %v4768_v63  ;;  %696 = vmatmul.mubr.f32.gmra.mrb[48].mxu1 %v446_v48  ;;  %849 = vmatmul.mubr.f32.gmra.mrb[16].mxu0 %v446_v48  ;;  %v448_v12 = vmul.f32 %v416_v44, %v320_v31  ;;  %v327_v44 = vmul.f32 0.5, %v4996_v37 }
 0x114   :  { %v4087_v59 = vpop.eup %4086  ;;  %v449_v1 = vmul.f32 %v417_v52, %v321_v25  ;;  %v360_v3 = vmul.f32 0.70710677, %v5008_v53  ;;  %3709 = vmatpush1.bf16.msra.mxu1 %v3708_v54  ;;  %v328_v37 = vmul.f32 0.5, %v5008_v53 }
 0x115   :  { %v4089_v4 = vpop.eup %4088  ;;  %v418_v6 = vadd.f32 1.0, %v4087_v59  ;;  %v361_v39 = vmul.f32 0.70710677, %v5020_v57  ;;  %v291_v10 = vpop.f32.mrb[28].mxu1  ;;  %3711 = vmatprep.subr.bf16.mxu1 %v3710_v2  ;;  %v329_v50 = vmul.f32 0.5, %v5020_v57 }
 0x116   :  { %v419_v16 = vadd.f32 1.0, %v4089_v4  ;;  %4098 = verf.f32 %v360_v3  ;;  %v5032_v18 = vadd.f32 %v291_v10, %v4765_v62  ;;  %v293_v20 = vpop.f32.mrb[29].mxu1  ;;  %3429 = vmatprep.mubr.msk.f32.mxu1 %vm534_vm2, %v449_v1  ;;  %3445 = vmatprep.mubr.msk.f32.mxu0 %vm534_vm2, %v449_v1 }
 0x117   :  { %4100 = verf.f32 %v361_v39  ;;  %v294_v22 = vadd.f32 %v293_v20, %v4768_v63  ;;  %702 = vmatmul.mubr.f32.gmra.mrb[50].mxu1 %v448_v12  ;;  %854 = vmatmul.mubr.f32.gmra.mrb[18].mxu0 %v448_v12  ;;  %v450_v0 = vmul.f32 %v418_v6, %v322_v34  ;;  %v1178_v34 = vld [vmem:[%s6596_s4 + $0x188] sm:$0xff] }
 0x118   :  { %v4091_v24 = vpop.eup %4090  ;;  %v451_v17 = vmul.f32 %v419_v16, %v323_v45  ;;  %v362_v51 = vmul.f32 0.70710677, %v5032_v18  ;;  %3713 = vmatpush1.bf16.msra.mxu1 %v3712_v19  ;;  %v330_v57 = vmul.f32 0.5, %v5032_v18  ;;  %v3718_v45 = vpack.c.bf16 %v1176_v13, %v1174_v9  ;;  %v1173_v16 = vld [vmem:[%s6596_s4 + $0x160] sm:$0xff]  ;;  %v1175_v18 = vld [vmem:[%s6596_s4 + $0x170] sm:$0xff] }
 0x119   :  { %v4093_v28 = vpop.eup %4092  ;;  %v420_v41 = vadd.f32 1.0, %v4091_v24  ;;  %v363_v29 = vmul.f32 0.70710677, %v294_v22  ;;  %v297_v30 = vpop.f32.mrb[30].mxu1  ;;  %3715 = vmatprep.subr.bf16.mxu1 %v3714_v27  ;;  %v331_v31 = vmul.f32 0.5, %v294_v22  ;;  %v3720_v20 = vpack.c.bf16 %v1175_v18, %v1173_v16  ;;  %v1180_v22 = vld [vmem:[%s6596_s4 + $0x198] sm:$0xff] }
 0x11a   :  { %v421_v47 = vadd.f32 1.0, %v4093_v28  ;;  %4102 = verf.f32 %v362_v51  ;;  %v298_v35 = vadd.f32 %v297_v30, %v4765_v62  ;;  %v299_v15 = vpop.f32.mrb[31].mxu1  ;;  %3430 = vmatprep.mubr.msk.f32.mxu1 %vm534_vm2, %v451_v17  ;;  %3446 = vmatprep.mubr.msk.f32.mxu0 %vm534_vm2, %v451_v17  ;;  %v3722_v24 = vpack.c.bf16 %v1180_v22, %v1178_v34  ;;  %v1177_v17 = vld [vmem:[%s6596_s4 + $0x180] sm:$0xff]  ;;  %v1179_v51 = vld [vmem:[%s6596_s4 + $0x190] sm:$0xff]  ;;  %v1182_v28 = vld [vmem:[%s6596_s4 + $0x1a8] sm:$0xff] }
 0x11b   :  { %4104 = verf.f32 %v363_v29  ;;  %v300_v7 = vadd.f32 %v299_v15, %v4768_v63  ;;  %708 = vmatmul.mubr.f32.gmra.mrb[52].mxu1 %v450_v0  ;;  %859 = vmatmul.mubr.f32.gmra.mrb[20].mxu0 %v450_v0  ;;  %v452_v62 = vmul.f32 %v420_v41, %v324_v36  ;;  %v326_v63 = vmul.f32 0.5, %v4984_v33  ;;  %v1184_v41 = vld [vmem:[%s6596_s4 + $0x1b8] sm:$0xff]  ;;  %v1181_v30 = vld [vmem:[%s6596_s4 + $0x1a0] sm:$0xff]  ;;  %v1183_v0 = vld [vmem:[%s6596_s4 + $0x1b0] sm:$0xff] }
 0x11c   :  { %v4095_v38 = vpop.eup %4094  ;;  %v453_v40 = vmul.f32 %v421_v47, %v325_v32  ;;  %v364_v42 = vmul.f32 0.70710677, %v298_v35  ;;  %3717 = vmatpush1.bf16.msra.mxu1 %v3716_v26  ;;  %v332_v10 = vmul.f32 0.5, %v298_v35  ;;  %v3724_v26 = vpack.c.bf16 %v1179_v51, %v1177_v17  ;;  %v1186_v47 = vld [vmem:[%s6596_s4 + $0x1c8] sm:$0xff]  ;;  %v1188_v35 = vld [vmem:[%s6596_s4 + $0x1d8] sm:$0xff]  ;;  %v1185_v36 = vld [vmem:[%s6596_s4 + $0x1c0] sm:$0xff] }
 0x11d   :  { %v4097_v14 = vpop.eup %4096  ;;  %v422_v54 = vadd.f32 1.0, %v4095_v38  ;;  %v365_v43 = vmul.f32 0.70710677, %v300_v7  ;;  %v333_v6 = vmul.f32 0.5, %v300_v7  ;;  %3719 = vmatprep.subr.bf16.mxu1 %v3718_v45  ;;  %v3726_v29 = vpack.c.bf16 %v1184_v41, %v1182_v28  ;;  %v1187_v7 = vld [vmem:[%s6596_s4 + $0x1d0] sm:$0xff] }
 0x11e   :  { %v423_v23 = vadd.f32 1.0, %v4097_v14  ;;  %4106 = verf.f32 %v364_v42  ;;  %3431 = vmatprep.mubr.msk.f32.mxu1 %vm534_vm2, %v453_v40  ;;  %3447 = vmatprep.mubr.msk.f32.mxu0 %vm534_vm2, %v453_v40  ;;  %v3728_v32 = vpack.c.bf16 %v1183_v0, %v1181_v30  ;;  %v3730_v15 = vpack.c.bf16 %v1188_v35, %v1186_v47  ;;  %v1190_v40 = vld [vmem:[%s6596_s4 + $0x1e8] sm:$0xff]  ;;  %v1192_v42 = vld [vmem:[%s6596_s4 + $0x1f8] sm:$0xff]  ;;  %v1193_v35 = vld [vmem:[%s6596_s4 + $0x200] sm:$0xff] }
 0x11f   :  { %4108 = verf.f32 %v365_v43  ;;  %714 = vmatmul.mubr.f32.gmra.mrb[54].mxu1 %v452_v62  ;;  %864 = vmatmul.mubr.f32.gmra.mrb[22].mxu0 %v452_v62  ;;  %v454_v49 = vmul.f32 %v422_v54, %v326_v63  ;;  %v3732_v38 = vpack.c.bf16 %v1187_v7, %v1185_v36  ;;  %v3734_v14 = vpack.c.bf16 %v1192_v42, %v1190_v40  ;;  %v1189_v54 = vld [vmem:[%s6596_s4 + $0x1e0] sm:$0xff]  ;;  %v1191_v43 = vld [vmem:[%s6596_s4 + $0x1f0] sm:$0xff] }
 0x120   :  { %v4099_v11 = vpop.eup %4098  ;;  %v455_v46 = vmul.f32 %v423_v23, %v327_v44  ;;  %3721 = vmatpush1.bf16.msra.mxu1 %v3720_v20  ;;  %v3736_v62 = vpack.c.bf16 %v1191_v43, %v1189_v54  ;;  %v1194_v44 = vld [vmem:[%s6596_s4 + $0x208] sm:$0xff]  ;;  %v1196_v23 = vld [vmem:[%s6596_s4 + $0x218] sm:$0xff]  ;;  %v1195_v40 = vld [vmem:[%s6596_s4 + $0x210] sm:$0xff] }
 0x121   :  { %v4101_v48 = vpop.eup %4100  ;;  %v424_v2 = vadd.f32 1.0, %v4099_v11  ;;  %3723 = vmatprep.subr.bf16.mxu1 %v3722_v24  ;;  %v3738_v63 = vpack.c.bf16 %v1196_v23, %v1194_v44  ;;  %v5127_v11 = vsub.s32 1, %v4751_v58  ;;  %v1198_v43 = vld [vmem:[%s6596_s4 + $0x228] sm:$0xff] }
 0x122   :  { %v425_v25 = vadd.f32 1.0, %v4101_v48  ;;  %3432 = vmatprep.mubr.msk.f32.mxu1 %vm534_vm2, %v455_v46  ;;  %3448 = vmatprep.mubr.msk.f32.mxu0 %vm534_vm2, %v455_v46 }
 0x123   :  { %720 = vmatmul.mubr.f32.gmra.mrb[56].mxu1 %v454_v49  ;;  %869 = vmatmul.mubr.f32.gmra.mrb[24].mxu0 %v454_v49  ;;  %v456_v56 = vmul.f32 %v424_v2, %v328_v37  ;;  %v5131_v46 = vrot.slane %v4757_v60, %v5127_v11  ;;  %v5135_v48 = vrot.slane %v4762_v61, %v5127_v11 }
 0x124   :  { %v4103_v33 = vpop.eup %4102  ;;  %v457_v52 = vmul.f32 %v425_v25, %v329_v50  ;;  %3725 = vmatpush1.bf16.msra.mxu1 %v3724_v26 }
 0x125   :  { %v4105_v55 = vpop.eup %4104  ;;  %v426_v21 = vadd.f32 1.0, %v4103_v33  ;;  %3727 = vmatprep.subr.bf16.mxu1 %v3726_v29 }
 0x126   :  { %v427_v59 = vadd.f32 1.0, %v4105_v55  ;;  %3433 = vmatprep.mubr.msk.f32.mxu1 %vm534_vm2, %v457_v52  ;;  %3449 = vmatprep.mubr.msk.f32.mxu0 %vm534_vm2, %v457_v52 }
 0x127   :  { %726 = vmatmul.mubr.f32.gmra.mrb[58].mxu1 %v456_v56  ;;  %874 = vmatmul.mubr.f32.gmra.mrb[26].mxu0 %v456_v56  ;;  %v458_v4 = vmul.f32 %v426_v21, %v330_v57 }
 0x128   :  { %v4107_v1 = vpop.eup %4106  ;;  %v459_v3 = vmul.f32 %v427_v59, %v331_v31  ;;  %3729 = vmatpush1.bf16.msra.mxu1 %v3728_v32 }
 0x129   :  { %v4109_v53 = vpop.eup %4108  ;;  %v428_v19 = vadd.f32 1.0, %v4107_v1  ;;  %3731 = vmatprep.subr.bf16.mxu1 %v3730_v15 }
 0x12a   :  { %v429_v39 = vadd.f32 1.0, %v4109_v53  ;;  %3434 = vmatprep.mubr.msk.f32.mxu1 %vm534_vm2, %v459_v3  ;;  %3450 = vmatprep.mubr.msk.f32.mxu0 %vm534_vm2, %v459_v3 }
 0x12b   :  { %732 = vmatmul.mubr.f32.gmra.mrb[60].mxu1 %v458_v4  ;;  %879 = vmatmul.mubr.f32.gmra.mrb[28].mxu0 %v458_v4  ;;  %v460_v27 = vmul.f32 %v428_v19, %v332_v10 }
 0x12c   :  { %v461_v12 = vmul.f32 %v429_v39, %v333_v6  ;;  %3733 = vmatpush1.bf16.msra.mxu1 %v3732_v38 }
 0x12d   :  { %3735 = vmatprep.subr.bf16.mxu1 %v3734_v14 }
 0x12e   :  { %3435 = vmatprep.mubr.msk.f32.mxu1 %vm534_vm2, %v461_v12  ;;  %3451 = vmatprep.mubr.msk.f32.mxu0 %vm534_vm2, %v461_v12 }
 0x12f   :  { %738 = vmatmul.mubr.f32.gmra.mrb[62].mxu1 %v460_v27  ;;  %884 = vmatmul.mubr.f32.gmra.mrb[30].mxu0 %v460_v27 }
 0x130   :  { %3737 = vmatpush1.bf16.msra.mxu1 %v3736_v62  ;;  %v1200_v62 = vld [vmem:[%s6596_s4 + $0x238] sm:$0xff] }
 0x131   :  { %3739 = vmatprep.subr.bf16.mxu1 %v3738_v63 }
 0x1c6   :  { %v649_v2 = vpop.f32.mrb[32].mxu1  ;;  %v5137_v49 = vpop.f32.mrb[0].mxu0 }
 0x1c7   :  { %v5140_v50 = vadd.f32 %v649_v2, %v5131_v46  ;;  %v651_v25 = vpop.f32.mrb[33].mxu1  ;;  %v812_v37 = vpop.f32.mrb[1].mxu0 }
 0x1c8   :  { %v652_v33 = vadd.f32 %v651_v25, %v5135_v48 }
 0x1c9   :  { %v937_v52 = vmul.f32 0.70710677, %v5140_v50 }
 0x1ca   :  { %v655_v55 = vpop.f32.mrb[34].mxu1  ;;  %v5144_v21 = vpop.f32.mrb[2].mxu0  ;;  %v938_v60 = vmul.f32 0.70710677, %v652_v33  ;;  %v890_v23 = vmul.f32 0.5, %v652_v33 }
 0x1cb   :  { %v657_v56 = vpop.f32.mrb[35].mxu1  ;;  %v817_v31 = vpop.f32.mrb[3].mxu0  ;;  %v5147_v61 = vadd.f32 %v655_v55, %v5131_v46  ;;  %4110 = verf.f32 %v937_v52  ;;  %v889_v52 = vmul.f32 0.5, %v5140_v50  ;;  %v3740_v55 = vpack.c.bf16 %v1195_v40, %v1193_v35  ;;  %v1199_v50 = vld [vmem:[%s6596_s4 + $0x230] sm:$0xff] }
 0x1cc   :  { %v658_v59 = vadd.f32 %v657_v56, %v5135_v48  ;;  %4112 = verf.f32 %v938_v60 }
 0x1cd   :  { %v940_v19 = vmul.f32 0.70710677, %v5147_v61 }
 0x1ce   :  { %v941_v57 = vmul.f32 0.70710677, %v658_v59  ;;  %v661_v1 = vpop.f32.mrb[36].mxu1  ;;  %v5150_v3 = vpop.f32.mrb[4].mxu0  ;;  %v893_v56 = vmul.f32 0.5, %v658_v59 }
 0x1cf   :  { %v663_v53 = vpop.f32.mrb[37].mxu1  ;;  %v5154_v4 = vadd.f32 %v661_v1, %v5131_v46  ;;  %v822_v39 = vpop.f32.mrb[5].mxu0 }
 0x1d0   :  { %v5157_v6 = vadd.f32 %v663_v53, %v5135_v48  ;;  %4114 = verf.f32 %v941_v57  ;;  %v3742_v53 = vpack.c.bf16 %v1200_v62, %v1198_v43 }
 0x1d1   :  { %4116 = verf.f32 %v940_v19  ;;  %v943_v9 = vmul.f32 0.70710677, %v5154_v4 }
 0x1d2   :  { %v944_v10 = vmul.f32 0.70710677, %v5157_v6  ;;  %v667_v12 = vpop.f32.mrb[38].mxu1  ;;  %v5160_v27 = vpop.f32.mrb[6].mxu0 }
 0x1d3   :  { %v669_v13 = vpop.f32.mrb[39].mxu1  ;;  %v827_v45 = vpop.f32.mrb[7].mxu0  ;;  %v5164_v16 = vadd.f32 %v667_v12, %v5131_v46 }
 0x1d4   :  { %4118 = verf.f32 %v944_v10  ;;  %v5167_v18 = vadd.f32 %v669_v13, %v5135_v48  ;;  %v1197_v10 = vld [vmem:[%s6596_s4 + $0x220] sm:$0xff] }
 0x1d5   :  { %v4111_v22 = vpop.eup %4110  ;;  %4120 = verf.f32 %v943_v9  ;;  %v946_v26 = vmul.f32 0.70710677, %v5164_v16 }
 0x1d6   :  { %v673_v20 = vpop.f32.mrb[40].mxu1  ;;  %v947_v34 = vmul.f32 0.70710677, %v5167_v18  ;;  %v5170_v24 = vpop.f32.mrb[8].mxu0  ;;  %v1033_v15 = vadd.f32 1.0, %v4111_v22  ;;  %v1202_v22 = vld [vmem:[%s6596_s4 + $0x248] sm:$0xff] }
 0x1d7   :  { %v675_v17 = vpop.f32.mrb[41].mxu1  ;;  %v4113_v51 = vpop.eup %4112  ;;  %v5174_v28 = vadd.f32 %v673_v20, %v5131_v46 }
 0x1d8   :  { %v5177_v41 = vadd.f32 %v675_v17, %v5135_v48  ;;  %v832_v29 = vpop.f32.mrb[9].mxu0  ;;  %4122 = verf.f32 %v947_v34  ;;  %v1034_v36 = vadd.f32 1.0, %v4113_v51  ;;  %v1081_v19 = vmul.f32 %v1033_v15, %v889_v52  ;;  %v1204_v17 = vld [vmem:[%s6596_s4 + $0x258] sm:$0xff] }
 0x1d9   :  { %4124 = verf.f32 %v946_v26  ;;  %v949_v42 = vmul.f32 0.70710677, %v5174_v28  ;;  %v892_v51 = vmul.f32 0.5, %v5147_v61  ;;  %v1201_v61 = vld [vmem:[%s6596_s4 + $0x240] sm:$0xff] }
 0x1da   :  { %v679_v30 = vpop.f32.mrb[42].mxu1  ;;  %v5179_v0 = vpop.f32.mrb[10].mxu0  ;;  %v950_v7 = vmul.f32 0.70710677, %v5177_v41  ;;  %v1082_v57 = vmul.f32 %v1034_v36, %v890_v23  ;;  %v1208_v23 = vld [vmem:[%s6596_s4 + $0x278] sm:$0xff] }
 0x1db   :  { %v4115_v32 = vpop.eup %4114  ;;  %v681_v47 = vpop.f32.mrb[43].mxu1  ;;  %v5190_v14 = vadd.f32 %v679_v30, %v5131_v46  ;;  %v896_v30 = vmul.f32 0.5, %v5157_v6 }
 0x1dc   :  { %v837_v38 = vpop.f32.mrb[11].mxu0  ;;  %v5193_v54 = vadd.f32 %v681_v47, %v5135_v48  ;;  %v4117_v44 = vpop.eup %4116  ;;  %v1037_v63 = vadd.f32 1.0, %v4115_v32  ;;  %4126 = verf.f32 %v950_v7  ;;  %1330 = vmatprep.mubr.f32.mxu1 %v1082_v57  ;;  %v3744_v47 = vpack.c.bf16 %v1199_v50, %v1197_v10  ;;  %v1205_v50 = vld [vmem:[%s6596_s4 + $0x260] sm:$0xff] }
 0x1dd   :  { %v1036_v39 = vadd.f32 1.0, %v4117_v44  ;;  %4128 = verf.f32 %v949_v42  ;;  %v952_v33 = vmul.f32 0.70710677, %v5190_v14  ;;  %1331 = vmatmul.mubr.f32.vlgmr.msra.gmra.mrb[64].mxu1 %v1081_v19  ;;  %v3746_v7 = vpack.c.bf16 %v1204_v17, %v1202_v22  ;;  %v1203_v38 = vld [vmem:[%s6596_s4 + $0x250] sm:$0xff]  ;;  %v1206_v44 = vld [vmem:[%s6596_s4 + $0x268] sm:$0xff] }
 0x1de   :  { %v685_v2 = vpop.f32.mrb[44].mxu1  ;;  %v5201_v25 = vpop.f32.mrb[12].mxu0  ;;  %v953_v31 = vmul.f32 0.70710677, %v5193_v54  ;;  %v1085_v45 = vmul.f32 %v1037_v63, %v893_v56  ;;  %3741 = vmatpush1.bf16.msra.mxu1 %v3740_v55  ;;  %v899_v57 = vmul.f32 0.5, %v5167_v18  ;;  %v3750_v19 = vpack.c.bf16 %v1208_v23, %v1206_v44  ;;  %v1207_v18 = vld [vmem:[%s6596_s4 + $0x270] sm:$0xff] }
 0x1df   :  { %v4119_v37 = vpop.eup %4118  ;;  %v687_v60 = vpop.f32.mrb[45].mxu1  ;;  %v5213_v9 = vadd.f32 %v685_v2, %v5131_v46  ;;  %v1084_v15 = vmul.f32 %v1036_v39, %v892_v51  ;;  %3743 = vmatprep.subr.bf16.mxu1 %v3742_v53  ;;  %v895_v2 = vmul.f32 0.5, %v5154_v4  ;;  %v901_v44 = vmul.f32 0.5, %v5174_v28 }
 0x1e0   :  { %v842_v1 = vpop.f32.mrb[13].mxu0  ;;  %v4121_v12 = vpop.eup %4120  ;;  %v1040_v59 = vadd.f32 1.0, %v4119_v37  ;;  %v5216_v13 = vadd.f32 %v687_v60, %v5135_v48  ;;  %4130 = verf.f32 %v953_v31  ;;  %1336 = vmatprep.mubr.f32.mxu1 %v1085_v45  ;;  %v3748_v31 = vpack.c.bf16 %v1203_v38, %v1201_v61 }
 0x1e1   :  { %v1039_v35 = vadd.f32 1.0, %v4121_v12  ;;  %4132 = verf.f32 %v952_v33  ;;  %v955_v6 = vmul.f32 0.70710677, %v5213_v9  ;;  %1337 = vmatmul.mubr.f32.gmra.mrb[66].mxu1 %v1084_v15 }
 0x1e2   :  { %v691_v20 = vpop.f32.mrb[46].mxu1  ;;  %v5218_v34 = vpop.f32.mrb[14].mxu0  ;;  %v956_v32 = vmul.f32 0.70710677, %v5216_v13  ;;  %v1088_v42 = vmul.f32 %v1040_v59, %v896_v30  ;;  %3745 = vmatpush1.bf16.msra.mxu1 %v3744_v47  ;;  %v902_v30 = vmul.f32 0.5, %v5177_v41  ;;  %v3752_v47 = vpack.c.bf16 %v1207_v18, %v1205_v50 }
 0x1e3   :  { %v693_v26 = vpop.f32.mrb[47].mxu1  ;;  %v4123_v29 = vpop.eup %4122  ;;  %v5249_v52 = vadd.f32 %v691_v20, %v5131_v46  ;;  %v1087_v53 = vmul.f32 %v1039_v35, %v895_v2  ;;  %3747 = vmatprep.subr.bf16.mxu1 %v3746_v7  ;;  %v905_v2 = vmul.f32 0.5, %v5193_v54  ;;  %v904_v50 = vmul.f32 0.5, %v5190_v14 }
 0x1e4   :  { %v847_v36 = vpop.f32.mrb[15].mxu0  ;;  %v5237_v40 = vadd.f32 %v693_v26, %v5135_v48  ;;  %v4125_v63 = vpop.eup %4124  ;;  %v1043_v37 = vadd.f32 1.0, %v4123_v29  ;;  %4134 = verf.f32 %v956_v32  ;;  %1342 = vmatprep.mubr.f32.mxu1 %v1088_v42  ;;  %v898_v26 = vmul.f32 0.5, %v5164_v16 }
 0x1e5   :  { %v1042_v4 = vadd.f32 1.0, %v4125_v63  ;;  %4136 = verf.f32 %v955_v6  ;;  %v958_v45 = vmul.f32 0.70710677, %v5249_v52  ;;  %1343 = vmatmul.mubr.f32.gmra.mrb[68].mxu1 %v1087_v53 }
 0x1e6   :  { %v697_v43 = vpop.f32.mrb[48].mxu1  ;;  %v5239_v62 = vpop.f32.mrb[16].mxu0  ;;  %v959_v1 = vmul.f32 0.70710677, %v5237_v40  ;;  %v1091_v22 = vmul.f32 %v1043_v37, %v899_v57  ;;  %3749 = vmatpush1.bf16.msra.mxu1 %v3748_v31 }
 0x1e7   :  { %v699_v55 = vpop.f32.mrb[49].mxu1  ;;  %v852_v60 = vpop.f32.mrb[17].mxu0  ;;  %v5254_v39 = vadd.f32 %v697_v43, %v5131_v46  ;;  %3751 = vmatprep.subr.bf16.mxu1 %v3750_v19  ;;  %v1090_v36 = vmul.f32 %v1042_v4, %v898_v26 }
 0x1e8   :  { %v4127_v56 = vpop.eup %4126  ;;  %v5266_v20 = vadd.f32 %v699_v55, %v5135_v48  ;;  %4138 = verf.f32 %v959_v1  ;;  %1348 = vmatprep.mubr.f32.mxu1 %v1091_v22 }
 0x1e9   :  { %v4129_v12 = vpop.eup %4128  ;;  %v1046_v59 = vadd.f32 1.0, %v4127_v56  ;;  %v961_v15 = vmul.f32 0.70710677, %v5254_v39  ;;  %4140 = verf.f32 %v958_v45  ;;  %1349 = vmatmul.mubr.f32.gmra.mrb[70].mxu1 %v1090_v36 }
 0x1ea   :  { %v703_v33 = vpop.f32.mrb[50].mxu1  ;;  %v5256_v10 = vpop.f32.mrb[18].mxu0  ;;  %v962_v32 = vmul.f32 0.70710677, %v5266_v20  ;;  %v1045_v35 = vadd.f32 1.0, %v4129_v12  ;;  %3753 = vmatpush1.bf16.msra.mxu1 %v3752_v47  ;;  %v908_v12 = vmul.f32 0.5, %v5216_v13 }
 0x1eb   :  { %v705_v17 = vpop.f32.mrb[51].mxu1  ;;  %v857_v51 = vpop.f32.mrb[19].mxu0  ;;  %v5275_v16 = vadd.f32 %v703_v33, %v5131_v46  ;;  %v1094_v41 = vmul.f32 %v1046_v59, %v902_v30 }
 0x1ec   :  { %v4131_v29 = vpop.eup %4130  ;;  %v5278_v38 = vadd.f32 %v705_v17, %v5135_v48  ;;  %4142 = verf.f32 %v962_v32  ;;  %v1093_v55 = vmul.f32 %v1045_v35, %v901_v44  ;;  %v907_v35 = vmul.f32 0.5, %v5213_v9 }
 0x1ed   :  { %v4133_v43 = vpop.eup %4132  ;;  %v1049_v23 = vadd.f32 1.0, %v4131_v29  ;;  %1354 = vmatprep.mubr.f32.mxu1 %v1094_v41  ;;  %4144 = verf.f32 %v961_v15  ;;  %v964_v57 = vmul.f32 0.70710677, %v5275_v16  ;;  %v911_v41 = vmul.f32 0.5, %v5237_v40 }
 0x1ee   :  { %v709_v7 = vpop.f32.mrb[52].mxu1  ;;  %v5272_v61 = vpop.f32.mrb[20].mxu0  ;;  %v965_v37 = vmul.f32 0.70710677, %v5278_v38  ;;  %v1048_v31 = vadd.f32 1.0, %v4133_v43  ;;  %1355 = vmatmul.mubr.f32.gmra.mrb[72].mxu1 %v1093_v55 }
 0x1ef   :  { %v711_v6 = vpop.f32.mrb[53].mxu1  ;;  %v862_v42 = vpop.f32.mrb[21].mxu0  ;;  %v5287_v4 = vadd.f32 %v709_v7, %v5131_v46  ;;  %v1097_v33 = vmul.f32 %v1049_v23, %v905_v2 }
 0x1f0   :  { %v4135_v63 = vpop.eup %4134  ;;  %v5290_v54 = vadd.f32 %v711_v6, %v5135_v48  ;;  %4146 = verf.f32 %v965_v37  ;;  %v1096_v22 = vmul.f32 %v1048_v31, %v904_v50  ;;  %v910_v31 = vmul.f32 0.5, %v5249_v52 }
 0x1f1   :  { %v4137_v53 = vpop.eup %4136  ;;  %v1052_v19 = vadd.f32 1.0, %v4135_v63  ;;  %1360 = vmatprep.mubr.f32.mxu1 %v1097_v33  ;;  %4148 = verf.f32 %v964_v57  ;;  %v967_v26 = vmul.f32 0.70710677, %v5287_v4 }
 0x1f2   :  { %v715_v60 = vpop.f32.mrb[54].mxu1  ;;  %v5283_v56 = vpop.f32.mrb[22].mxu0  ;;  %v968_v59 = vmul.f32 0.70710677, %v5290_v54  ;;  %v1051_v45 = vadd.f32 1.0, %v4137_v53  ;;  %1361 = vmatmul.mubr.f32.gmra.mrb[74].mxu1 %v1096_v22  ;;  %v914_v53 = vmul.f32 0.5, %v5266_v20 }
 0x1f3   :  { %v717_v1 = vpop.f32.mrb[55].mxu1  ;;  %v867_v28 = vpop.f32.mrb[23].mxu0  ;;  %v5299_v29 = vadd.f32 %v715_v60, %v5131_v46  ;;  %v1100_v30 = vmul.f32 %v1052_v19, %v908_v12  ;;  %v913_v20 = vmul.f32 0.5, %v5254_v39 }
 0x1f4   :  { %v4139_v18 = vpop.eup %4138  ;;  %v5302_v14 = vadd.f32 %v717_v1, %v5135_v48  ;;  %4150 = verf.f32 %v968_v59  ;;  %v1099_v42 = vmul.f32 %v1051_v45, %v907_v35  ;;  %v917_v35 = vmul.f32 0.5, %v5278_v38 }
 0x1f5   :  { %v4141_v47 = vpop.eup %4140  ;;  %v1055_v15 = vadd.f32 1.0, %v4139_v18  ;;  %1366 = vmatprep.mubr.f32.mxu1 %v1100_v30  ;;  %4152 = verf.f32 %v967_v26  ;;  %v970_v2 = vmul.f32 0.70710677, %v5299_v29 }
 0x1f6   :  { %v721_v17 = vpop.f32.mrb[56].mxu1  ;;  %v5295_v51 = vpop.f32.mrb[24].mxu0  ;;  %v971_v6 = vmul.f32 0.70710677, %v5302_v14  ;;  %v1054_v63 = vadd.f32 1.0, %v4141_v47  ;;  %1367 = vmatmul.mubr.f32.gmra.mrb[76].mxu1 %v1099_v42 }
 0x1f7   :  { %v723_v32 = vpop.f32.mrb[57].mxu1  ;;  %v872_v13 = vpop.f32.mrb[25].mxu0  ;;  %v5311_v9 = vadd.f32 %v721_v17, %v5131_v46  ;;  %v1103_v60 = vmul.f32 %v1055_v15, %v911_v41  ;;  %v70_v47 = vld [vmem:[%s6601_s9 + $0x10] sm:$0x7f] }
 0x1f8   :  { %v4143_v36 = vpop.eup %4142  ;;  %4154 = verf.f32 %v971_v6  ;;  %v5314_v40 = vadd.f32 %v723_v32, %v5135_v48  ;;  %v1102_v50 = vmul.f32 %v1054_v63, %v910_v31 }
 0x1f9   :  { %v4145_v23 = vpop.eup %4144  ;;  %v1058_v55 = vadd.f32 1.0, %v4143_v36  ;;  %1372 = vmatprep.mubr.f32.mxu1 %v1103_v60  ;;  %4156 = verf.f32 %v970_v2  ;;  %v973_v33 = vmul.f32 0.70710677, %v5311_v9  ;;  %v920_v60 = vmul.f32 0.5, %v5290_v54 }
 0x1fa   :  { %v727_v7 = vpop.f32.mrb[58].mxu1  ;;  %v5307_v43 = vpop.f32.mrb[26].mxu0  ;;  %v1057_v28 = vadd.f32 1.0, %v4145_v23  ;;  %v974_v19 = vmul.f32 0.70710677, %v5314_v40  ;;  %1373 = vmatmul.mubr.f32.gmra.mrb[78].mxu1 %v1102_v50  ;;  %v919_v54 = vmul.f32 0.5, %v5287_v4 }
 0x1fb   :  { %v729_v44 = vpop.f32.mrb[59].mxu1  ;;  %v877_v37 = vpop.f32.mrb[27].mxu0  ;;  %v5321_v18 = vadd.f32 %v727_v7, %v5131_v46  ;;  %v1106_v22 = vmul.f32 %v1058_v55, %v914_v53  ;;  %v916_v55 = vmul.f32 0.5, %v5275_v16  ;;  %v1589_v4 = vld [vmem:[%s6597_s5 + $0x8] sm:$0xff] }
 0x1fc   :  { %v4147_v1 = vpop.eup %4146  ;;  %v5326_v52 = vadd.f32 %v729_v44, %v5135_v48  ;;  %4158 = verf.f32 %v974_v19  ;;  %v1105_v7 = vmul.f32 %v1057_v28, %v913_v20  ;;  %v5344_v37 = vrot.slane %v70_v47, %v5127_v11 }
 0x1fd   :  { %v4149_v45 = vpop.eup %4148  ;;  %v1061_v26 = vadd.f32 1.0, %v4147_v1  ;;  %1378 = vmatprep.mubr.f32.mxu1 %v1106_v22  ;;  %4160 = verf.f32 %v973_v33  ;;  %v976_v36 = vmul.f32 0.70710677, %v5321_v18  ;;  %v922_v47 = vmul.f32 0.5, %v5299_v29 }
 0x1fe   :  { %v733_v57 = vpop.f32.mrb[60].mxu1  ;;  %v5323_v12 = vpop.f32.mrb[28].mxu0  ;;  %v977_v39 = vmul.f32 0.70710677, %v5326_v52  ;;  %v1060_v6 = vadd.f32 1.0, %v4149_v45  ;;  %1379 = vmatmul.mubr.f32.gmra.mrb[80].mxu1 %v1105_v7  ;;  %v5358_v16 = vadd.f32 %v5137_v49, %v5344_v37  ;;  %v923_v45 = vmul.f32 0.5, %v5302_v14 }
 0x1ff   :  { %v735_v59 = vpop.f32.mrb[61].mxu1  ;;  %v882_v17 = vpop.f32.mrb[29].mxu0  ;;  %v5338_v42 = vadd.f32 %v733_v57, %v5131_v46  ;;  %v1109_v38 = vmul.f32 %v1061_v26, %v917_v35  ;;  %v1588_v49 = vld [vmem:[%s6597_s5] sm:$0xff]  ;;  %v926_v14 = vmul.f32 0.5, %v5314_v40  ;;  %v1590_v35 = vld [vmem:[%s6597_s5 + $0x10] sm:$0xff] }
 0x200   :  { %v4151_v13 = vpop.eup %4150  ;;  %4162 = verf.f32 %v977_v39  ;;  %v5341_v63 = vadd.f32 %v735_v59, %v5135_v48  ;;  %v1108_v28 = vmul.f32 %v1060_v6, %v916_v55  ;;  %v5381_v39 = vadd.f32 %v5144_v21, %v5344_v37  ;;  %v1592_v21 = vld [vmem:[%s6597_s5 + $0x20] sm:$0xff]  ;;  %v1593_v55 = vld [vmem:[%s6597_s5 + $0x28] sm:$0xff] }
 0x201   :  { %v4153_v44 = vpop.eup %4152  ;;  %v1064_v23 = vadd.f32 1.0, %v4151_v13  ;;  %4164 = verf.f32 %v976_v36  ;;  %v979_v31 = vmul.f32 0.70710677, %v5338_v42  ;;  %1384 = vmatprep.mubr.f32.mxu1 %v1109_v38  ;;  %v939_v13 = vmul.f32 0.70710677, %v5358_v16 }
 0x202   :  { %v739_v30 = vpop.f32.mrb[62].mxu1  ;;  %v5329_v32 = vpop.f32.mrb[30].mxu0  ;;  %v980_v57 = vmul.f32 0.70710677, %v5341_v63  ;;  %v1063_v1 = vadd.f32 1.0, %v4153_v44  ;;  %1385 = vmatmul.mubr.f32.gmra.mrb[82].mxu1 %v1108_v28  ;;  %v3755_v7 = vpack.c.bf16 %v1589_v4, %v1588_v49 }
 0x203   :  { %v741_v15 = vpop.f32.mrb[63].mxu1  ;;  %v887_v41 = vpop.f32.mrb[31].mxu0  ;;  %v5351_v53 = vadd.f32 %v739_v30, %v5131_v46  ;;  %v1112_v50 = vmul.f32 %v1064_v23, %v920_v60  ;;  %v929_v23 = vmul.f32 0.5, %v5326_v52  ;;  %v942_v60 = vmul.f32 0.70710677, %v5381_v39 }
 0x204   :  { %v4155_v2 = vpop.eup %4154  ;;  %v5354_v11 = vadd.f32 %v741_v15, %v5135_v48  ;;  %4166 = verf.f32 %v980_v57  ;;  %v1111_v20 = vmul.f32 %v1063_v1, %v919_v54  ;;  %v1591_v15 = vld [vmem:[%s6597_s5 + $0x18] sm:$0xff]  ;;  %3756 = vmatpush1.bf16.msra.mxu0 %v3755_v7  ;;  %v5395_v52 = vadd.f32 %v5150_v3, %v5344_v37  ;;  %v1594_v3 = vld [vmem:[%s6597_s5 + $0x30] sm:$0xff] }
 0x205   :  { %v4157_v19 = vpop.eup %4156  ;;  %v1067_v33 = vadd.f32 1.0, %v4155_v2  ;;  %4168 = verf.f32 %v979_v31  ;;  %v982_v46 = vmul.f32 0.70710677, %v5351_v53  ;;  %1390 = vmatprep.mubr.f32.mxu1 %v1112_v50  ;;  %v3758_v38 = vpack.c.bf16 %v1591_v15, %v1590_v35  ;;  %3757 = vmatprep.subr.bf16.mxu0 %v6605_v8 }
 0x206   :  { %v4159_v59 = vpop.eup %4158  ;;  %v1066_v22 = vadd.f32 1.0, %v4157_v19  ;;  %v983_v48 = vmul.f32 0.70710677, %v5354_v11  ;;  %1391 = vmatmul.mubr.f32.gmra.mrb[84].mxu1 %v1111_v20  ;;  %v925_v2 = vmul.f32 0.5, %v5311_v9  ;;  %v932_v19 = vmul.f32 0.5, %v5341_v63 }
 0x207   :  { %v1070_v17 = vadd.f32 1.0, %v4159_v59  ;;  %v4161_v26 = vpop.eup %4160  ;;  %v1115_v30 = vmul.f32 %v1067_v33, %v923_v45  ;;  %v3761_v50 = vpack.c.bf16 %v1593_v55, %v1592_v21  ;;  %v928_v54 = vmul.f32 0.5, %v5321_v18  ;;  %v1595_v59 = vld [vmem:[%s6597_s5 + $0x38] sm:$0xff] }
 0x208   :  { %4170 = verf.f32 %v983_v48  ;;  %v1069_v29 = vadd.f32 1.0, %v4161_v26  ;;  %v1114_v6 = vmul.f32 %v1066_v22, %v922_v47  ;;  %3759 = vmatpush1.bf16.msra.mxu0 %v3758_v38  ;;  %v945_v45 = vmul.f32 0.70710677, %v5395_v52  ;;  %v1600_v38 = vld [vmem:[%s6597_s5 + $0x60] sm:$0xff] }
 0x209   :  { %4172 = verf.f32 %v982_v46  ;;  %1396 = vmatprep.mubr.f32.mxu1 %v1115_v30  ;;  %v1118_v40 = vmul.f32 %v1070_v17, %v926_v14  ;;  %3760 = vmatprep.subr.bf16.mxu0 %v6605_v8  ;;  %v5409_v63 = vadd.f32 %v5160_v27, %v5344_v37  ;;  %v935_v20 = vmul.f32 0.5, %v5354_v11  ;;  %v1596_v27 = vld [vmem:[%s6597_s5 + $0x40] sm:$0xff]  ;;  %v1597_v14 = vld [vmem:[%s6597_s5 + $0x48] sm:$0xff] }
 0x20a   :  { %v4163_v36 = vpop.eup %4162  ;;  %1397 = vmatmul.mubr.f32.gmra.mrb[86].mxu1 %v1114_v6  ;;  %4174 = verf.f32 %v939_v13  ;;  %v1117_v1 = vmul.f32 %v1069_v29, %v925_v2  ;;  %v3764_v4 = vpack.c.bf16 %v1595_v59, %v1594_v3  ;;  %v931_v26 = vmul.f32 0.5, %v5338_v42  ;;  %v1604_v3 = vld [vmem:[%s6597_s5 + $0x80] sm:$0xff] }
 0x20b   :  { %v1073_v41 = vadd.f32 1.0, %v4163_v36  ;;  %v4165_v44 = vpop.eup %4164  ;;  %1402 = vmatprep.mubr.f32.mxu1 %v1118_v40  ;;  %4176 = verf.f32 %v942_v60  ;;  %v948_v30 = vmul.f32 0.70710677, %v5409_v63  ;;  %v5423_v11 = vadd.f32 %v5170_v24, %v5344_v37  ;;  %v1598_v40 = vld [vmem:[%s6597_s5 + $0x50] sm:$0xff]  ;;  %v1599_v24 = vld [vmem:[%s6597_s5 + $0x58] sm:$0xff] }
 0x20c   :  { %v1072_v57 = vadd.f32 1.0, %v4165_v44  ;;  %3762 = vmatpush1.bf16.msra.mxu0 %v3761_v50  ;;  %4178 = verf.f32 %v945_v45  ;;  %v3767_v15 = vpack.c.bf16 %v1597_v14, %v1596_v27  ;;  %v934_v36 = vmul.f32 0.5, %v5351_v53 }
 0x20d   :  { %v1121_v9 = vmul.f32 %v1073_v41, %v929_v23  ;;  %3763 = vmatprep.subr.bf16.mxu0 %v6605_v8  ;;  %4180 = verf.f32 %v948_v30  ;;  %v951_v7 = vmul.f32 0.70710677, %v5423_v11  ;;  %v5436_v29 = vadd.f32 %v5179_v0, %v5344_v37  ;;  %v1601_v0 = vld [vmem:[%s6597_s5 + $0x68] sm:$0xff] }
 0x20e   :  { %v4167_v31 = vpop.eup %4166  ;;  %1403 = vmatmul.mubr.f32.gmra.mrb[88].mxu1 %v1117_v1  ;;  %v1120_v17 = vmul.f32 %v1072_v57, %v928_v54  ;;  %v3770_v44 = vpack.c.bf16 %v1599_v24, %v1598_v40  ;;  %v891_v23 = vmul.f32 0.5, %v5358_v16  ;;  %v5449_v21 = vadd.f32 %v5201_v25, %v5344_v37  ;;  %v1602_v57 = vld [vmem:[%s6597_s5 + $0x70] sm:$0xff]  ;;  %v1603_v25 = vld [vmem:[%s6597_s5 + $0x78] sm:$0xff] }
 0x20f   :  { %v4169_v28 = vpop.eup %4168  ;;  %v1076_v33 = vadd.f32 1.0, %v4167_v31  ;;  %1408 = vmatprep.mubr.f32.mxu1 %v1121_v9  ;;  %4182 = verf.f32 %v951_v7  ;;  %v954_v2 = vmul.f32 0.70710677, %v5436_v29  ;;  %v3773_v9 = vpack.c.bf16 %v1601_v0, %v1600_v38 }
 0x210   :  { %v1075_v22 = vadd.f32 1.0, %v4169_v28  ;;  %3765 = vmatpush1.bf16.msra.mxu0 %v3764_v4  ;;  %v894_v31 = vmul.f32 0.5, %v5381_v39  ;;  %v957_v1 = vmul.f32 0.70710677, %v5449_v21  ;;  %v5464_v28 = vadd.f32 %v5218_v34, %v5344_v37  ;;  %v1605_v34 = vld [vmem:[%s6597_s5 + $0x88] sm:$0xff] }
 0x211   :  { %v1124_v18 = vmul.f32 %v1076_v33, %v932_v19  ;;  %3766 = vmatprep.subr.bf16.mxu0 %v6605_v8  ;;  %4184 = verf.f32 %v954_v2  ;;  %v3776_v50 = vpack.c.bf16 %v1603_v25, %v1602_v57  ;;  %v897_v54 = vmul.f32 0.5, %v5395_v52 }
 0x212   :  { %v4171_v46 = vpop.eup %4170  ;;  %1409 = vmatmul.mubr.f32.gmra.mrb[90].mxu1 %v1120_v17  ;;  %v1123_v47 = vmul.f32 %v1075_v22, %v931_v26  ;;  %4186 = verf.f32 %v957_v1  ;;  %v960_v59 = vmul.f32 0.70710677, %v5464_v28  ;;  %v851_v45 = vadd.f32 %v5239_v62, %v5344_v37  ;;  %v1607_v62 = vld [vmem:[%s6597_s5 + $0x98] sm:$0xff] }
 0x213   :  { %v4173_v48 = vpop.eup %4172  ;;  %v1079_v49 = vadd.f32 1.0, %v4171_v46  ;;  %1414 = vmatprep.mubr.f32.mxu1 %v1124_v18  ;;  %v3779_v22 = vpack.c.bf16 %v1605_v34, %v1604_v3  ;;  %v900_v17 = vmul.f32 0.5, %v5409_v63  ;;  %v903_v14 = vmul.f32 0.5, %v5423_v11 }
 0x214   :  { %v1078_v13 = vadd.f32 1.0, %v4173_v48  ;;  %v4175_v35 = vpop.eup %4174  ;;  %3768 = vmatpush1.bf16.msra.mxu0 %v3767_v15  ;;  %v1606_v48 = vld [vmem:[%s6597_s5 + $0x90] sm:$0xff]  ;;  %4188 = verf.f32 %v960_v59  ;;  %v866_v15 = vadd.f32 %v5283_v56, %v5344_v37  ;;  %v909_v24 = vmul.f32 0.5, %v5449_v21 }
 0x215   :  { %v1127_v42 = vmul.f32 %v1079_v49, %v935_v20  ;;  %v1035_v53 = vadd.f32 1.0, %v4175_v35  ;;  %v4177_v6 = vpop.eup %4176  ;;  %3769 = vmatprep.subr.bf16.mxu0 %v6605_v8  ;;  %v963_v20 = vmul.f32 0.70710677, %v851_v45  ;;  %v856_v49 = vadd.f32 %v5256_v10, %v5344_v37 }
 0x216   :  { %1415 = vmatmul.mubr.f32.gmra.mrb[92].mxu1 %v1123_v47  ;;  %v1126_v41 = vmul.f32 %v1078_v13, %v934_v36  ;;  %v1038_v55 = vadd.f32 1.0, %v4177_v6  ;;  %v4179_v60 = vpop.eup %4178  ;;  %v3782_v27 = vpack.c.bf16 %v1607_v62, %v1606_v48  ;;  %v906_v35 = vmul.f32 0.5, %v5436_v29 }
 0x217   :  { %1420 = vmatprep.mubr.f32.mxu1 %v1127_v42  ;;  %v1083_v16 = vmul.f32 %v1035_v53, %v891_v23  ;;  %v1041_v19 = vadd.f32 1.0, %v4179_v60  ;;  %v4181_v33 = vpop.eup %4180  ;;  %4190 = verf.f32 %v963_v20  ;;  %v966_v30 = vmul.f32 0.70710677, %v856_v49 }
 0x218   :  { %3771 = vmatpush1.bf16.msra.mxu0 %v3770_v44  ;;  %v1086_v39 = vmul.f32 %v1038_v55, %v894_v31  ;;  %v1044_v18 = vadd.f32 1.0, %v4181_v33  ;;  %v861_v42 = vadd.f32 %v5272_v61, %v5344_v37  ;;  %v972_v7 = vmul.f32 0.70710677, %v866_v15 }
 0x219   :  { %3772 = vmatprep.subr.bf16.mxu0 %v6605_v8  ;;  %v1089_v52 = vmul.f32 %v1041_v19, %v897_v54  ;;  %v4183_v46 = vpop.eup %4182  ;;  %4192 = verf.f32 %v966_v30  ;;  %v871_v29 = vadd.f32 %v5295_v51, %v5344_v37  ;;  %v912_v56 = vmul.f32 0.5, %v5464_v28  ;;  %v55_v30 = vld [vmem:[%s6593_s1 + $0x18] sm:$0xff] }
 0x21a   :  { %1421 = vmatmul.mubr.f32.gmra.mrb[94].mxu1 %v1126_v41  ;;  %v1092_v63 = vmul.f32 %v1044_v18, %v900_v17  ;;  %v1047_v4 = vadd.f32 1.0, %v4183_v46  ;;  %v969_v11 = vmul.f32 0.70710677, %v861_v42  ;;  %v876_v23 = vadd.f32 %v5307_v43, %v5344_v37 }
 0x21b   :  { %1491 = vmatprep.mubr.f32.mxu1 %v6603_v5  ;;  %v4185_v26 = vpop.eup %4184  ;;  %v975_v44 = vmul.f32 0.70710677, %v871_v29  ;;  %v915_v51 = vmul.f32 0.5, %v851_v45  ;;  %v918_v31 = vmul.f32 0.5, %v856_v49  ;;  %v886_v57 = vadd.f32 %v5329_v32, %v5344_v37 }
 0x21c   :  { %3774 = vmatpush1.bf16.msra.mxu0 %v3773_v9  ;;  %v1095_v10 = vmul.f32 %v1047_v4, %v903_v14  ;;  %v1050_v13 = vadd.f32 1.0, %v4185_v26  ;;  %v4187_v47 = vpop.eup %4186  ;;  %4194 = verf.f32 %v969_v11  ;;  %v978_v21 = vmul.f32 0.70710677, %v876_v23  ;;  %v52_v4 = vld [vmem:[%s6593_s1] sm:$0xff]  ;;  %v54_v14 = vld [vmem:[%s6593_s1 + $0x10] sm:$0xff] }
 0x21d   :  { %3775 = vmatprep.subr.bf16.mxu0 %v6605_v8  ;;  %v1053_v40 = vadd.f32 1.0, %v4187_v47  ;;  %4196 = verf.f32 %v972_v7  ;;  %v924_v54 = vmul.f32 0.5, %v866_v15  ;;  %v927_v34 = vmul.f32 0.5, %v871_v29  ;;  %v57_v47 = vld [vmem:[%s6593_s1 + $0x28] sm:$0xff]  ;;  %v58_v11 = vld [vmem:[%s6593_s1 + $0x30] sm:$0xff]  ;;  %v59_v15 = vld [vmem:[%s6593_s1 + $0x38] sm:$0xff] }
 0x21e   :  { %3452 = vmatmul.mubr.msk.f32.vlgmr.msra.gmra.mrb[64].mxu1 %vm1217_vm3, %v1083_v16  ;;  %v1098_v36 = vmul.f32 %v1050_v13, %v906_v35  ;;  %v4189_v61 = vpop.eup %4188  ;;  %4198 = verf.f32 %v975_v44  ;;  %v881_v16 = vadd.f32 %v5323_v12, %v5344_v37  ;;  %v984_v12 = vmul.f32 0.70710677, %v886_v57  ;;  %v1905_v13 = vld [vmem:[%s6598_s6 + $0x20] sm:$0xff]  ;;  %v65_v29 = vld [vmem:[%s6593_s1 + $0x68] sm:$0xff] }
 0x21f   :  { %1497 = vmatprep.mubr.f32.mxu1 %v6603_v5  ;;  %v1101_v53 = vmul.f32 %v1053_v40, %v909_v24  ;;  %v1056_v41 = vadd.f32 1.0, %v4189_v61  ;;  %4200 = verf.f32 %v978_v21  ;;  %v930_v18 = vmul.f32 0.5, %v876_v23  ;;  %v61_v40 = vld [vmem:[%s6593_s1 + $0x48] sm:$0xff]  ;;  %v62_v61 = vld [vmem:[%s6593_s1 + $0x50] sm:$0xff]  ;;  %v63_v24 = vld [vmem:[%s6593_s1 + $0x58] sm:$0xff] }
 0x220   :  { %3777 = vmatpush1.bf16.msra.mxu0 %v3776_v50  ;;  %v981_v43 = vmul.f32 0.70710677, %v881_v16  ;;  %v933_v48 = vmul.f32 0.5, %v881_v16  ;;  %v936_v49 = vmul.f32 0.5, %v886_v57  ;;  %v4397_v26 = vmov 0   ;;  %v64_v7 = vld [vmem:[%s6593_s1 + $0x60] sm:$0xff] }
 0x221   :  { %3778 = vmatprep.subr.bf16.mxu0 %v6605_v8  ;;  %v4191_v6 = vpop.eup %4190  ;;  %v1104_v38 = vmul.f32 %v1056_v41, %v912_v56  ;;  %4044 = vset.pattern.permute.xlu0 %v4397_v26  ;;  %v67_v41 = vld [vmem:[%s6593_s1 + $0x78] sm:$0xff]  ;;  %v5592_v56 = vld [vmem:[%s6601_s9 + $0x8] sm:$0x7f]  ;;  %v5600_v23 = vld [vmem:[%s6601_s9] sm:$0x7f] }
 0x222   :  { %3453 = vmatmul.mubr.msk.f32.gmra.mrb[66].mxu1 %vm1217_vm3, %v1086_v39  ;;  %v1059_v0 = vadd.f32 1.0, %v4191_v6  ;;  %v921_v39 = vmul.f32 0.5, %v861_v42  ;;  %4202 = verf.f32 %v981_v43  ;;  %4045 = vset.pattern.permute.xlu1 %v4397_v26  ;;  %v56_v42 = vld [vmem:[%s6593_s1 + $0x20] sm:$0xff]  ;;  %v1211_v6 = vsub.s32 2, %v4751_v58  ;;  %v1908_v21 = vld [vmem:[%s6598_s6 + $0x38] sm:$0xff]  ;;  %v1911_v16 = vld [vmem:[%s6598_s6 + $0x50] sm:$0xff] }
 0x223   :  { %1503 = vmatprep.mubr.f32.mxu1 %v6603_v5  ;;  %v4193_v2 = vpop.eup %4192  ;;  %4204 = verf.f32 %v984_v12  ;;  %1807 = vperm.xlu0 %4044, %v52_v4   ;;  %v3788_v43 = vpack.c.bf16 %v1911_v16, %v1908_v21  ;;  %v1907_v57 = vld [vmem:[%s6598_s6 + $0x30] sm:$0xff] }
 0x224   :  { %3780 = vmatpush1.bf16.msra.mxu0 %v3779_v22  ;;  %v1107_v55 = vmul.f32 %v1059_v0, %v915_v51  ;;  %v1062_v60 = vadd.f32 1.0, %v4193_v2  ;;  %1817 = vperm.xlu1 %4045, %v54_v14   ;;  %v5595_v44 = vrot.slane %v5592_v56, %v1211_v6  ;;  %v1901_v0 = vld [vmem:[%s6598_s6] sm:$0xff]  ;;  %v1904_v2 = vld [vmem:[%s6598_s6 + $0x18] sm:$0xff] }
 0x225   :  { %3781 = vmatprep.subr.bf16.mxu0 %v6605_v8 }
 0x226   :  { %3454 = vmatmul.mubr.msk.f32.gmra.mrb[68].mxu1 %vm1217_vm3, %v1089_v52  ;;  %v4195_v9 = vpop.eup %4194  ;;  %v1110_v25 = vmul.f32 %v1062_v60, %v918_v31 }
 0x227   :  { %1509 = vmatprep.mubr.f32.mxu1 %v6603_v5  ;;  %v1065_v1 = vadd.f32 1.0, %v4195_v9  ;;  %v4197_v28 = vpop.eup %4196  ;;  %v3786_v9 = vpack.c.bf16 %v1904_v2, %v1901_v0 }
 0x228   :  { %3783 = vmatpush1.bf16.msra.mxu0 %v3782_v27  ;;  %v1068_v33 = vadd.f32 1.0, %v4197_v28  ;;  %v4199_v50 = vpop.eup %4198  ;;  %v53_v27 = vld [vmem:[%s6593_s1 + $0x8] sm:$0xff]  ;;  %1822 = vperm.xlu1 %4045, %v55_v30  }
 0x229   :  { %v1113_v19 = vmul.f32 %v1065_v1, %v921_v39  ;;  %v1071_v37 = vadd.f32 1.0, %v4199_v50  ;;  %v4201_v3 = vpop.eup %4200  ;;  %1812 = vperm.xlu0 %4044, %v53_v27  }
 0x22a   :  { %3455 = vmatmul.mubr.msk.f32.gmra.mrb[70].mxu1 %vm1217_vm3, %v1092_v63  ;;  %v1116_v32 = vmul.f32 %v1068_v33, %v924_v54  ;;  %v1074_v45 = vadd.f32 1.0, %v4201_v3 }
 0x22b   :  { %1515 = vmatprep.mubr.f32.mxu1 %v6603_v5  ;;  %v1119_v59 = vmul.f32 %v1071_v37, %v927_v34 }
 0x22c   :  { %v4203_v52 = vpop.eup %4202  ;;  %v1122_v46 = vmul.f32 %v1074_v45, %v930_v18  ;;  %1832 = vperm.xlu1 %4045, %v57_v47  }
 0x22d   :  { %v1077_v22 = vadd.f32 1.0, %v4203_v52  ;;  %v4205_v17 = vpop.eup %4204  ;;  %1827 = vperm.xlu0 %4044, %v56_v42  }
 0x22e   :  { %3456 = vmatmul.mubr.msk.f32.gmra.mrb[72].mxu1 %vm1217_vm3, %v1095_v10  ;;  %v1080_v20 = vadd.f32 1.0, %v4205_v17  ;;  %v1902_v10 = vld [vmem:[%s6598_s6 + $0x8] sm:$0xff] }
 0x22f   :  { %1521 = vmatprep.mubr.f32.mxu1 %v6603_v5  ;;  %v1125_v62 = vmul.f32 %v1077_v22, %v933_v48  ;;  %v3784_v35 = vpack.c.bf16 %v1905_v13, %v1902_v10 }
 0x230   :  { %v1128_v63 = vmul.f32 %v1080_v20, %v936_v49  ;;  %1842 = vperm.xlu1 %4045, %v59_v15  }
 0x231   :  { %3785 = vmatprep.subr.bf16.mxu0 %v3784_v35  ;;  %1837 = vperm.xlu0 %4044, %v58_v11  }
 0x232   :  { %3457 = vmatmul.mubr.msk.f32.gmra.mrb[74].mxu1 %vm1217_vm3, %v1098_v36  ;;  %v60_v36 = vld [vmem:[%s6593_s1 + $0x40] sm:$0xff] }
 0x233   :  { %1527 = vmatprep.mubr.f32.mxu1 %v6603_v5 }
 0x234   :  { %1852 = vperm.xlu1 %4045, %v61_v40  }
 0x235   :  { %1847 = vperm.xlu0 %4044, %v60_v36  }
 0x236   :  { %3458 = vmatmul.mubr.msk.f32.gmra.mrb[76].mxu1 %vm1217_vm3, %v1101_v53  ;;  %v66_v53 = vld [vmem:[%s6593_s1 + $0x70] sm:$0xff] }
 0x237   :  { %1533 = vmatprep.mubr.f32.mxu1 %v6603_v5 }
 0x238   :  { %1862 = vperm.xlu1 %4045, %v63_v24  }
 0x239   :  { %1857 = vperm.xlu0 %4044, %v62_v61  }
 0x23a   :  { %3459 = vmatmul.mubr.msk.f32.gmra.mrb[78].mxu1 %vm1217_vm3, %v1104_v38  ;;  %v5603_v38 = vrot.slane %v5600_v23, %v1211_v6 }
 0x23b   :  { %1539 = vmatprep.mubr.f32.mxu1 %v6603_v5 }
 0x23c   :  { %1872 = vperm.xlu1 %4045, %v65_v29  }
 0x23d   :  { %1867 = vperm.xlu0 %4044, %v64_v7  }
 0x23e   :  { %3460 = vmatmul.mubr.msk.f32.gmra.mrb[80].mxu1 %vm1217_vm3, %v1107_v55 }
 0x23f   :  { %1545 = vmatprep.mubr.f32.mxu1 %v6603_v5 }
 0x240   :  { %1882 = vperm.xlu1 %4045, %v67_v41  }
 0x241   :  { %1877 = vperm.xlu0 %4044, %v66_v53  }
 0x242   :  { %3461 = vmatmul.mubr.msk.f32.gmra.mrb[82].mxu1 %vm1217_vm3, %v1110_v25  ;;  %v1910_v25 = vld [vmem:[%s6598_s6 + $0x48] sm:$0xff] }
 0x243   :  { %1551 = vmatprep.mubr.f32.mxu1 %v6603_v5  ;;  %v3790_v12 = vpack.c.bf16 %v1910_v25, %v1907_v57 }
 0x246   :  { %3462 = vmatmul.mubr.msk.f32.gmra.mrb[84].mxu1 %vm1217_vm3, %v1113_v19 }
 0x247   :  { %1557 = vmatprep.mubr.f32.mxu1 %v6603_v5 }
 0x24a   :  { %3463 = vmatmul.mubr.msk.f32.gmra.mrb[86].mxu1 %vm1217_vm3, %v1116_v32 }
 0x24b   :  { %1563 = vmatprep.mubr.f32.mxu1 %v6603_v5 }
 0x24e   :  { %3464 = vmatmul.mubr.msk.f32.gmra.mrb[88].mxu1 %vm1217_vm3, %v1119_v59 }
 0x24f   :  { %1569 = vmatprep.mubr.f32.mxu1 %v6603_v5 }
 0x252   :  { %3465 = vmatmul.mubr.msk.f32.gmra.mrb[90].mxu1 %vm1217_vm3, %v1122_v46 }
 0x253   :  { %1575 = vmatprep.mubr.f32.mxu1 %v6603_v5 }
 0x256   :  { %3466 = vmatmul.mubr.msk.f32.gmra.mrb[92].mxu1 %vm1217_vm3, %v1125_v62 }
 0x257   :  { %1581 = vmatprep.mubr.f32.mxu1 %v6603_v5 }
 0x25a   :  { %3467 = vmatmul.mubr.msk.f32.gmra.mrb[94].mxu1 %vm1217_vm3, %v1128_v63 }
 0x2f1   :  { %v1493_v51 = vpop.f32.mrb[64].mxu1 }
 0x2f2   :  { %v1495_v55 = vpop.f32.mrb[65].mxu1  ;;  %v3910_v31 = vadd.f32 %v1493_v51, %v5603_v38 }
 0x2f3   :  { %v3911_v60 = vadd.f32 %v1495_v55, %v5595_v44 }
 0x2f5   :  { %v1499_v1 = vpop.f32.mrb[66].mxu1  ;;  %3468 = vmatprep.mubr.msk.f32.mxu0 %vm534_vm2, %v3911_v60 }
 0x2f6   :  { %v1501_v28 = vpop.f32.mrb[67].mxu1  ;;  %1725 = vmatmul.mubr.f32.vlgmr.msra.gmra.mrb[32].mxu0 %v3910_v31  ;;  %v3912_v19 = vadd.f32 %v1499_v1, %v5603_v38 }
 0x2f7   :  { %v3913_v39 = vadd.f32 %v1501_v28, %v5595_v44  ;;  %3787 = vmatpush1.bf16.msra.mxu0 %v3786_v9 }
 0x2f8   :  { %3789 = vmatprep.subr.bf16.mxu0 %v3788_v43 }
 0x2f9   :  { %v1505_v33 = vpop.f32.mrb[68].mxu1  ;;  %3469 = vmatprep.mubr.msk.f32.mxu0 %vm534_vm2, %v3913_v39 }
 0x2fa   :  { %v1507_v50 = vpop.f32.mrb[69].mxu1  ;;  %1730 = vmatmul.mubr.f32.gmra.mrb[34].mxu0 %v3912_v19  ;;  %v3914_v32 = vadd.f32 %v1505_v33, %v5603_v38  ;;  %v1903_v19 = vld [vmem:[%s6598_s6 + $0x10] sm:$0xff]  ;;  %v1906_v33 = vld [vmem:[%s6598_s6 + $0x28] sm:$0xff] }
 0x2fb   :  { %v3915_v54 = vadd.f32 %v1507_v50, %v5595_v44  ;;  %3791 = vmatpush1.bf16.msra.mxu0 %v3790_v12  ;;  %v3792_v50 = vpack.c.bf16 %v1906_v33, %v1903_v19  ;;  %v2542_v19 = vld [vmem:[%s6599_s7 + $0xb8] sm:$0xff] }
 0x2fd   :  { %v1511_v37 = vpop.f32.mrb[70].mxu1  ;;  %3470 = vmatprep.mubr.msk.f32.mxu0 %vm534_vm2, %v3915_v54  ;;  %3793 = vmatprep.subr.bf16.mxu1 %v3792_v50 }
 0x2fe   :  { %v1513_v3 = vpop.f32.mrb[71].mxu1  ;;  %1735 = vmatmul.mubr.f32.gmra.mrb[36].mxu0 %v3914_v32  ;;  %v3916_v59 = vadd.f32 %v1511_v37, %v5603_v38  ;;  %3795 = vmatpush3.bf16.msra.mxu1 %v3792_v50  ;;  %v2520_v32 = vld [vmem:[%s6599_s7 + $0x8] sm:$0xff]  ;;  %v2522_v37 = vld [vmem:[%s6599_s7 + $0x18] sm:$0xff] }
 0x2ff   :  { %v3917_v34 = vadd.f32 %v1513_v3, %v5595_v44  ;;  %v3800_v3 = vpack.c.bf16 %v2522_v37, %v2520_v32  ;;  %v2539_v37 = vld [vmem:[%s6599_s7 + $0xa0] sm:$0xff] }
 0x301   :  { %v1517_v45 = vpop.f32.mrb[72].mxu1  ;;  %3471 = vmatprep.mubr.msk.f32.mxu0 %vm534_vm2, %v3917_v34  ;;  %3801 = vmatprep.subr.bf16.mxu0 %v3800_v3  ;;  %v1610_v34 = vsub.s32 3, %v4751_v58  ;;  %v2541_v3 = vld [vmem:[%s6599_s7 + $0xb0] sm:$0xff] }
 0x302   :  { %v1519_v52 = vpop.f32.mrb[73].mxu1  ;;  %1740 = vmatmul.mubr.f32.gmra.mrb[38].mxu0 %v3916_v59  ;;  %v3918_v46 = vadd.f32 %v1517_v45, %v5603_v38  ;;  %v2519_v45 = vld [vmem:[%s6599_s7] sm:$0xff] }
 0x303   :  { %v3919_v18 = vadd.f32 %v1519_v52, %v5595_v44  ;;  %v5693_v59 = vrot.slane %v5600_v23, %v1610_v34  ;;  %v2521_v52 = vld [vmem:[%s6599_s7 + $0x10] sm:$0xff] }
 0x305   :  { %v1523_v22 = vpop.f32.mrb[74].mxu1  ;;  %3472 = vmatprep.mubr.msk.f32.mxu0 %vm534_vm2, %v3919_v18  ;;  %v5701_v18 = vpop.permute.xlu0 %1807 }
 0x306   :  { %v1525_v17 = vpop.f32.mrb[75].mxu1  ;;  %1745 = vmatmul.mubr.f32.gmra.mrb[40].mxu0 %v3918_v46  ;;  %v3920_v62 = vadd.f32 %v1523_v22, %v5603_v38  ;;  %v2524_v22 = vld [vmem:[%s6599_s7 + $0x28] sm:$0xff] }
 0x307   :  { %v3921_v48 = vadd.f32 %v1525_v17, %v5595_v44  ;;  %v2526_v17 = vld [vmem:[%s6599_s7 + $0x38] sm:$0xff] }
 0x309   :  { %v1529_v20 = vpop.f32.mrb[76].mxu1  ;;  %3473 = vmatprep.mubr.msk.f32.mxu0 %vm534_vm2, %v3921_v48 }
 0x30a   :  { %v1531_v49 = vpop.f32.mrb[77].mxu1  ;;  %1750 = vmatmul.mubr.f32.gmra.mrb[42].mxu0 %v3920_v62  ;;  %v3922_v4 = vadd.f32 %v1529_v20, %v5603_v38  ;;  %v3802_v20 = vpack.c.bf16 %v2521_v52, %v2519_v45  ;;  %v2544_v45 = vld [vmem:[%s6599_s7 + $0xc8] sm:$0xff]  ;;  %v2546_v52 = vld [vmem:[%s6599_s7 + $0xd8] sm:$0xff] }
 0x30b   :  { %v3923_v63 = vadd.f32 %v1531_v49, %v5595_v44 }
 0x30d   :  { %v1535_v26 = vpop.f32.mrb[78].mxu1  ;;  %3474 = vmatprep.mubr.msk.f32.mxu0 %vm534_vm2, %v3923_v63  ;;  %v3804_v63 = vpack.c.bf16 %v2526_v17, %v2524_v22 }
 0x30e   :  { %v1537_v27 = vpop.f32.mrb[79].mxu1  ;;  %1755 = vmatmul.mubr.f32.gmra.mrb[44].mxu0 %v3922_v4  ;;  %v3924_v30 = vadd.f32 %v1535_v26, %v5603_v38  ;;  %v2523_v4 = vld [vmem:[%s6599_s7 + $0x20] sm:$0xff]  ;;  %v2525_v26 = vld [vmem:[%s6599_s7 + $0x30] sm:$0xff] }
 0x30f   :  { %v3925_v14 = vadd.f32 %v1537_v27, %v5595_v44 }
 0x311   :  { %v1541_v42 = vpop.f32.mrb[80].mxu1  ;;  %3475 = vmatprep.mubr.msk.f32.mxu0 %vm534_vm2, %v3925_v14  ;;  %v2528_v14 = vld [vmem:[%s6599_s7 + $0x48] sm:$0xff] }
 0x312   :  { %v1543_v10 = vpop.f32.mrb[81].mxu1  ;;  %1760 = vmatmul.mubr.f32.gmra.mrb[46].mxu0 %v3924_v30  ;;  %v3926_v47 = vadd.f32 %v1541_v42, %v5603_v38  ;;  %v2530_v30 = vld [vmem:[%s6599_s7 + $0x58] sm:$0xff] }
 0x313   :  { %v3927_v13 = vadd.f32 %v1543_v10, %v5595_v44 }
 0x315   :  { %v1547_v35 = vpop.f32.mrb[82].mxu1  ;;  %3476 = vmatprep.mubr.msk.f32.mxu0 %vm534_vm2, %v3927_v13  ;;  %v5726_v13 = vpop.permute.xlu0 %1812 }
 0x316   :  { %v1549_v11 = vpop.f32.mrb[83].mxu1  ;;  %1765 = vmatmul.mubr.f32.gmra.mrb[48].mxu0 %v3926_v47  ;;  %v3928_v36 = vadd.f32 %v1547_v35, %v5603_v38  ;;  %v3806_v47 = vpack.c.bf16 %v2525_v26, %v2523_v4  ;;  %v2548_v26 = vld [vmem:[%s6599_s7 + $0xe8] sm:$0xff] }
 0x317   :  { %v3929_v15 = vadd.f32 %v1549_v11, %v5595_v44  ;;  %v3808_v11 = vpack.c.bf16 %v2530_v30, %v2528_v14 }
 0x319   :  { %v1553_v40 = vpop.f32.mrb[84].mxu1  ;;  %3477 = vmatprep.mubr.msk.f32.mxu0 %vm534_vm2, %v3929_v15  ;;  %v2527_v15 = vld [vmem:[%s6599_s7 + $0x40] sm:$0xff] }
 0x31a   :  { %v1555_v61 = vpop.f32.mrb[85].mxu1  ;;  %1770 = vmatmul.mubr.f32.gmra.mrb[50].mxu0 %v3928_v36  ;;  %v3930_v7 = vadd.f32 %v1553_v40, %v5603_v38  ;;  %v2529_v36 = vld [vmem:[%s6599_s7 + $0x50] sm:$0xff]  ;;  %v5736_v40 = vpop.permute.xlu1 %1817 }
 0x31b   :  { %v3931_v24 = vadd.f32 %v1555_v61, %v5595_v44 }
 0x31d   :  { %v1559_v29 = vpop.f32.mrb[86].mxu1  ;;  %3478 = vmatprep.mubr.msk.f32.mxu0 %vm534_vm2, %v3931_v24  ;;  %v2532_v24 = vld [vmem:[%s6599_s7 + $0x68] sm:$0xff] }
 0x31e   :  { %v1561_v53 = vpop.f32.mrb[87].mxu1  ;;  %1775 = vmatmul.mubr.f32.gmra.mrb[52].mxu0 %v3930_v7  ;;  %v3932_v6 = vadd.f32 %v1559_v29, %v5603_v38  ;;  %v2534_v7 = vld [vmem:[%s6599_s7 + $0x78] sm:$0xff] }
 0x31f   :  { %v3933_v41 = vadd.f32 %v1561_v53, %v5595_v44 }
 0x321   :  { %v1565_v0 = vpop.f32.mrb[88].mxu1  ;;  %3479 = vmatprep.mubr.msk.f32.mxu0 %vm534_vm2, %v3933_v41  ;;  %v3810_v41 = vpack.c.bf16 %v2529_v36, %v2527_v15  ;;  %v2549_v15 = vld [vmem:[%s6599_s7 + $0xf0] sm:$0xff] }
 0x322   :  { %v1567_v2 = vpop.f32.mrb[89].mxu1  ;;  %1780 = vmatmul.mubr.f32.gmra.mrb[54].mxu0 %v3932_v6  ;;  %v3934_v21 = vadd.f32 %v1565_v0, %v5603_v38  ;;  %v3812_v0 = vpack.c.bf16 %v2534_v7, %v2532_v24  ;;  %v2554_v24 = vld [vmem:[%s6599_s7 + $0x118] sm:$0xff] }
 0x323   :  { %v3935_v51 = vadd.f32 %v1567_v2, %v5595_v44  ;;  %v2531_v2 = vld [vmem:[%s6599_s7 + $0x60] sm:$0xff] }
 0x325   :  { %v1571_v16 = vpop.f32.mrb[90].mxu1  ;;  %3480 = vmatprep.mubr.msk.f32.mxu0 %vm534_vm2, %v3935_v51  ;;  %v2533_v51 = vld [vmem:[%s6599_s7 + $0x70] sm:$0xff] }
 0x326   :  { %v1573_v55 = vpop.f32.mrb[91].mxu1  ;;  %1785 = vmatmul.mubr.f32.gmra.mrb[56].mxu0 %v3934_v21  ;;  %v3936_v9 = vadd.f32 %v1571_v16, %v5603_v38  ;;  %v2536_v16 = vld [vmem:[%s6599_s7 + $0x88] sm:$0xff] }
 0x327   :  { %v3937_v60 = vadd.f32 %v1573_v55, %v5595_v44  ;;  %v2538_v55 = vld [vmem:[%s6599_s7 + $0x98] sm:$0xff] }
 0x329   :  { %v1577_v31 = vpop.f32.mrb[92].mxu1  ;;  %3481 = vmatprep.mubr.msk.f32.mxu0 %vm534_vm2, %v3937_v60 }
 0x32a   :  { %v1579_v43 = vpop.f32.mrb[93].mxu1  ;;  %1790 = vmatmul.mubr.f32.gmra.mrb[58].mxu0 %v3936_v9  ;;  %v3938_v25 = vadd.f32 %v1577_v31, %v5603_v38  ;;  %v5764_v31 = vpop.permute.xlu1 %1822 }
 0x32b   :  { %v3939_v57 = vadd.f32 %v1579_v43, %v5595_v44  ;;  %v3814_v43 = vpack.c.bf16 %v2533_v51, %v2531_v2  ;;  %v2551_v2 = vld [vmem:[%s6599_s7 + $0x100] sm:$0xff]  ;;  %v2553_v51 = vld [vmem:[%s6599_s7 + $0x110] sm:$0xff] }
 0x32d   :  { %v1583_v1 = vpop.f32.mrb[94].mxu1  ;;  %3482 = vmatprep.mubr.msk.f32.mxu0 %vm534_vm2, %v3939_v57 }
 0x32e   :  { %v1585_v28 = vpop.f32.mrb[95].mxu1  ;;  %1795 = vmatmul.mubr.f32.gmra.mrb[60].mxu0 %v3938_v25  ;;  %v3940_v12 = vadd.f32 %v1583_v1, %v5603_v38  ;;  %v1912_v38 = vld [vmem:[%s6598_s6 + $0x58] sm:$0xff]  ;;  %v3816_v25 = vpack.c.bf16 %v2538_v55, %v2536_v16  ;;  %v2535_v1 = vld [vmem:[%s6599_s7 + $0x80] sm:$0xff]  ;;  %v5802_v17 = vpop.permute.xlu1 %1832  ;;  %v2556_v16 = vld [vmem:[%s6599_s7 + $0x128] sm:$0xff] }
 0x32f   :  { %v3941_v39 = vadd.f32 %v1585_v28, %v5595_v44  ;;  %v1909_v44 = vld [vmem:[%s6598_s6 + $0x40] sm:$0xff]  ;;  %v2537_v28 = vld [vmem:[%s6599_s7 + $0x90] sm:$0xff]  ;;  %v2558_v55 = vld [vmem:[%s6599_s7 + $0x138] sm:$0xff] }
 0x330   :  { %v3796_v54 = vpack.c.bf16 %v1912_v38, %v1909_v44  ;;  %v5783_v44 = vpop.permute.xlu0 %1827  ;;  %v3818_v38 = vpack.c.bf16 %v2537_v28, %v2535_v1  ;;  %v3836_v1 = vpack.c.bf16 %v2558_v55, %v2556_v16  ;;  %v2555_v28 = vld [vmem:[%s6599_s7 + $0x120] sm:$0xff] }
 0x331   :  { %3483 = vmatprep.mubr.msk.f32.mxu0 %vm534_vm2, %v3941_v39 }
 0x332   :  { %1800 = vmatmul.mubr.f32.gmra.mrb[62].mxu0 %v3940_v12  ;;  %3797 = vmatprep.subr.bf16.mxu1 %v3796_v54  ;;  %v2540_v12 = vld [vmem:[%s6599_s7 + $0xa8] sm:$0xff] }
 0x333   :  { %2037 = vmatprep.mubr.f32.mxu0 %v6603_v5  ;;  %3799 = vmatpush3.bf16.msra.mxu1 %v3796_v54  ;;  %v3820_v32 = vpack.c.bf16 %v2542_v19, %v2540_v12  ;;  %v2560_v19 = vld [vmem:[%s6599_s7 + $0x148] sm:$0xff] }
 0x334   :  { %3880 = vmatprep.subr.bf16.mxu1 %v6605_v8 }
 0x3c9   :  { %v1726_v46 = vpop.f32.mrb[32].mxu0 }
 0x3ca   :  { %v1727_v48 = vadd.f32 %v1726_v46, %v5693_v59  ;;  %v1728_v62 = vpop.f32.mrb[33].mxu0 }
 0x3cc   :  { %v1885_v49 = vmul.f32 %v5701_v18, %v1727_v48  ;;  %v3822_v48 = vpack.c.bf16 %v2541_v3, %v2539_v37 }
 0x3cd   :  { %v1731_v27 = vpop.f32.mrb[34].mxu0 }
 0x3ce   :  { %v1732_v42 = vadd.f32 %v1731_v27, %v5693_v59  ;;  %v1733_v10 = vpop.f32.mrb[35].mxu0  ;;  %3484 = vmatmul.mubr.msk.f32.vlgmr.msra.gmra.mrb[64].mxu0 %vm534_vm2, %v1885_v49  ;;  %3576 = vmatprep.mubr.msk.f32.mxu1 %vm534_vm2, %v1885_v49  ;;  %v2543_v49 = vld [vmem:[%s6599_s7 + $0xc0] sm:$0xff]  ;;  %v2550_v27 = vld [vmem:[%s6599_s7 + $0xf8] sm:$0xff] }
 0x3cf   :  { %2043 = vmatprep.mubr.f32.mxu0 %v6603_v5  ;;  %3803 = vmatpush1.bf16.msra.mxu0 %v3802_v20  ;;  %v3824_v20 = vpack.c.bf16 %v2546_v52, %v2544_v45  ;;  %v2561_v45 = vld [vmem:[%s6599_s7 + $0x150] sm:$0xff] }
 0x3d0   :  { %v1886_v35 = vmul.f32 %v5726_v13, %v1732_v42  ;;  %3805 = vmatprep.subr.bf16.mxu0 %v3804_v63  ;;  %v2545_v63 = vld [vmem:[%s6599_s7 + $0xd0] sm:$0xff]  ;;  %v5821_v42 = vpop.permute.xlu0 %1837 }
 0x3d1   :  { %v1736_v61 = vpop.f32.mrb[36].mxu0  ;;  %v3826_v10 = vpack.c.bf16 %v2545_v63, %v2543_v49 }
 0x3d2   :  { %v1737_v29 = vadd.f32 %v1736_v61, %v5693_v59  ;;  %v1738_v53 = vpop.f32.mrb[37].mxu0  ;;  %3485 = vmatmul.mubr.msk.f32.gmra.mrb[66].mxu0 %vm534_vm2, %v1886_v35  ;;  %3577 = vmatmul.mubr.msk.f32.vlgmr.msra.gmra.mrb[96].mxu1 %vm534_vm2, %v1886_v35  ;;  %v3828_v35 = vpack.c.bf16 %v2550_v27, %v2548_v26  ;;  %v2552_v61 = vld [vmem:[%s6599_s7 + $0x108] sm:$0xff] }
 0x3d3   :  { %2049 = vmatprep.mubr.f32.mxu0 %v6603_v5  ;;  %3807 = vmatpush1.bf16.msra.mxu0 %v3806_v47  ;;  %v5840_v53 = vpop.permute.xlu1 %1842 }
 0x3d4   :  { %v1887_v6 = vmul.f32 %v5736_v40, %v1737_v29  ;;  %3809 = vmatprep.subr.bf16.mxu0 %v3808_v11  ;;  %v2547_v11 = vld [vmem:[%s6599_s7 + $0xe0] sm:$0xff] }
 0x3d5   :  { %v1741_v21 = vpop.f32.mrb[38].mxu0 }
 0x3d6   :  { %v1742_v60 = vadd.f32 %v1741_v21, %v5693_v59  ;;  %v1743_v9 = vpop.f32.mrb[39].mxu0  ;;  %3486 = vmatmul.mubr.msk.f32.gmra.mrb[68].mxu0 %vm534_vm2, %v1887_v6  ;;  %3579 = vmatprep.mubr.msk.f32.mxu1 %vm534_vm2, %v1887_v6 }
 0x3d7   :  { %2055 = vmatprep.mubr.f32.mxu0 %v6603_v5  ;;  %3811 = vmatpush1.bf16.msra.mxu0 %v3810_v41  ;;  %v3830_v41 = vpack.c.bf16 %v2549_v15, %v2547_v11 }
 0x3d8   :  { %v1888_v57 = vmul.f32 %v5764_v31, %v1742_v60  ;;  %3813 = vmatprep.subr.bf16.mxu0 %v3812_v0  ;;  %v3832_v0 = vpack.c.bf16 %v2554_v24, %v2552_v61 }
 0x3d9   :  { %v1746_v39 = vpop.f32.mrb[40].mxu0 }
 0x3da   :  { %v1747_v33 = vadd.f32 %v1746_v39, %v5693_v59  ;;  %v1748_v50 = vpop.f32.mrb[41].mxu0  ;;  %3487 = vmatmul.mubr.msk.f32.gmra.mrb[70].mxu0 %vm534_vm2, %v1888_v57  ;;  %3580 = vmatmul.mubr.msk.f32.gmra.mrb[98].mxu1 %vm534_vm2, %v1888_v57  ;;  %v3834_v57 = vpack.c.bf16 %v2553_v51, %v2551_v2  ;;  %v2557_v39 = vld [vmem:[%s6599_s7 + $0x130] sm:$0xff] }
 0x3db   :  { %2061 = vmatprep.mubr.f32.mxu0 %v6603_v5  ;;  %3815 = vmatpush1.bf16.msra.mxu0 %v3814_v43  ;;  %v5859_v43 = vpop.permute.xlu0 %1847 }
 0x3dc   :  { %v1889_v54 = vmul.f32 %v5783_v44, %v1747_v33  ;;  %3817 = vmatprep.subr.bf16.mxu0 %v3816_v25  ;;  %v2562_v33 = vld [vmem:[%s6599_s7 + $0x158] sm:$0xff] }
 0x3dd   :  { %v1751_v34 = vpop.f32.mrb[42].mxu0  ;;  %v3840_v3 = vpack.c.bf16 %v2562_v33, %v2560_v19  ;;  %v2567_v19 = vld [vmem:[%s6599_s7 + $0x180] sm:$0xff]  ;;  %v2569_v33 = vld [vmem:[%s6599_s7 + $0x190] sm:$0xff] }
 0x3de   :  { %v1752_v46 = vadd.f32 %v1751_v34, %v5693_v59  ;;  %v1753_v22 = vpop.f32.mrb[43].mxu0  ;;  %3488 = vmatmul.mubr.msk.f32.gmra.mrb[72].mxu0 %vm534_vm2, %v1889_v54  ;;  %3582 = vmatprep.mubr.msk.f32.mxu1 %vm534_vm2, %v1889_v54  ;;  %v5878_v54 = vpop.permute.xlu1 %1852  ;;  %v2559_v34 = vld [vmem:[%s6599_s7 + $0x140] sm:$0xff] }
 0x3df   :  { %2067 = vmatprep.mubr.f32.mxu0 %v6603_v5  ;;  %3819 = vmatpush1.bf16.msra.mxu0 %v3818_v38 }
 0x3e0   :  { %v1890_v62 = vmul.f32 %v5802_v17, %v1752_v46  ;;  %3821 = vmatprep.subr.bf16.mxu0 %v3820_v32  ;;  %v3838_v32 = vpack.c.bf16 %v2557_v39, %v2555_v28  ;;  %v2568_v28 = vld [vmem:[%s6599_s7 + $0x188] sm:$0xff]  ;;  %v2570_v39 = vld [vmem:[%s6599_s7 + $0x198] sm:$0xff] }
 0x3e1   :  { %v1756_v4 = vpop.f32.mrb[44].mxu0 }
 0x3e2   :  { %v1757_v14 = vadd.f32 %v1756_v4, %v5693_v59  ;;  %v1758_v30 = vpop.f32.mrb[45].mxu0  ;;  %3489 = vmatmul.mubr.msk.f32.gmra.mrb[74].mxu0 %vm534_vm2, %v1890_v62  ;;  %3583 = vmatmul.mubr.msk.f32.gmra.mrb[100].mxu1 %vm534_vm2, %v1890_v62  ;;  %v3842_v62 = vpack.c.bf16 %v2561_v45, %v2559_v34  ;;  %v5898_v26 = vpop.permute.xlu1 %1862  ;;  %v2573_v34 = vld [vmem:[%s6599_s7 + $0x1b0] sm:$0xff] }
 0x3e3   :  { %2073 = vmatprep.mubr.f32.mxu0 %v6603_v5  ;;  %3823 = vmatpush1.bf16.msra.mxu0 %v3822_v48  ;;  %v5891_v48 = vpop.permute.xlu0 %1857 }
 0x3e4   :  { %v1891_v47 = vmul.f32 %v5821_v42, %v1757_v14  ;;  %3825 = vmatprep.subr.bf16.mxu0 %v3824_v20 }
 0x3e5   :  { %v1761_v36 = vpop.f32.mrb[46].mxu0 }
 0x3e6   :  { %v1762_v7 = vadd.f32 %v1761_v36, %v5693_v59  ;;  %v1763_v29 = vpop.f32.mrb[47].mxu0  ;;  %3490 = vmatmul.mubr.msk.f32.gmra.mrb[76].mxu0 %vm534_vm2, %v1891_v47  ;;  %3585 = vmatprep.mubr.msk.f32.mxu1 %vm534_vm2, %v1891_v47  ;;  %v5912_v61 = vpop.permute.xlu1 %1872 }
 0x3e7   :  { %2079 = vmatprep.mubr.f32.mxu0 %v6603_v5  ;;  %3827 = vmatpush1.bf16.msra.mxu0 %v3826_v10  ;;  %v5905_v47 = vpop.permute.xlu0 %1867  ;;  %6610 = vst [vmem:[#allocation5_spill] sm:$0xff] %v5912_v61 }
 0x3e8   :  { %v1892_v6 = vmul.f32 %v5840_v53, %v1762_v7  ;;  %3829 = vmatprep.subr.bf16.mxu0 %v3828_v35 }
 0x3e9   :  { %v1766_v21 = vpop.f32.mrb[48].mxu0 }
 0x3ea   :  { %v1767_v60 = vadd.f32 %v1766_v21, %v5693_v59  ;;  %v1768_v9 = vpop.f32.mrb[49].mxu0  ;;  %3491 = vmatmul.mubr.msk.f32.gmra.mrb[78].mxu0 %vm534_vm2, %v1892_v6  ;;  %3586 = vmatmul.mubr.msk.f32.gmra.mrb[102].mxu1 %vm534_vm2, %v1892_v6  ;;  %v5926_v16 = vpop.permute.xlu1 %1882 }
 0x3eb   :  { %2085 = vmatprep.mubr.f32.mxu0 %v6603_v5  ;;  %3831 = vmatpush1.bf16.msra.mxu0 %v3830_v41  ;;  %v5919_v6 = vpop.permute.xlu0 %1877  ;;  %6612 = vst [vmem:[#allocation7_spill] sm:$0xff] %v5926_v16 }
 0x3ec   :  { %v1893_v25 = vmul.f32 %v5859_v43, %v1767_v60  ;;  %3833 = vmatprep.subr.bf16.mxu0 %v3832_v0  ;;  %6611 = vst [vmem:[#allocation6_spill] sm:$0xff] %v5919_v6  ;;  %v2564_v60 = vld [vmem:[%s6599_s7 + $0x168] sm:$0xff] }
 0x3ed   :  { %v1771_v12 = vpop.f32.mrb[50].mxu0 }
 0x3ee   :  { %v1772_v50 = vadd.f32 %v1771_v12, %v5693_v59  ;;  %v1773_v38 = vpop.f32.mrb[51].mxu0  ;;  %3492 = vmatmul.mubr.msk.f32.gmra.mrb[80].mxu0 %vm534_vm2, %v1893_v25  ;;  %3588 = vmatprep.mubr.msk.f32.mxu1 %vm534_vm2, %v1893_v25  ;;  %v2565_v25 = vld [vmem:[%s6599_s7 + $0x170] sm:$0xff]  ;;  %v3848_v12 = vpack.c.bf16 %v2570_v39, %v2568_v28 }
 0x3ef   :  { %2091 = vmatprep.mubr.f32.mxu0 %v6603_v5  ;;  %3835 = vmatpush1.bf16.msra.mxu0 %v3834_v57  ;;  %v2563_v57 = vld [vmem:[%s6599_s7 + $0x160] sm:$0xff]  ;;  %v2572_v38 = vld [vmem:[%s6599_s7 + $0x1a8] sm:$0xff] }
 0x3f0   :  { %v1894_v37 = vmul.f32 %v5878_v54, %v1772_v50  ;;  %3837 = vmatprep.subr.bf16.mxu0 %v3836_v1  ;;  %v3846_v1 = vpack.c.bf16 %v2565_v25, %v2563_v57  ;;  %v3850_v50 = vpack.c.bf16 %v2569_v33, %v2567_v19 }
 0x3f1   :  { %v1776_v52 = vpop.f32.mrb[52].mxu0 }
 0x3f2   :  { %v1777_v46 = vadd.f32 %v1776_v52, %v5693_v59  ;;  %v1778_v22 = vpop.f32.mrb[53].mxu0  ;;  %3493 = vmatmul.mubr.msk.f32.gmra.mrb[82].mxu0 %vm534_vm2, %v1894_v37  ;;  %3589 = vmatmul.mubr.msk.f32.gmra.mrb[104].mxu1 %vm534_vm2, %v1894_v37  ;;  %v2576_v52 = vld [vmem:[%s6599_s7 + $0x1c8] sm:$0xff] }
 0x3f3   :  { %2097 = vmatprep.mubr.f32.mxu0 %v6603_v5  ;;  %3839 = vmatpush1.bf16.msra.mxu0 %v3838_v32  ;;  %v2574_v32 = vld [vmem:[%s6599_s7 + $0x1b8] sm:$0xff] }
 0x3f4   :  { %v1895_v20 = vmul.f32 %v5891_v48, %v1777_v46  ;;  %3841 = vmatprep.subr.bf16.mxu0 %v3840_v3  ;;  %v3852_v37 = vpack.c.bf16 %v2574_v32, %v2572_v38  ;;  %v2571_v3 = vld [vmem:[%s6599_s7 + $0x1a0] sm:$0xff]  ;;  %v2578_v46 = vld [vmem:[%s6599_s7 + $0x1d8] sm:$0xff] }
 0x3f5   :  { %v1781_v49 = vpop.f32.mrb[54].mxu0  ;;  %v3854_v45 = vpack.c.bf16 %v2573_v34, %v2571_v3  ;;  %v3856_v22 = vpack.c.bf16 %v2578_v46, %v2576_v52 }
 0x3f6   :  { %v1782_v63 = vadd.f32 %v1781_v49, %v5693_v59  ;;  %v1783_v4 = vpop.f32.mrb[55].mxu0  ;;  %3494 = vmatmul.mubr.msk.f32.gmra.mrb[84].mxu0 %vm534_vm2, %v1895_v20  ;;  %3591 = vmatprep.mubr.msk.f32.mxu1 %vm534_vm2, %v1895_v20  ;;  %v2577_v20 = vld [vmem:[%s6599_s7 + $0x1d0] sm:$0xff] }
 0x3f7   :  { %2103 = vmatprep.mubr.f32.mxu0 %v6603_v5  ;;  %3843 = vmatpush1.bf16.msra.mxu0 %v3842_v62  ;;  %v2575_v62 = vld [vmem:[%s6599_s7 + $0x1c0] sm:$0xff]  ;;  %v2582_v4 = vld [vmem:[%s6599_s7 + $0x1f8] sm:$0xff] }
 0x3f8   :  { %v1896_v27 = vmul.f32 %v5898_v26, %v1782_v63  ;;  %v3858_v49 = vpack.c.bf16 %v2577_v20, %v2575_v62  ;;  %v2580_v63 = vld [vmem:[%s6599_s7 + $0x1e8] sm:$0xff]  ;;  %v2583_v62 = vld [vmem:[%s6599_s7 + $0x200] sm:$0xff]  ;;  %v2585_v20 = vld [vmem:[%s6599_s7 + $0x210] sm:$0xff] }
 0x3f9   :  { %v1786_v14 = vpop.f32.mrb[56].mxu0 }
 0x3fa   :  { %v1787_v30 = vadd.f32 %v1786_v14, %v5693_v59  ;;  %v1788_v10 = vpop.f32.mrb[57].mxu0  ;;  %3495 = vmatmul.mubr.msk.f32.gmra.mrb[86].mxu0 %vm534_vm2, %v1896_v27  ;;  %3592 = vmatmul.mubr.msk.f32.gmra.mrb[106].mxu1 %vm534_vm2, %v1896_v27  ;;  %v3860_v27 = vpack.c.bf16 %v2582_v4, %v2580_v63  ;;  %v2579_v14 = vld [vmem:[%s6599_s7 + $0x1e0] sm:$0xff] }
 0x3fb   :  { %2109 = vmatprep.mubr.f32.mxu0 %v6603_v5 }
 0x3fc   :  { %v1897_v35 = vmul.f32 %v5905_v47, %v1787_v30  ;;  %v2581_v30 = vld [vmem:[%s6599_s7 + $0x1f0] sm:$0xff] }
 0x3fd   :  { %v1791_v11 = vpop.f32.mrb[58].mxu0  ;;  %v3862_v10 = vpack.c.bf16 %v2581_v30, %v2579_v14  ;;  %v2590_v14 = vld [vmem:[%s6599_s7 + $0x238] sm:$0xff] }
 0x3fe   :  { %v1792_v15 = vadd.f32 %v1791_v11, %v5693_v59  ;;  %v1793_v36 = vpop.f32.mrb[59].mxu0  ;;  %3496 = vmatmul.mubr.msk.f32.gmra.mrb[88].mxu0 %vm534_vm2, %v1897_v35  ;;  %3594 = vmatprep.mubr.msk.f32.mxu1 %vm534_vm2, %v1897_v35  ;;  %v2584_v35 = vld [vmem:[%s6599_s7 + $0x208] sm:$0xff]  ;;  %v2586_v11 = vld [vmem:[%s6599_s7 + $0x218] sm:$0xff] }
 0x3ff   :  { %2115 = vmatprep.mubr.f32.mxu0 %v6603_v5  ;;  %v5999_v36 = vsub.s32 4, %v4751_v58 }
 0x400   :  { %v1898_v24 = vmul.f32 %v5912_v61, %v1792_v15  ;;  %v3864_v15 = vpack.c.bf16 %v2586_v11, %v2584_v35 }
 0x401   :  { %v1796_v7 = vpop.f32.mrb[60].mxu0 }
 0x402   :  { %v1797_v29 = vadd.f32 %v1796_v7, %v5693_v59  ;;  %v1798_v41 = vpop.f32.mrb[61].mxu0  ;;  %3497 = vmatmul.mubr.msk.f32.gmra.mrb[90].mxu0 %vm534_vm2, %v1898_v24  ;;  %3595 = vmatmul.mubr.msk.f32.gmra.mrb[108].mxu1 %vm534_vm2, %v1898_v24  ;;  %v6003_v24 = vrot.slane %v5600_v23, %v5999_v36  ;;  %v6007_v7 = vrot.slane %v5592_v56, %v5999_v36 }
 0x403   :  { %2121 = vmatprep.mubr.f32.mxu0 %v6603_v5 }
 0x404   :  { %v1899_v0 = vmul.f32 %v5919_v6, %v1797_v29 }
 0x405   :  { %v1801_v2 = vpop.f32.mrb[62].mxu0 }
 0x406   :  { %v1802_v51 = vadd.f32 %v1801_v2, %v5693_v59  ;;  %v1803_v21 = vpop.f32.mrb[63].mxu0  ;;  %3498 = vmatmul.mubr.msk.f32.gmra.mrb[92].mxu0 %vm534_vm2, %v1899_v0  ;;  %3597 = vmatprep.mubr.msk.f32.mxu1 %vm534_vm2, %v1899_v0  ;;  %v2566_v59 = vld [vmem:[%s6599_s7 + $0x178] sm:$0xff] }
 0x407   :  { %2127 = vmatprep.mubr.f32.mxu0 %v6603_v5  ;;  %v3844_v9 = vpack.c.bf16 %v2566_v59, %v2564_v60 }
 0x408   :  { %v1900_v55 = vmul.f32 %v5926_v16, %v1802_v51 }
 0x409   :  { %3845 = vmatprep.subr.bf16.mxu0 %v3844_v9 }
 0x40a   :  { %3499 = vmatmul.mubr.msk.f32.gmra.mrb[94].mxu0 %vm534_vm2, %v1900_v55  ;;  %3598 = vmatmul.mubr.msk.f32.gmra.mrb[110].mxu1 %vm534_vm2, %v1900_v55 }
 0x40b   :  { %3847 = vmatpush1.bf16.msra.mxu0 %v3846_v1 }
 0x40c   :  { %3849 = vmatprep.subr.bf16.mxu0 %v3848_v12 }
 0x40f   :  { %3851 = vmatpush1.bf16.msra.mxu0 %v3850_v50 }
 0x410   :  { %3853 = vmatprep.subr.bf16.mxu0 %v3852_v37 }
 0x413   :  { %3855 = vmatpush1.bf16.msra.mxu0 %v3854_v45 }
 0x414   :  { %3857 = vmatprep.subr.bf16.mxu0 %v3856_v22 }
 0x417   :  { %3859 = vmatpush1.bf16.msra.mxu0 %v3858_v49 }
 0x418   :  { %3861 = vmatprep.subr.bf16.mxu0 %v3860_v27  ;;  %v2588_v27 = vld [vmem:[%s6599_s7 + $0x228] sm:$0xff] }
 0x41b   :  { %3863 = vmatpush1.bf16.msra.mxu0 %v3862_v10 }
 0x41c   :  { %3865 = vmatprep.subr.bf16.mxu0 %v3864_v15 }
 0x4a1   :  { %v2039_v29 = vpop.f32.mrb[64].mxu0 }
 0x4a2   :  { %v2040_v41 = vadd.f32 %v2039_v29, %v6003_v24  ;;  %v2041_v0 = vpop.f32.mrb[65].mxu0  ;;  %v3866_v29 = vpack.c.bf16 %v2585_v20, %v2583_v62 }
 0x4a3   :  { %v2042_v2 = vadd.f32 %v2041_v0, %v6007_v7 }
 0x4a4   :  { %v2327_v51 = vmul.f32 0.70710677, %v2040_v41  ;;  %v2279_v30 = vmul.f32 0.5, %v2040_v41  ;;  %v2587_v41 = vld [vmem:[%s6599_s7 + $0x220] sm:$0xff] }
 0x4a5   :  { %v2328_v21 = vmul.f32 0.70710677, %v2042_v2  ;;  %v2045_v55 = vpop.f32.mrb[66].mxu0  ;;  %v6011_v60 = vpop.f32.mrb[96].mxu1  ;;  %v2280_v49 = vmul.f32 0.5, %v2042_v2 }
 0x4a6   :  { %4206 = verf.f32 %v2327_v51  ;;  %v6014_v59 = vadd.f32 %v2045_v55, %v6003_v24  ;;  %v2047_v23 = vpop.f32.mrb[67].mxu0  ;;  %v6016_v9 = vpop.f32.mrb[97].mxu1  ;;  %v3868_v55 = vpack.c.bf16 %v2590_v14, %v2588_v27  ;;  %v2598_v27 = vld [vmem:[%s6599_s7 + $0x278] sm:$0xff] }
 0x4a7   :  { %4208 = verf.f32 %v2328_v21  ;;  %v2048_v56 = vadd.f32 %v2047_v23, %v6007_v7  ;;  %v2589_v23 = vld [vmem:[%s6599_s7 + $0x230] sm:$0xff] }
 0x4a8   :  { %v2330_v25 = vmul.f32 0.70710677, %v6014_v59 }
 0x4a9   :  { %v2331_v57 = vmul.f32 0.70710677, %v2048_v56  ;;  %v2051_v1 = vpop.f32.mrb[68].mxu0 }
 0x4aa   :  { %v2053_v28 = vpop.f32.mrb[69].mxu0  ;;  %v6021_v39 = vadd.f32 %v2051_v1, %v6003_v24 }
 0x4ab   :  { %4210 = verf.f32 %v2331_v57  ;;  %v6024_v12 = vadd.f32 %v2053_v28, %v6007_v7  ;;  %v2592_v28 = vld [vmem:[%s6599_s7 + $0x248] sm:$0xff] }
 0x4ac   :  { %4212 = verf.f32 %v2330_v25  ;;  %v2333_v45 = vmul.f32 0.70710677, %v6021_v39 }
 0x4ad   :  { %v2057_v19 = vpop.f32.mrb[70].mxu0  ;;  %v6026_v33 = vpop.f32.mrb[98].mxu1  ;;  %v2334_v32 = vmul.f32 0.70710677, %v6024_v12 }
 0x4ae   :  { %v2059_v50 = vpop.f32.mrb[71].mxu0  ;;  %v6028_v38 = vpop.f32.mrb[99].mxu1  ;;  %v6032_v37 = vadd.f32 %v2057_v19, %v6003_v24  ;;  %v2594_v19 = vld [vmem:[%s6599_s7 + $0x258] sm:$0xff] }
 0x4af   :  { %v6035_v3 = vadd.f32 %v2059_v50, %v6007_v7  ;;  %4214 = verf.f32 %v2334_v32  ;;  %v3872_v20 = vpack.c.bf16 %v2594_v19, %v2592_v28  ;;  %v2597_v19 = vld [vmem:[%s6599_s7 + $0x270] sm:$0xff] }
 0x4b0   :  { %v4207_v34 = vpop.eup %4206  ;;  %v2336_v10 = vmul.f32 0.70710677, %v6032_v37  ;;  %4216 = verf.f32 %v2333_v45 }
 0x4b1   :  { %v4209_v52 = vpop.eup %4208  ;;  %v2423_v46 = vadd.f32 1.0, %v4207_v34  ;;  %v2337_v22 = vmul.f32 0.70710677, %v6035_v3  ;;  %v2063_v4 = vpop.f32.mrb[72].mxu0 }
 0x4b2   :  { %v2424_v63 = vadd.f32 1.0, %v4209_v52  ;;  %v2065_v35 = vpop.f32.mrb[73].mxu0  ;;  %v6056_v2 = vadd.f32 %v2063_v4, %v6003_v24  ;;  %v3870_v52 = vpack.c.bf16 %v2589_v23, %v2587_v41  ;;  %v2282_v41 = vmul.f32 0.5, %v6014_v59 }
 0x4b3   :  { %v6053_v11 = vadd.f32 %v2065_v35, %v6007_v7  ;;  %v2471_v0 = vmul.f32 %v2423_v46, %v2279_v30  ;;  %4218 = verf.f32 %v2337_v22  ;;  %v2283_v46 = vmul.f32 0.5, %v2048_v56  ;;  %v2596_v56 = vld [vmem:[%s6599_s7 + $0x268] sm:$0xff] }
 0x4b4   :  { %v2472_v15 = vmul.f32 %v2424_v63, %v2280_v49  ;;  %4220 = verf.f32 %v2336_v10  ;;  %v2339_v22 = vmul.f32 0.70710677, %v6056_v2  ;;  %v2591_v49 = vld [vmem:[%s6599_s7 + $0x240] sm:$0xff]  ;;  %v2593_v63 = vld [vmem:[%s6599_s7 + $0x250] sm:$0xff]  ;;  %v3876_v28 = vpack.c.bf16 %v2598_v27, %v2596_v56 }
 0x4b5   :  { %v2069_v51 = vpop.f32.mrb[74].mxu0  ;;  %v6058_v21 = vpop.f32.mrb[100].mxu1  ;;  %v2340_v32 = vmul.f32 0.70710677, %v6053_v11 }
 0x4b6   :  { %v4211_v57 = vpop.eup %4210  ;;  %v2071_v25 = vpop.f32.mrb[75].mxu0  ;;  %2719 = vmatprep.mubr.f32.mxu0 %v2472_v15  ;;  %v6080_v62 = vadd.f32 %v2069_v51, %v6003_v24  ;;  %v2595_v51 = vld [vmem:[%s6599_s7 + $0x260] sm:$0xff] }
 0x4b7   :  { %v6066_v1 = vpop.f32.mrb[101].mxu1  ;;  %v2427_v50 = vadd.f32 1.0, %v4211_v57  ;;  %v6076_v34 = vadd.f32 %v2071_v25, %v6007_v7  ;;  %2720 = vmatmul.mubr.f32.vlgmr.msra.gmra.mrb[96].mxu0 %v2471_v0  ;;  %v4213_v45 = vpop.eup %4212  ;;  %4222 = verf.f32 %v2340_v32  ;;  %v3874_v0 = vpack.c.bf16 %v2593_v63, %v2591_v49 }
 0x4b8   :  { %3867 = vmatpush1.bf16.msra.mxu0 %v3866_v29  ;;  %v2426_v14 = vadd.f32 1.0, %v4213_v45  ;;  %4224 = verf.f32 %v2339_v22  ;;  %v2342_v23 = vmul.f32 0.70710677, %v6080_v62  ;;  %v3878_v63 = vpack.c.bf16 %v2597_v19, %v2595_v51 }
 0x4b9   :  { %3869 = vmatprep.subr.bf16.mxu0 %v3868_v55  ;;  %v2075_v4 = vpop.f32.mrb[76].mxu0  ;;  %v2343_v30 = vmul.f32 0.70710677, %v6076_v34  ;;  %v2475_v35 = vmul.f32 %v2427_v50, %v2283_v46  ;;  %v4215_v55 = vpop.eup %4214 }
 0x4ba   :  { %v2077_v10 = vpop.f32.mrb[77].mxu0  ;;  %v6096_v15 = vadd.f32 %v2075_v4, %v6003_v24  ;;  %v4217_v50 = vpop.eup %4216  ;;  %v2474_v46 = vmul.f32 %v2426_v14, %v2282_v41  ;;  %v2430_v22 = vadd.f32 1.0, %v4215_v55  ;;  %v2289_v41 = vmul.f32 0.5, %v6035_v3 }
 0x4bb   :  { %v6099_v29 = vadd.f32 %v2077_v10, %v6007_v7  ;;  %2725 = vmatprep.mubr.f32.mxu0 %v2475_v35  ;;  %4226 = verf.f32 %v2343_v30  ;;  %v2429_v4 = vadd.f32 1.0, %v4217_v50  ;;  %v2286_v30 = vmul.f32 0.5, %v6024_v12 }
 0x4bc   :  { %3871 = vmatpush1.bf16.msra.mxu0 %v3870_v52  ;;  %v2345_v49 = vmul.f32 0.70710677, %v6096_v15  ;;  %4228 = verf.f32 %v2342_v23 }
 0x4bd   :  { %v2081_v57 = vpop.f32.mrb[78].mxu0  ;;  %v6106_v25 = vpop.f32.mrb[102].mxu1  ;;  %3873 = vmatprep.subr.bf16.mxu0 %v3872_v20  ;;  %v2346_v32 = vmul.f32 0.70710677, %v6099_v29  ;;  %2726 = vmatmul.mubr.f32.gmra.mrb[98].mxu0 %v2474_v46  ;;  %v2478_v23 = vmul.f32 %v2430_v22, %v2286_v30  ;;  %v2288_v22 = vmul.f32 0.5, %v6032_v37 }
 0x4be   :  { %v2083_v45 = vpop.f32.mrb[79].mxu0  ;;  %v6112_v52 = vpop.f32.mrb[103].mxu1  ;;  %v6116_v56 = vadd.f32 %v2081_v57, %v6003_v24 }
 0x4bf   :  { %v4219_v59 = vpop.eup %4218  ;;  %v6119_v27 = vadd.f32 %v2083_v45, %v6007_v7  ;;  %4230 = verf.f32 %v2346_v32  ;;  %2731 = vmatprep.mubr.f32.mxu0 %v2478_v23 }
 0x4c0   :  { %3875 = vmatpush1.bf16.msra.mxu0 %v3874_v0  ;;  %v4221_v20 = vpop.eup %4220  ;;  %v2433_v14 = vadd.f32 1.0, %v4219_v59  ;;  %v2285_v0 = vmul.f32 0.5, %v6021_v39  ;;  %4232 = verf.f32 %v2345_v49  ;;  %v2348_v19 = vmul.f32 0.70710677, %v6116_v56 }
 0x4c1   :  { %v2087_v10 = vpop.f32.mrb[80].mxu0  ;;  %3877 = vmatprep.subr.bf16.mxu0 %v3876_v28  ;;  %v2349_v51 = vmul.f32 0.70710677, %v6119_v27  ;;  %v2432_v55 = vadd.f32 1.0, %v4221_v20  ;;  %v4223_v57 = vpop.eup %4222 }
 0x4c2   :  { %v2089_v35 = vpop.f32.mrb[81].mxu0  ;;  %v2477_v50 = vmul.f32 %v2429_v4, %v2285_v0  ;;  %v6127_v28 = vadd.f32 %v2087_v10, %v6003_v24  ;;  %v2481_v45 = vmul.f32 %v2433_v14, %v2289_v41  ;;  %v4225_v46 = vpop.eup %4224  ;;  %v2436_v49 = vadd.f32 1.0, %v4223_v57 }
 0x4c3   :  { %v6130_v12 = vadd.f32 %v2089_v35, %v6007_v7  ;;  %4234 = verf.f32 %v2349_v51  ;;  %v2480_v10 = vmul.f32 %v2432_v55, %v2288_v22  ;;  %v2435_v35 = vadd.f32 1.0, %v4225_v46 }
 0x4c4   :  { %3879 = vmatpush1.bf16.msra.mxu0 %v3878_v63  ;;  %v2351_v63 = vmul.f32 0.70710677, %v6127_v28  ;;  %4236 = verf.f32 %v2348_v19  ;;  %v2292_v41 = vmul.f32 0.5, %v6053_v11  ;;  %v2291_v57 = vmul.f32 0.5, %v6056_v2 }
 0x4c5   :  { %v2093_v32 = vpop.f32.mrb[82].mxu0  ;;  %v6132_v39 = vpop.f32.mrb[104].mxu1  ;;  %2732 = vmatmul.mubr.f32.gmra.mrb[100].mxu0 %v2477_v50  ;;  %v2352_v4 = vmul.f32 0.70710677, %v6130_v12  ;;  %v2295_v50 = vmul.f32 0.5, %v6076_v34 }
 0x4c6   :  { %v2095_v59 = vpop.f32.mrb[83].mxu0  ;;  %v6134_v3 = vpop.f32.mrb[105].mxu1  ;;  %2737 = vmatprep.mubr.f32.mxu0 %v2481_v45  ;;  %v6143_v0 = vadd.f32 %v2093_v32, %v6003_v24  ;;  %4238 = verf.f32 %v2351_v63  ;;  %v2484_v45 = vmul.f32 %v2436_v49, %v2292_v41  ;;  %v2483_v11 = vmul.f32 %v2435_v35, %v2291_v57 }
 0x4c7   :  { %v4227_v20 = vpop.eup %4226  ;;  %v6140_v30 = vadd.f32 %v2095_v59, %v6007_v7  ;;  %4240 = verf.f32 %v2352_v4  ;;  %v2294_v49 = vmul.f32 0.5, %v6080_v62  ;;  %v2298_v35 = vmul.f32 0.5, %v6099_v29 }
 0x4c8   :  { %v4229_v51 = vpop.eup %4228  ;;  %v2439_v19 = vadd.f32 1.0, %v4227_v20  ;;  %v2354_v5 = vmul.f32 0.70710677, %v6143_v0 }
 0x4c9   :  { %v2099_v14 = vpop.f32.mrb[84].mxu0  ;;  %2738 = vmatmul.mubr.f32.gmra.mrb[102].mxu0 %v2480_v10  ;;  %v4231_v23 = vpop.eup %4230  ;;  %v2355_v55 = vmul.f32 0.70710677, %v6140_v30  ;;  %v2438_v22 = vadd.f32 1.0, %v4229_v51 }
 0x4ca   :  { %v2101_v37 = vpop.f32.mrb[85].mxu0  ;;  %v4233_v32 = vpop.eup %4232  ;;  %v6153_v10 = vadd.f32 %v2099_v14, %v6003_v24  ;;  %v2442_v63 = vadd.f32 1.0, %v4231_v23  ;;  %2743 = vmatprep.mubr.f32.mxu0 %v2484_v45  ;;  %v2487_v4 = vmul.f32 %v2439_v19, %v2295_v50  ;;  %v2297_v50 = vmul.f32 0.5, %v6096_v15 }
 0x4cb   :  { %v6158_v34 = vadd.f32 %v2101_v37, %v6007_v7  ;;  %4242 = verf.f32 %v2355_v55  ;;  %v2441_v41 = vadd.f32 1.0, %v4233_v32  ;;  %v2486_v8 = vmul.f32 %v2438_v22, %v2294_v49 }
 0x4cc   :  { %4244 = verf.f32 %v2354_v5  ;;  %v2357_v14 = vmul.f32 0.70710677, %v6153_v10  ;;  %v2490_v19 = vmul.f32 %v2442_v63, %v2298_v35  ;;  %v2301_v5 = vmul.f32 0.5, %v6119_v27 }
 0x4cd   :  { %v2105_v59 = vpop.f32.mrb[86].mxu0  ;;  %v6149_v46 = vpop.f32.mrb[106].mxu1  ;;  %2744 = vmatmul.mubr.f32.gmra.mrb[104].mxu0 %v2483_v11  ;;  %v2358_v62 = vmul.f32 0.70710677, %v6158_v34  ;;  %v2489_v49 = vmul.f32 %v2441_v41, %v2297_v50 }
 0x4ce   :  { %v2107_v2 = vpop.f32.mrb[87].mxu0  ;;  %v6155_v20 = vpop.f32.mrb[107].mxu1  ;;  %2749 = vmatprep.mubr.f32.mxu0 %v2487_v4  ;;  %v6168_v55 = vadd.f32 %v2105_v59, %v6003_v24  ;;  %4246 = verf.f32 %v2357_v14 }
 0x4cf   :  { %v4235_v51 = vpop.eup %4234  ;;  %v6164_v23 = vadd.f32 %v2107_v2, %v6007_v7  ;;  %4248 = verf.f32 %v2358_v62 }
 0x4d0   :  { %v4237_v45 = vpop.eup %4236  ;;  %v2445_v29 = vadd.f32 1.0, %v4235_v51  ;;  %v2360_v59 = vmul.f32 0.70710677, %v6168_v55  ;;  %v2300_v51 = vmul.f32 0.5, %v6116_v56 }
 0x4d1   :  { %v2111_v57 = vpop.f32.mrb[88].mxu0  ;;  %2750 = vmatmul.mubr.f32.gmra.mrb[106].mxu0 %v2486_v8  ;;  %v4239_v22 = vpop.eup %4238  ;;  %v2444_v11 = vadd.f32 1.0, %v4237_v45  ;;  %v2361_v2 = vmul.f32 0.70710677, %v6164_v23 }
 0x4d2   :  { %v2113_v37 = vpop.f32.mrb[89].mxu0  ;;  %2755 = vmatprep.mubr.f32.mxu0 %v2490_v19  ;;  %v4241_v16 = vpop.eup %4240  ;;  %v6177_v15 = vadd.f32 %v2111_v57, %v6003_v24  ;;  %v2493_v41 = vmul.f32 %v2445_v29, %v2301_v5  ;;  %v2447_v45 = vadd.f32 1.0, %v4239_v22  ;;  %v2304_v29 = vmul.f32 0.5, %v6130_v12 }
 0x4d3   :  { %v6180_v8 = vadd.f32 %v2113_v37, %v6007_v7  ;;  %4250 = verf.f32 %v2361_v2  ;;  %v2448_v62 = vadd.f32 1.0, %v4241_v16  ;;  %v2492_v57 = vmul.f32 %v2444_v11, %v2300_v51 }
 0x4d4   :  { %4252 = verf.f32 %v2360_v59  ;;  %v2363_v37 = vmul.f32 0.70710677, %v6177_v15  ;;  %v2303_v16 = vmul.f32 0.5, %v6127_v28 }
 0x4d5   :  { %v2117_v32 = vpop.f32.mrb[90].mxu0  ;;  %v6173_v4 = vpop.f32.mrb[108].mxu1  ;;  %2756 = vmatmul.mubr.f32.gmra.mrb[108].mxu0 %v2489_v49  ;;  %v2364_v19 = vmul.f32 0.70710677, %v6180_v8  ;;  %v2307_v49 = vmul.f32 0.5, %v6140_v30 }
 0x4d6   :  { %v2119_v27 = vpop.f32.mrb[91].mxu0  ;;  %v6182_v63 = vpop.f32.mrb[109].mxu1  ;;  %2761 = vmatprep.mubr.f32.mxu0 %v2493_v41  ;;  %v6188_v6 = vadd.f32 %v2117_v32, %v6003_v24  ;;  %v2496_v32 = vmul.f32 %v2448_v62, %v2304_v29  ;;  %v2306_v62 = vmul.f32 0.5, %v6143_v0 }
 0x4d7   :  { %v4243_v14 = vpop.eup %4242  ;;  %v6191_v56 = vadd.f32 %v2119_v27, %v6007_v7  ;;  %4254 = verf.f32 %v2364_v19  ;;  %v2495_v19 = vmul.f32 %v2447_v45, %v2303_v16  ;;  %v4368_v45 = vld [vmem:[%s6601_s9 + $0x10] sm:$0x7f] }
 0x4d8   :  { %v4245_v2 = vpop.eup %4244  ;;  %v2451_v5 = vadd.f32 1.0, %v4243_v14  ;;  %4256 = verf.f32 %v2363_v37  ;;  %v2366_v12 = vmul.f32 0.70710677, %v6188_v6 }
 0x4d9   :  { %v2123_v35 = vpop.f32.mrb[92].mxu0  ;;  %2762 = vmatmul.mubr.f32.gmra.mrb[110].mxu0 %v2492_v57  ;;  %v2367_v59 = vmul.f32 0.70710677, %v6191_v56  ;;  %v2450_v27 = vadd.f32 1.0, %v4245_v2  ;;  %v4247_v57 = vpop.eup %4246  ;;  %v6214_v2 = vrot.slane %v4368_v45, %v5999_v36  ;;  %v2310_v36 = vmul.f32 0.5, %v6158_v34  ;;  %v3140_v45 = vld [vmem:[%s6600_s8 + $0x18] sm:$0xff] }
 0x4da   :  { %v2125_v50 = vpop.f32.mrb[93].mxu0  ;;  %2767 = vmatprep.mubr.f32.mxu0 %v2496_v32  ;;  %v6203_v28 = vadd.f32 %v2123_v35, %v6003_v24  ;;  %v4249_v30 = vpop.eup %4248  ;;  %v2499_v29 = vmul.f32 %v2451_v5, %v2307_v49  ;;  %v2453_v49 = vadd.f32 1.0, %v4247_v57 }
 0x4db   :  { %4258 = verf.f32 %v2367_v59  ;;  %v6206_v14 = vadd.f32 %v2125_v50, %v6007_v7  ;;  %v2498_v35 = vmul.f32 %v2450_v27, %v2306_v62  ;;  %v2454_v50 = vadd.f32 1.0, %v4249_v30 }
 0x4dc   :  { %4260 = verf.f32 %v2366_v12  ;;  %v2369_v16 = vmul.f32 0.70710677, %v6203_v28  ;;  %v6226_v27 = vadd.f32 %v6016_v9, %v6214_v2  ;;  %v2309_v12 = vmul.f32 0.5, %v6153_v10  ;;  %v3138_v9 = vld [vmem:[%s6600_s8 + $0x8] sm:$0xff] }
 0x4dd   :  { %v2129_v22 = vpop.f32.mrb[94].mxu0  ;;  %v6195_v11 = vpop.f32.mrb[110].mxu1  ;;  %2768 = vmatmul.mubr.f32.gmra.mrb[112].mxu0 %v2495_v19  ;;  %v2370_v37 = vmul.f32 0.70710677, %v6206_v14  ;;  %v2313_v30 = vmul.f32 0.5, %v6164_v23  ;;  %v2502_v57 = vmul.f32 %v2454_v50, %v2310_v36  ;;  %v2312_v50 = vmul.f32 0.5, %v6168_v55 }
 0x4de   :  { %v2131_v51 = vpop.f32.mrb[95].mxu0  ;;  %v6199_v41 = vpop.f32.mrb[111].mxu1  ;;  %2773 = vmatprep.mubr.f32.mxu0 %v2499_v29  ;;  %v6218_v0 = vadd.f32 %v2129_v22, %v6003_v24  ;;  %v2501_v10 = vmul.f32 %v2453_v49, %v2309_v12  ;;  %v2316_v29 = vmul.f32 0.5, %v6180_v8  ;;  %v3141_v55 = vld [vmem:[%s6600_s8 + $0x20] sm:$0xff] }
 0x4df   :  { %v4251_v61 = vpop.eup %4250  ;;  %4262 = verf.f32 %v2370_v37  ;;  %v6221_v32 = vadd.f32 %v2131_v51, %v6007_v7  ;;  %v3137_v7 = vld [vmem:[%s6600_s8] sm:$0xff]  ;;  %v3139_v37 = vld [vmem:[%s6600_s8 + $0x10] sm:$0xff] }
 0x4e0   :  { %v4253_v5 = vpop.eup %4252  ;;  %v2457_v59 = vadd.f32 1.0, %v4251_v61  ;;  %4264 = verf.f32 %v2369_v16  ;;  %v2372_v61 = vmul.f32 0.70710677, %v6218_v0  ;;  %v3881_v16 = vpack.c.bf16 %v3138_v9, %v3137_v7 }
 0x4e1   :  { %2774 = vmatmul.mubr.f32.gmra.mrb[114].mxu0 %v2498_v35  ;;  %v4255_v19 = vpop.eup %4254  ;;  %v2373_v24 = vmul.f32 0.70710677, %v6221_v32  ;;  %v2456_v51 = vadd.f32 1.0, %v4253_v5  ;;  %v6247_v35 = vadd.f32 %v6011_v60, %v6214_v2  ;;  %v2329_v5 = vmul.f32 0.70710677, %v6226_v27 }
 0x4e2   :  { %v2460_v22 = vadd.f32 1.0, %v4255_v19  ;;  %v4257_v34 = vpop.eup %4256  ;;  %v2505_v23 = vmul.f32 %v2457_v59, %v2313_v30  ;;  %2779 = vmatprep.mubr.f32.mxu0 %v2502_v57  ;;  %3882 = vmatpush1.bf16.msra.mxu1 %v3881_v16  ;;  %v3884_v12 = vpack.c.bf16 %v3140_v45, %v3139_v37  ;;  %v6613_v60 = vmov 0.0|0.0  }
 0x4e3   :  { %4266 = verf.f32 %v2373_v24  ;;  %v2459_v19 = vadd.f32 1.0, %v4257_v34  ;;  %v2504_v36 = vmul.f32 %v2456_v51, %v2312_v50  ;;  %v2319_v24 = vmul.f32 0.5, %v6191_v56  ;;  %3883 = vmatprep.subr.bf16.mxu1 %v6613_v60 }
 0x4e4   :  { %4268 = verf.f32 %v2372_v61  ;;  %v2508_v49 = vmul.f32 %v2460_v22, %v2316_v29  ;;  %v3142_v61 = vld [vmem:[%s6600_s8 + $0x28] sm:$0xff]  ;;  %v2332_v22 = vmul.f32 0.70710677, %v6247_v35  ;;  %v2315_v57 = vmul.f32 0.5, %v6177_v15  ;;  %v3143_v15 = vld [vmem:[%s6600_s8 + $0x30] sm:$0xff] }
 0x4e5   :  { %v4259_v62 = vpop.eup %4258  ;;  %2780 = vmatmul.mubr.f32.gmra.mrb[116].mxu0 %v2501_v10  ;;  %4270 = verf.f32 %v2329_v5  ;;  %v6263_v7 = vadd.f32 %v6028_v38, %v6214_v2  ;;  %v3887_v10 = vpack.c.bf16 %v3142_v61, %v3141_v55  ;;  %v3144_v38 = vld [vmem:[%s6600_s8 + $0x38] sm:$0xff]  ;;  %v2318_v37 = vmul.f32 0.5, %v6188_v6  ;;  %v3145_v6 = vld [vmem:[%s6600_s8 + $0x40] sm:$0xff] }
 0x4e6   :  { %v2463_v8 = vadd.f32 1.0, %v4259_v62  ;;  %2785 = vmatprep.mubr.f32.mxu0 %v2505_v23  ;;  %v4261_v59 = vpop.eup %4260  ;;  %v2507_v51 = vmul.f32 %v2459_v19, %v2315_v57  ;;  %3885 = vmatpush1.bf16.msra.mxu1 %v3884_v12  ;;  %v2322_v62 = vmul.f32 0.5, %v6206_v14  ;;  %4272 = verf.f32 %v2332_v22 }
 0x4e7   :  { %v2462_v34 = vadd.f32 1.0, %v4261_v59  ;;  %3886 = vmatprep.subr.bf16.mxu1 %v6613_v60  ;;  %v6276_v45 = vadd.f32 %v6026_v33, %v6214_v2  ;;  %v2335_v14 = vmul.f32 0.70710677, %v6263_v7  ;;  %v2325_v19 = vmul.f32 0.5, %v6221_v32  ;;  %v3146_v33 = vld [vmem:[%s6600_s8 + $0x48] sm:$0xff] }
 0x4e8   :  { %v2511_v9 = vmul.f32 %v2463_v8, %v2319_v24  ;;  %v3893_v61 = vpack.c.bf16 %v3146_v33, %v3145_v6  ;;  %v2324_v57 = vmul.f32 0.5, %v6218_v0  ;;  %v2231_v0 = vadd.f32 %v6112_v52, %v6214_v2 }
 0x4e9   :  { %v4263_v30 = vpop.eup %4262  ;;  %2786 = vmatmul.mubr.f32.gmra.mrb[118].mxu0 %v2504_v36  ;;  %v2510_v8 = vmul.f32 %v2462_v34, %v2318_v37  ;;  %v2321_v36 = vmul.f32 0.5, %v6203_v28  ;;  %v2338_v12 = vmul.f32 0.70710677, %v6276_v45  ;;  %4274 = verf.f32 %v2335_v14 }
 0x4ea   :  { %v2466_v56 = vadd.f32 1.0, %v4263_v30  ;;  %2791 = vmatprep.mubr.f32.mxu0 %v2508_v49  ;;  %v4265_v23 = vpop.eup %4264  ;;  %3888 = vmatpush1.bf16.msra.mxu1 %v3887_v10  ;;  %v3890_v49 = vpack.c.bf16 %v3144_v38, %v3143_v15  ;;  %v2221_v30 = vadd.f32 %v6066_v1, %v6214_v2  ;;  %v2226_v28 = vadd.f32 %v6058_v21, %v6214_v2 }
 0x4eb   :  { %v2465_v5 = vadd.f32 1.0, %v4265_v23  ;;  %3889 = vmatprep.subr.bf16.mxu1 %v6613_v60  ;;  %4276 = verf.f32 %v2338_v12  ;;  %v6614_v23 = vmov 0.0   ;;  %v2284_v38 = vmul.f32 0.5, %v6247_v35 }
 0x4ec   :  { %v2514_v16 = vmul.f32 %v2466_v56, %v2322_v62  ;;  %v2341_v56 = vmul.f32 0.70710677, %v2221_v30  ;;  %v2344_v10 = vmul.f32 0.70710677, %v2226_v28  ;;  %v2287_v52 = vmul.f32 0.5, %v6263_v7 }
 0x4ed   :  { %v4267_v29 = vpop.eup %4266  ;;  %2792 = vmatmul.mubr.f32.gmra.mrb[120].mxu0 %v2507_v51  ;;  %v2513_v55 = vmul.f32 %v2465_v5, %v2321_v36  ;;  %v2281_v51 = vmul.f32 0.5, %v6226_v27  ;;  %v2347_v27 = vmul.f32 0.70710677, %v2231_v0  ;;  %v2241_v35 = vadd.f32 %v6134_v3, %v6214_v2 }
 0x4ee   :  { %v2469_v50 = vadd.f32 1.0, %v4267_v29  ;;  %2797 = vmatprep.mubr.f32.mxu0 %v2511_v9  ;;  %v4269_v59 = vpop.eup %4268  ;;  %3891 = vmatpush1.bf16.msra.mxu1 %v3890_v49  ;;  %4278 = verf.f32 %v2341_v56  ;;  %v2236_v29 = vadd.f32 %v6106_v25, %v6214_v2  ;;  %v2290_v49 = vmul.f32 0.5, %v6276_v45 }
 0x4ef   :  { %v2468_v24 = vadd.f32 1.0, %v4269_v59  ;;  %v4271_v22 = vpop.eup %4270  ;;  %3892 = vmatprep.subr.bf16.mxu1 %v6613_v60  ;;  %4280 = verf.f32 %v2344_v10  ;;  %v2246_v7 = vadd.f32 %v6132_v39, %v6214_v2  ;;  %v2353_v59 = vmul.f32 0.70710677, %v2241_v35 }
 0x4f0   :  { %v2517_v32 = vmul.f32 %v2469_v50, %v2325_v19  ;;  %v4273_v9 = vpop.eup %4272  ;;  %v2425_v1 = vadd.f32 1.0, %v4271_v22  ;;  %4282 = verf.f32 %v2347_v27  ;;  %v2293_v3 = vmul.f32 0.5, %v2221_v30 }
 0x4f1   :  { %2798 = vmatmul.mubr.f32.gmra.mrb[122].mxu0 %v2510_v8  ;;  %v2516_v34 = vmul.f32 %v2468_v24, %v2324_v57  ;;  %v2428_v62 = vadd.f32 1.0, %v4273_v9  ;;  %v2356_v36 = vmul.f32 0.70710677, %v2246_v7  ;;  %v2251_v45 = vadd.f32 %v6155_v20, %v6214_v2 }
 0x4f2   :  { %2803 = vmatprep.mubr.f32.mxu0 %v2514_v16  ;;  %3894 = vmatpush1.bf16.msra.mxu1 %v3893_v61  ;;  %v2473_v21 = vmul.f32 %v2425_v1, %v2281_v51  ;;  %v2350_v16 = vmul.f32 0.70710677, %v2236_v29  ;;  %v2296_v39 = vmul.f32 0.5, %v2226_v28  ;;  %v2299_v56 = vmul.f32 0.5, %v2231_v0 }
 0x4f3   :  { %3895 = vmatprep.subr.bf16.mxu1 %v6613_v60  ;;  %v4275_v15 = vpop.eup %4274  ;;  %v2476_v37 = vmul.f32 %v2428_v62, %v2284_v38  ;;  %v2359_v30 = vmul.f32 0.70710677, %v2251_v45  ;;  %v2261_v28 = vadd.f32 %v6182_v63, %v6214_v2  ;;  %v2266_v51 = vadd.f32 %v6173_v4, %v6214_v2 }
 0x4f4   :  { %v2431_v14 = vadd.f32 1.0, %v4275_v15  ;;  %4284 = verf.f32 %v2350_v16  ;;  %v2305_v15 = vmul.f32 0.5, %v2241_v35  ;;  %v2271_v38 = vadd.f32 %v6199_v41, %v6214_v2 }
 0x4f5   :  { %2804 = vmatmul.mubr.f32.gmra.mrb[124].mxu0 %v2513_v55  ;;  %v4277_v50 = vpop.eup %4276  ;;  %4286 = verf.f32 %v2353_v59  ;;  %v2256_v55 = vadd.f32 %v6149_v46, %v6214_v2  ;;  %v2302_v46 = vmul.f32 0.5, %v2236_v29  ;;  %v2365_v10 = vmul.f32 0.70710677, %v2261_v28 }
 0x4f6   :  { %2809 = vmatprep.mubr.f32.mxu0 %v2517_v32  ;;  %v2434_v5 = vadd.f32 1.0, %v4277_v50  ;;  %v2479_v8 = vmul.f32 %v2431_v14, %v2287_v52  ;;  %4288 = verf.f32 %v2356_v36  ;;  %v2368_v63 = vmul.f32 0.70710677, %v2266_v51 }
 0x4f7   :  { %v2362_v20 = vmul.f32 0.70710677, %v2256_v55  ;;  %4290 = verf.f32 %v2359_v30  ;;  %v2308_v4 = vmul.f32 0.5, %v2246_v7  ;;  %v2276_v14 = vadd.f32 %v6195_v11, %v6214_v2 }
 0x4f8   :  { %v4279_v25 = vpop.eup %4278  ;;  %v2482_v19 = vmul.f32 %v2434_v5, %v2290_v49  ;;  %v2371_v50 = vmul.f32 0.70710677, %v2271_v38  ;;  %v2311_v5 = vmul.f32 0.5, %v2251_v45  ;;  %v2314_v7 = vmul.f32 0.5, %v2256_v55 }
 0x4f9   :  { %2810 = vmatmul.mubr.f32.gmra.mrb[126].mxu0 %v2516_v34  ;;  %v2437_v6 = vadd.f32 1.0, %v4279_v25  ;;  %v4281_v33 = vpop.eup %4280  ;;  %4292 = verf.f32 %v2362_v20  ;;  %v2374_v41 = vmul.f32 0.70710677, %v2276_v14  ;;  %v2320_v36 = vmul.f32 0.5, %v2266_v51  ;;  %v3149_v20 = vld [vmem:[%s6600_s8 + $0x60] sm:$0xff]  ;;  %v3154_v51 = vld [vmem:[%s6600_s8 + $0x88] sm:$0xff] }
 0x4fa   :  { %2880 = vmatprep.mubr.f32.mxu0 %v6614_v23  ;;  %v2440_v12 = vadd.f32 1.0, %v4281_v33  ;;  %v4283_v24 = vpop.eup %4282  ;;  %4294 = verf.f32 %v2365_v10  ;;  %v2326_v30 = vmul.f32 0.5, %v2276_v14 }
 0x4fb   :  { %v2485_v32 = vmul.f32 %v2437_v6, %v2293_v3  ;;  %v2443_v22 = vadd.f32 1.0, %v4283_v24  ;;  %4296 = verf.f32 %v2368_v63  ;;  %v2323_v24 = vmul.f32 0.5, %v2271_v38  ;;  %v6390_v63 = vld [vmem:[%s6601_s9] sm:$0x7f] }
 0x4fc   :  { %v2488_v61 = vmul.f32 %v2440_v12, %v2296_v39  ;;  %4298 = verf.f32 %v2371_v50 }
 0x4fd   :  { %3516 = vmatmul.mubr.msk.f32.vlgmr.msra.gmra.mrb[96].mxu0 %vm1217_vm3, %v2473_v21  ;;  %v2491_v1 = vmul.f32 %v2443_v22, %v2299_v56  ;;  %4300 = verf.f32 %v2374_v41  ;;  %v3147_v22 = vld [vmem:[%s6600_s8 + $0x50] sm:$0xff] }
 0x4fe   :  { %2886 = vmatprep.mubr.f32.mxu0 %v6614_v23  ;;  %v4285_v57 = vpop.eup %4284 }
 0x4ff   :  { %v2446_v9 = vadd.f32 1.0, %v4285_v57  ;;  %v4287_v34 = vpop.eup %4286  ;;  %v3148_v57 = vld [vmem:[%s6600_s8 + $0x58] sm:$0xff] }
 0x500   :  { %v2449_v62 = vadd.f32 1.0, %v4287_v34  ;;  %v4289_v21 = vpop.eup %4288  ;;  %v3896_v56 = vpack.c.bf16 %v3148_v57, %v3147_v22 }
 0x501   :  { %3517 = vmatmul.mubr.msk.f32.gmra.mrb[98].mxu0 %vm1217_vm3, %v2476_v37  ;;  %v2494_v0 = vmul.f32 %v2446_v9, %v2302_v46  ;;  %v2452_v29 = vadd.f32 1.0, %v4289_v21  ;;  %v4291_v37 = vpop.eup %4290  ;;  %v3151_v9 = vld [vmem:[%s6600_s8 + $0x70] sm:$0xff]  ;;  %v3153_v46 = vld [vmem:[%s6600_s8 + $0x80] sm:$0xff] }
 0x502   :  { %2892 = vmatprep.mubr.f32.mxu0 %v6614_v23  ;;  %v2497_v27 = vmul.f32 %v2449_v62, %v2305_v15  ;;  %v2455_v16 = vadd.f32 1.0, %v4291_v37  ;;  %3897 = vmatpush1.bf16.msra.mxu1 %v3896_v56  ;;  %v3905_v10 = vpack.c.bf16 %v3154_v51, %v3153_v46  ;;  %v3156_v62 = vld [vmem:[%s6600_s8 + $0x98] sm:$0xff]  ;;  %v2601_v15 = vsub.s32 5, %v4751_v58 }
 0x503   :  { %v2500_v52 = vmul.f32 %v2452_v29, %v2308_v4  ;;  %v4293_v35 = vpop.eup %4292  ;;  %3898 = vmatprep.subr.bf16.mxu1 %v6613_v60 }
 0x504   :  { %v2503_v25 = vmul.f32 %v2455_v16, %v2311_v5  ;;  %v4295_v49 = vpop.eup %4294  ;;  %v6393_v38 = vrot.slane %v6390_v63, %v2601_v15 }
 0x505   :  { %3518 = vmatmul.mubr.msk.f32.gmra.mrb[100].mxu0 %vm1217_vm3, %v2479_v8  ;;  %v2458_v8 = vadd.f32 1.0, %v4293_v35  ;;  %v2461_v2 = vadd.f32 1.0, %v4295_v49  ;;  %v4297_v59 = vpop.eup %4296 }
 0x506   :  { %2898 = vmatprep.mubr.f32.mxu0 %v6614_v23  ;;  %v2464_v6 = vadd.f32 1.0, %v4297_v59  ;;  %v4299_v3 = vpop.eup %4298 }
 0x507   :  { %v2506_v11 = vmul.f32 %v2458_v8, %v2314_v7  ;;  %v2467_v12 = vadd.f32 1.0, %v4299_v3 }
 0x508   :  { %v2512_v45 = vmul.f32 %v2464_v6, %v2320_v36 }
 0x509   :  { %3519 = vmatmul.mubr.msk.f32.gmra.mrb[102].mxu0 %vm1217_vm3, %v2482_v19  ;;  %v2317_v19 = vmul.f32 0.5, %v2261_v28  ;;  %v2515_v55 = vmul.f32 %v2467_v12, %v2323_v24 }
 0x50a   :  { %2904 = vmatprep.mubr.f32.mxu0 %v6614_v23 }
 0x50b   :  { %v2509_v33 = vmul.f32 %v2461_v2, %v2317_v19 }
 0x50d   :  { %3520 = vmatmul.mubr.msk.f32.gmra.mrb[104].mxu0 %vm1217_vm3, %v2485_v32  ;;  %v4301_v32 = vpop.eup %4300 }
 0x50e   :  { %2910 = vmatprep.mubr.f32.mxu0 %v6614_v23  ;;  %v2470_v39 = vadd.f32 1.0, %v4301_v32 }
 0x511   :  { %3521 = vmatmul.mubr.msk.f32.gmra.mrb[106].mxu0 %vm1217_vm3, %v2488_v61  ;;  %v2518_v61 = vmul.f32 %v2470_v39, %v2326_v30 }
 0x512   :  { %2916 = vmatprep.mubr.f32.mxu0 %v6614_v23 }
 0x515   :  { %3522 = vmatmul.mubr.msk.f32.gmra.mrb[108].mxu0 %vm1217_vm3, %v2491_v1  ;;  %v3152_v1 = vld [vmem:[%s6600_s8 + $0x78] sm:$0xff] }
 0x516   :  { %2922 = vmatprep.mubr.f32.mxu0 %v6614_v23  ;;  %v3902_v34 = vpack.c.bf16 %v3152_v1, %v3151_v9 }
 0x519   :  { %3523 = vmatmul.mubr.msk.f32.gmra.mrb[110].mxu0 %vm1217_vm3, %v2494_v0  ;;  %v3155_v0 = vld [vmem:[%s6600_s8 + $0x90] sm:$0xff] }
 0x51a   :  { %2928 = vmatprep.mubr.f32.mxu0 %v6614_v23  ;;  %v3908_v21 = vpack.c.bf16 %v3156_v62, %v3155_v0 }
 0x51d   :  { %3524 = vmatmul.mubr.msk.f32.gmra.mrb[112].mxu0 %vm1217_vm3, %v2497_v27 }
 0x51e   :  { %2934 = vmatprep.mubr.f32.mxu0 %v6614_v23 }
 0x521   :  { %3525 = vmatmul.mubr.msk.f32.gmra.mrb[114].mxu0 %vm1217_vm3, %v2500_v52 }
 0x522   :  { %2940 = vmatprep.mubr.f32.mxu0 %v6614_v23 }
 0x525   :  { %3526 = vmatmul.mubr.msk.f32.gmra.mrb[116].mxu0 %vm1217_vm3, %v2503_v25 }
 0x526   :  { %2946 = vmatprep.mubr.f32.mxu0 %v6614_v23 }
 0x529   :  { %3527 = vmatmul.mubr.msk.f32.gmra.mrb[118].mxu0 %vm1217_vm3, %v2506_v11 }
 0x52a   :  { %2952 = vmatprep.mubr.f32.mxu0 %v6614_v23 }
 0x52d   :  { %3528 = vmatmul.mubr.msk.f32.gmra.mrb[120].mxu0 %vm1217_vm3, %v2509_v33 }
 0x52e   :  { %2958 = vmatprep.mubr.f32.mxu0 %v6614_v23 }
 0x531   :  { %3529 = vmatmul.mubr.msk.f32.gmra.mrb[122].mxu0 %vm1217_vm3, %v2512_v45 }
 0x532   :  { %2964 = vmatprep.mubr.f32.mxu0 %v6614_v23 }
 0x535   :  { %3530 = vmatmul.mubr.msk.f32.gmra.mrb[124].mxu0 %vm1217_vm3, %v2515_v55 }
 0x536   :  { %2970 = vmatprep.mubr.f32.mxu0 %v6614_v23  ;;  %v3150_v23 = vld [vmem:[%s6600_s8 + $0x68] sm:$0xff]  ;;  %s4398_s8 = smov [#allocation2]  }
 0x537   :  { %v3899_v28 = vpack.c.bf16 %v3150_v23, %v3149_v20 }
 0x539   :  { %3531 = vmatmul.mubr.msk.f32.gmra.mrb[126].mxu0 %vm1217_vm3, %v2518_v61  ;;  %3900 = vmatpush1.bf16.msra.mxu1 %v3899_v28 }
 0x53a   :  { %3901 = vmatprep.subr.bf16.mxu1 %v6613_v60 }
 0x53d   :  { %3903 = vmatpush1.bf16.msra.mxu1 %v3902_v34 }
 0x53e   :  { %3904 = vmatprep.subr.bf16.mxu1 %v6613_v60 }
 0x541   :  { %3906 = vmatpush1.bf16.msra.mxu1 %v3905_v10 }
 0x542   :  { %3907 = vmatprep.subr.bf16.mxu1 %v6613_v60  ;;  %v4370_v60 = vld [vmem:[%s6601_s9 + $0x8] sm:$0x7f]  ;;  %s3391_s9 = sshll.u32 %s4398_s8, 4  ;;  %s3392_s9 = int_to_ptr.vmem [resolvable:$true] %s3391_s9 }
 0x543   :  { %v6398_v29 = vrot.slane %v4370_v60, %v2601_v15  ;;  %s4371_s22 = scalar_lea.vmem %s3392_s9, 2048  ;;  %p4376_p1 = scmp.lt.s32.totalorder %s3392_s9, %s3392_s9 }
 0x544   :  { %p4372_p0 = scmp.ne.s32.totalorder %s3392_s9, %s4371_s22  ;;  %p4377_p2 = scmp.lt.s32.totalorder %s4371_s22, %s4371_s22 }
 0x545   :  { %3909 = vmatpush1.bf16.msra.mxu1 %v3908_v21 }
 0x546   :  { %p4378_p3 = por %p4377_p2, %p4376_p1 }
 0x548   :  { %p4379_p4 = pnand %p4378_p3, %p4372_p0 }
 0x5d0   :  { %v2882_v27 = vpop.f32.mrb[96].mxu0 }
 0x5d1   :  { %v3942_v37 = vadd.f32 %v2882_v27, %v6393_v38  ;;  %v2884_v4 = vpop.f32.mrb[97].mxu0 }
 0x5d2   :  { %v3943_v14 = vadd.f32 %v2884_v4, %v6398_v29 }
 0x5d3   :  { %v3009_v50 = vmul.f32 0.70710677, %v3942_v37  ;;  %v2977_v56 = vmul.f32 0.5, %v3942_v37 }
 0x5d4   :  { %v3010_v52 = vmul.f32 0.70710677, %v3943_v14  ;;  %v2888_v16 = vpop.f32.mrb[98].mxu0  ;;  %v2978_v30 = vmul.f32 0.5, %v3943_v14 }
 0x5d5   :  { %4302 = verf.f32 %v3009_v50  ;;  %v3944_v35 = vadd.f32 %v2888_v16, %v6393_v38  ;;  %v2890_v5 = vpop.f32.mrb[99].mxu0 }
 0x5d6   :  { %4304 = verf.f32 %v3010_v52  ;;  %v3945_v41 = vadd.f32 %v2890_v5, %v6398_v29 }
 0x5d7   :  { %v3011_v8 = vmul.f32 0.70710677, %v3944_v35  ;;  %v2979_v60 = vmul.f32 0.5, %v3944_v35 }
 0x5d8   :  { %v3012_v25 = vmul.f32 0.70710677, %v3945_v41  ;;  %v2894_v49 = vpop.f32.mrb[100].mxu0  ;;  %v2980_v0 = vmul.f32 0.5, %v3945_v41 }
 0x5d9   :  { %4306 = verf.f32 %v3011_v8  ;;  %v3946_v7 = vadd.f32 %v2894_v49, %v6393_v38  ;;  %v2896_v11 = vpop.f32.mrb[101].mxu0 }
 0x5da   :  { %4308 = verf.f32 %v3012_v25  ;;  %v3947_v2 = vadd.f32 %v2896_v11, %v6398_v29 }
 0x5db   :  { %v3013_v59 = vmul.f32 0.70710677, %v3946_v7  ;;  %v2981_v11 = vmul.f32 0.5, %v3946_v7 }
 0x5dc   :  { %v3014_v19 = vmul.f32 0.70710677, %v3947_v2  ;;  %v2900_v6 = vpop.f32.mrb[102].mxu0  ;;  %v2982_v8 = vmul.f32 0.5, %v3947_v2 }
 0x5dd   :  { %4310 = verf.f32 %v3013_v59  ;;  %v6407_v33 = vadd.f32 %v2900_v6, %v6393_v38  ;;  %v2902_v3 = vpop.f32.mrb[103].mxu0 }
 0x5de   :  { %4312 = verf.f32 %v3014_v19  ;;  %v3949_v36 = vadd.f32 %v2902_v3, %v6398_v29 }
 0x5df   :  { %v4303_v45 = vpop.eup %4302  ;;  %v3015_v12 = vmul.f32 0.70710677, %v6407_v33 }
 0x5e0   :  { %v4305_v32 = vpop.eup %4304  ;;  %v3073_v24 = vadd.f32 1.0, %v4303_v45  ;;  %v3016_v39 = vmul.f32 0.70710677, %v3949_v36  ;;  %v2906_v55 = vpop.f32.mrb[104].mxu0 }
 0x5e1   :  { %v3074_v61 = vadd.f32 1.0, %v4305_v32  ;;  %4314 = verf.f32 %v3015_v12  ;;  %v6412_v22 = vadd.f32 %v2906_v55, %v6393_v38  ;;  %v2908_v57 = vpop.f32.mrb[105].mxu0 }
 0x5e2   :  { %4316 = verf.f32 %v3016_v39  ;;  %v6415_v20 = vadd.f32 %v2908_v57, %v6398_v29  ;;  %v3105_v34 = vmul.f32 %v3073_v24, %v2977_v56  ;;  %v2984_v39 = vmul.f32 0.5, %v3949_v36 }
 0x5e3   :  { %v4307_v23 = vpop.eup %4306  ;;  %v3106_v28 = vmul.f32 %v3074_v61, %v2978_v30  ;;  %v3017_v9 = vmul.f32 0.70710677, %v6412_v22  ;;  %v2983_v61 = vmul.f32 0.5, %v6407_v33 }
 0x5e4   :  { %v4309_v1 = vpop.eup %4308  ;;  %v3075_v46 = vadd.f32 1.0, %v4307_v23  ;;  %v3018_v51 = vmul.f32 0.70710677, %v6415_v20  ;;  %v2912_v10 = vpop.f32.mrb[106].mxu0 }
 0x5e5   :  { %v3076_v62 = vadd.f32 1.0, %v4309_v1  ;;  %4318 = verf.f32 %v3017_v9  ;;  %v6420_v21 = vadd.f32 %v2912_v10, %v6393_v38  ;;  %v2914_v15 = vpop.f32.mrb[107].mxu0  ;;  %3532 = vmatprep.mubr.msk.f32.mxu1 %vm534_vm2, %v3106_v28 }
 0x5e6   :  { %4320 = verf.f32 %v3018_v51  ;;  %v6424_v27 = vadd.f32 %v2914_v15, %v6398_v29  ;;  %3274 = vmatmul.mubr.f32.vlgmr.msra.gmra.mrb[112].mxu1 %v3105_v34  ;;  %v3107_v41 = vmul.f32 %v3075_v46, %v2979_v60  ;;  %v2986_v51 = vmul.f32 0.5, %v6415_v20 }
 0x5e7   :  { %v4311_v37 = vpop.eup %4310  ;;  %v3108_v4 = vmul.f32 %v3076_v62, %v2980_v0  ;;  %v3019_v14 = vmul.f32 0.70710677, %v6420_v21  ;;  %v2985_v62 = vmul.f32 0.5, %v6412_v22 }
 0x5e8   :  { %v4313_v50 = vpop.eup %4312  ;;  %v3077_v52 = vadd.f32 1.0, %v4311_v37  ;;  %v3020_v16 = vmul.f32 0.70710677, %v6424_v27  ;;  %v2918_v5 = vpop.f32.mrb[108].mxu0 }
 0x5e9   :  { %v3078_v25 = vadd.f32 1.0, %v4313_v50  ;;  %4322 = verf.f32 %v3019_v14  ;;  %v6429_v35 = vadd.f32 %v2918_v5, %v6393_v38  ;;  %v2920_v49 = vpop.f32.mrb[109].mxu0  ;;  %3533 = vmatprep.mubr.msk.f32.mxu1 %vm534_vm2, %v3108_v4  ;;  %v2988_v5 = vmul.f32 0.5, %v6424_v27 }
 0x5ea   :  { %4324 = verf.f32 %v3020_v16  ;;  %v6433_v59 = vadd.f32 %v2920_v49, %v6398_v29  ;;  %3279 = vmatmul.mubr.f32.gmra.mrb[114].mxu1 %v3107_v41  ;;  %v3109_v24 = vmul.f32 %v3077_v52, %v2981_v11 }
 0x5eb   :  { %v4315_v19 = vpop.eup %4314  ;;  %v3110_v6 = vmul.f32 %v3078_v25, %v2982_v8  ;;  %v3021_v3 = vmul.f32 0.70710677, %v6429_v35  ;;  %v2987_v25 = vmul.f32 0.5, %v6420_v21 }
 0x5ec   :  { %v4317_v45 = vpop.eup %4316  ;;  %v3079_v2 = vadd.f32 1.0, %v4315_v19  ;;  %v3022_v12 = vmul.f32 0.70710677, %v6433_v59  ;;  %v2924_v32 = vpop.f32.mrb[110].mxu0 }
 0x5ed   :  { %v3080_v55 = vadd.f32 1.0, %v4317_v45  ;;  %4326 = verf.f32 %v3021_v3  ;;  %v6438_v7 = vadd.f32 %v2924_v32, %v6393_v38  ;;  %v2926_v30 = vpop.f32.mrb[111].mxu0  ;;  %3534 = vmatprep.mubr.msk.f32.mxu1 %vm534_vm2, %v3110_v6  ;;  %v2990_v32 = vmul.f32 0.5, %v6433_v59 }
 0x5ee   :  { %4328 = verf.f32 %v3022_v12  ;;  %v6443_v57 = vadd.f32 %v2926_v30, %v6398_v29  ;;  %3284 = vmatmul.mubr.f32.gmra.mrb[116].mxu1 %v3109_v24  ;;  %v3111_v46 = vmul.f32 %v3079_v2, %v2983_v61 }
 0x5ef   :  { %v4319_v56 = vpop.eup %4318  ;;  %v3112_v23 = vmul.f32 %v3080_v55, %v2984_v39  ;;  %v3023_v28 = vmul.f32 0.70710677, %v6438_v7  ;;  %v2989_v55 = vmul.f32 0.5, %v6429_v35 }
 0x5f0   :  { %v4321_v36 = vpop.eup %4320  ;;  %v3081_v9 = vadd.f32 1.0, %v4319_v56  ;;  %v3024_v1 = vmul.f32 0.70710677, %v6443_v57  ;;  %v2930_v34 = vpop.f32.mrb[112].mxu0 }
 0x5f1   :  { %v3082_v10 = vadd.f32 1.0, %v4321_v36  ;;  %4330 = verf.f32 %v3023_v28  ;;  %v6449_v33 = vadd.f32 %v2930_v34, %v6393_v38  ;;  %v2932_v0 = vpop.f32.mrb[113].mxu0  ;;  %3535 = vmatprep.mubr.msk.f32.mxu1 %vm534_vm2, %v3112_v23  ;;  %v2992_v34 = vmul.f32 0.5, %v6443_v57 }
 0x5f2   :  { %4332 = verf.f32 %v3024_v1  ;;  %v6454_v15 = vadd.f32 %v2932_v0, %v6398_v29  ;;  %3289 = vmatmul.mubr.f32.gmra.mrb[118].mxu1 %v3111_v46  ;;  %v3113_v16 = vmul.f32 %v3081_v9, %v2985_v62 }
 0x5f3   :  { %v4323_v60 = vpop.eup %4322  ;;  %v3114_v37 = vmul.f32 %v3082_v10, %v2986_v51  ;;  %v3025_v4 = vmul.f32 0.70710677, %v6449_v33  ;;  %v2991_v10 = vmul.f32 0.5, %v6438_v7 }
 0x5f4   :  { %v4325_v20 = vpop.eup %4324  ;;  %v3083_v14 = vadd.f32 1.0, %v4323_v60  ;;  %v3026_v50 = vmul.f32 0.70710677, %v6454_v15  ;;  %v2936_v52 = vpop.f32.mrb[114].mxu0 }
 0x5f5   :  { %v3084_v41 = vadd.f32 1.0, %v4325_v20  ;;  %4334 = verf.f32 %v3025_v4  ;;  %v6460_v22 = vadd.f32 %v2936_v52, %v6393_v38  ;;  %v2938_v8 = vpop.f32.mrb[115].mxu0  ;;  %3536 = vmatprep.mubr.msk.f32.mxu1 %vm534_vm2, %v3114_v37  ;;  %v2994_v52 = vmul.f32 0.5, %v6454_v15 }
 0x5f6   :  { %4336 = verf.f32 %v3026_v50  ;;  %v6465_v49 = vadd.f32 %v2938_v8, %v6398_v29  ;;  %3294 = vmatmul.mubr.f32.gmra.mrb[120].mxu1 %v3113_v16  ;;  %v3115_v12 = vmul.f32 %v3083_v14, %v2987_v25 }
 0x5f7   :  { %v4327_v11 = vpop.eup %4326  ;;  %v3116_v19 = vmul.f32 %v3084_v41, %v2988_v5  ;;  %v3027_v6 = vmul.f32 0.70710677, %v6460_v22  ;;  %v2993_v41 = vmul.f32 0.5, %v6449_v33 }
 0x5f8   :  { %v4329_v27 = vpop.eup %4328  ;;  %v3085_v3 = vadd.f32 1.0, %v4327_v11  ;;  %v3028_v45 = vmul.f32 0.70710677, %v6465_v49  ;;  %v2942_v2 = vpop.f32.mrb[116].mxu0 }
 0x5f9   :  { %v3086_v24 = vadd.f32 1.0, %v4329_v27  ;;  %4338 = verf.f32 %v3027_v6  ;;  %v6471_v21 = vadd.f32 %v2942_v2, %v6393_v38  ;;  %v2944_v39 = vpop.f32.mrb[117].mxu0  ;;  %3537 = vmatprep.mubr.msk.f32.mxu1 %vm534_vm2, %v3116_v19  ;;  %v2996_v2 = vmul.f32 0.5, %v6465_v49 }
 0x5fa   :  { %4340 = verf.f32 %v3028_v45  ;;  %v6476_v30 = vadd.f32 %v2944_v39, %v6398_v29  ;;  %3299 = vmatmul.mubr.f32.gmra.mrb[122].mxu1 %v3115_v12  ;;  %v3117_v1 = vmul.f32 %v3085_v3, %v2989_v55 }
 0x5fb   :  { %v4331_v61 = vpop.eup %4330  ;;  %v3118_v56 = vmul.f32 %v3086_v24, %v2990_v32  ;;  %v3029_v23 = vmul.f32 0.70710677, %v6471_v21  ;;  %v2995_v24 = vmul.f32 0.5, %v6460_v22 }
 0x5fc   :  { %v4333_v59 = vpop.eup %4332  ;;  %v3087_v28 = vadd.f32 1.0, %v4331_v61  ;;  %v3030_v36 = vmul.f32 0.70710677, %v6476_v30  ;;  %v2948_v9 = vpop.f32.mrb[118].mxu0 }
 0x5fd   :  { %v3088_v46 = vadd.f32 1.0, %v4333_v59  ;;  %4342 = verf.f32 %v3029_v23  ;;  %v6482_v35 = vadd.f32 %v2948_v9, %v6393_v38  ;;  %v2950_v51 = vpop.f32.mrb[119].mxu0  ;;  %3538 = vmatprep.mubr.msk.f32.mxu1 %vm534_vm2, %v3118_v56  ;;  %v2998_v9 = vmul.f32 0.5, %v6476_v30 }
 0x5fe   :  { %4344 = verf.f32 %v3030_v36  ;;  %v6487_v0 = vadd.f32 %v2950_v51, %v6398_v29  ;;  %3304 = vmatmul.mubr.f32.gmra.mrb[124].mxu1 %v3117_v1  ;;  %v3119_v50 = vmul.f32 %v3087_v28, %v2991_v10 }
 0x5ff   :  { %v4335_v62 = vpop.eup %4334  ;;  %v3120_v60 = vmul.f32 %v3088_v46, %v2992_v34  ;;  %v3031_v37 = vmul.f32 0.70710677, %v6482_v35  ;;  %v2997_v46 = vmul.f32 0.5, %v6471_v21  ;;  %v2999_v21 = vmul.f32 0.5, %v6482_v35 }
 0x600   :  { %v4337_v57 = vpop.eup %4336  ;;  %v3089_v4 = vadd.f32 1.0, %v4335_v62  ;;  %v3032_v20 = vmul.f32 0.70710677, %v6487_v0  ;;  %v2954_v14 = vpop.f32.mrb[120].mxu0 }
 0x601   :  { %v3090_v16 = vadd.f32 1.0, %v4337_v57  ;;  %4346 = verf.f32 %v3031_v37  ;;  %v6493_v7 = vadd.f32 %v2954_v14, %v6393_v38  ;;  %v2956_v5 = vpop.f32.mrb[121].mxu0  ;;  %3539 = vmatprep.mubr.msk.f32.mxu1 %vm534_vm2, %v3120_v60  ;;  %v3000_v14 = vmul.f32 0.5, %v6487_v0 }
 0x602   :  { %4348 = verf.f32 %v3032_v20  ;;  %v6498_v8 = vadd.f32 %v2956_v5, %v6398_v29  ;;  %3309 = vmatmul.mubr.f32.gmra.mrb[126].mxu1 %v3119_v50  ;;  %v3121_v45 = vmul.f32 %v3089_v4, %v2993_v41 }
 0x603   :  { %v4339_v25 = vpop.eup %4338  ;;  %v3122_v11 = vmul.f32 %v3090_v16, %v2994_v52  ;;  %v3033_v19 = vmul.f32 0.70710677, %v6493_v7 }
 0x604   :  { %v4341_v15 = vpop.eup %4340  ;;  %v3091_v6 = vadd.f32 1.0, %v4339_v25  ;;  %v3034_v27 = vmul.f32 0.70710677, %v6498_v8  ;;  %v2960_v3 = vpop.f32.mrb[122].mxu0 }
 0x605   :  { %v3092_v12 = vadd.f32 1.0, %v4341_v15  ;;  %4350 = verf.f32 %v3033_v19  ;;  %v6504_v33 = vadd.f32 %v2960_v3, %v6393_v38  ;;  %v2962_v32 = vpop.f32.mrb[123].mxu0  ;;  %3540 = vmatprep.mubr.msk.f32.mxu1 %vm534_vm2, %v3122_v11 }
 0x606   :  { %4352 = verf.f32 %v3034_v27  ;;  %v3969_v39 = vadd.f32 %v2962_v32, %v6398_v29  ;;  %3314 = vmatmul.mubr.f32.gmra.mrb[128].mxu1 %v3121_v45  ;;  %v3123_v36 = vmul.f32 %v3091_v6, %v2995_v24  ;;  %v3002_v27 = vmul.f32 0.5, %v6498_v8 }
 0x607   :  { %v4343_v55 = vpop.eup %4342  ;;  %v3124_v61 = vmul.f32 %v3092_v12, %v2996_v2  ;;  %v3035_v56 = vmul.f32 0.70710677, %v6504_v33 }
 0x608   :  { %v4345_v23 = vpop.eup %4344  ;;  %v3093_v49 = vadd.f32 1.0, %v4343_v55  ;;  %v3036_v59 = vmul.f32 0.70710677, %v3969_v39  ;;  %v2966_v28 = vpop.f32.mrb[124].mxu0  ;;  %v3004_v32 = vmul.f32 0.5, %v3969_v39  ;;  %v3003_v55 = vmul.f32 0.5, %v6504_v33 }
 0x609   :  { %v3094_v1 = vadd.f32 1.0, %v4345_v23  ;;  %4354 = verf.f32 %v3035_v56  ;;  %v3970_v34 = vadd.f32 %v2966_v28, %v6393_v38  ;;  %v2968_v22 = vpop.f32.mrb[125].mxu0  ;;  %3541 = vmatprep.mubr.msk.f32.mxu1 %vm534_vm2, %v3124_v61 }
 0x60a   :  { %4356 = verf.f32 %v3036_v59  ;;  %v3971_v51 = vadd.f32 %v2968_v22, %v6398_v29  ;;  %3319 = vmatmul.mubr.f32.gmra.mrb[130].mxu1 %v3123_v36  ;;  %v3125_v20 = vmul.f32 %v3093_v49, %v2997_v46 }
 0x60b   :  { %v4347_v10 = vpop.eup %4346  ;;  %v3126_v62 = vmul.f32 %v3094_v1, %v2998_v9  ;;  %v3037_v60 = vmul.f32 0.70710677, %v3970_v34  ;;  %v3005_v28 = vmul.f32 0.5, %v3970_v34 }
 0x60c   :  { %v4349_v37 = vpop.eup %4348  ;;  %v3095_v57 = vadd.f32 1.0, %v4347_v10  ;;  %v3038_v4 = vmul.f32 0.70710677, %v3971_v51  ;;  %v2972_v30 = vpop.f32.mrb[126].mxu0 }
 0x60d   :  { %v3096_v50 = vadd.f32 1.0, %v4349_v37  ;;  %4358 = verf.f32 %v3037_v60  ;;  %v3972_v52 = vadd.f32 %v2972_v30, %v6393_v38  ;;  %v2974_v16 = vpop.f32.mrb[127].mxu0  ;;  %3542 = vmatprep.mubr.msk.f32.mxu1 %vm534_vm2, %v3126_v62  ;;  %v3001_v38 = vmul.f32 0.5, %v6493_v7 }
 0x60e   :  { %4360 = verf.f32 %v3038_v4  ;;  %v3973_v5 = vadd.f32 %v2974_v16, %v6398_v29  ;;  %3324 = vmatmul.mubr.f32.gmra.mrb[132].mxu1 %v3125_v20  ;;  %v3127_v0 = vmul.f32 %v3095_v57, %v2999_v21  ;;  %v3006_v7 = vmul.f32 0.5, %v3971_v51 }
 0x60f   :  { %v4351_v41 = vpop.eup %4350  ;;  %v3128_v25 = vmul.f32 %v3096_v50, %v3000_v14  ;;  %v3039_v11 = vmul.f32 0.70710677, %v3972_v52  ;;  %v3007_v33 = vmul.f32 0.5, %v3972_v52  ;;  %v3159_v51 = vsub.s32 6, %v4751_v58 }
 0x610   :  { %v4353_v19 = vpop.eup %4352  ;;  %v3097_v15 = vadd.f32 1.0, %v4351_v41  ;;  %v3040_v6 = vmul.f32 0.70710677, %v3973_v5  ;;  %v3008_v46 = vmul.f32 0.5, %v3973_v5 }
 0x611   :  { %v3098_v3 = vadd.f32 1.0, %v4353_v19  ;;  %4362 = verf.f32 %v3039_v11  ;;  %3543 = vmatprep.mubr.msk.f32.mxu1 %vm534_vm2, %v3128_v25  ;;  %v6530_v34 = vrot.slane %v6390_v63, %v3159_v51 }
 0x612   :  { %4364 = verf.f32 %v3040_v6  ;;  %3329 = vmatmul.mubr.f32.gmra.mrb[134].mxu1 %v3127_v0  ;;  %v3129_v12 = vmul.f32 %v3097_v15, %v3001_v38 }
 0x613   :  { %v4355_v35 = vpop.eup %4354  ;;  %v3130_v29 = vmul.f32 %v3098_v3, %v3002_v27 }
 0x614   :  { %v4357_v45 = vpop.eup %4356  ;;  %v3099_v2 = vadd.f32 1.0, %v4355_v35 }
 0x615   :  { %v3100_v24 = vadd.f32 1.0, %v4357_v45  ;;  %3544 = vmatprep.mubr.msk.f32.mxu1 %vm534_vm2, %v3130_v29 }
 0x616   :  { %3334 = vmatmul.mubr.f32.gmra.mrb[136].mxu1 %v3129_v12  ;;  %v3131_v49 = vmul.f32 %v3099_v2, %v3003_v55 }
 0x617   :  { %v4359_v8 = vpop.eup %4358  ;;  %v3132_v61 = vmul.f32 %v3100_v24, %v3004_v32 }
 0x618   :  { %v4361_v56 = vpop.eup %4360  ;;  %v3101_v23 = vadd.f32 1.0, %v4359_v8 }
 0x619   :  { %v3102_v59 = vadd.f32 1.0, %v4361_v56  ;;  %3545 = vmatprep.mubr.msk.f32.mxu1 %vm534_vm2, %v3132_v61 }
 0x61a   :  { %3339 = vmatmul.mubr.f32.gmra.mrb[138].mxu1 %v3131_v49  ;;  %v3133_v22 = vmul.f32 %v3101_v23, %v3005_v28 }
 0x61b   :  { %v4363_v36 = vpop.eup %4362  ;;  %v3134_v9 = vmul.f32 %v3102_v59, %v3006_v7 }
 0x61c   :  { %v4365_v39 = vpop.eup %4364  ;;  %v3103_v1 = vadd.f32 1.0, %v4363_v36 }
 0x61d   :  { %v3104_v10 = vadd.f32 1.0, %v4365_v39  ;;  %3546 = vmatprep.mubr.msk.f32.mxu1 %vm534_vm2, %v3134_v9 }
 0x61e   :  { %3344 = vmatmul.mubr.f32.gmra.mrb[140].mxu1 %v3133_v22  ;;  %v3135_v60 = vmul.f32 %v3103_v1, %v3007_v33 }
 0x61f   :  { %v3136_v62 = vmul.f32 %v3104_v10, %v3008_v46  ;;  %v6615_v46 = vld [vmem:[#allocation5_spill] sm:$0xff] }
 0x621   :  { %3547 = vmatprep.mubr.msk.f32.mxu1 %vm534_vm2, %v3136_v62 }
 0x622   :  { %3349 = vmatmul.mubr.f32.gmra.mrb[142].mxu1 %v3135_v60  ;;  %v6616_v60 = vld [vmem:[#allocation6_spill] sm:$0xff] }
 0x6b9   :  { %v3275_v37 = vpop.f32.mrb[112].mxu1 }
 0x6ba   :  { %v3276_v57 = vadd.f32 %v3275_v37, %v6530_v34  ;;  %v3277_v4 = vpop.f32.mrb[113].mxu1 }
 0x6bb   :  { %v6617_v4 = vld [vmem:[#allocation7_spill] sm:$0xff] }
 0x6bc   :  { %v3354_v30 = vmul.f32 %v3276_v57, %v5701_v18 }
 0x6bd   :  { %v3280_v20 = vpop.f32.mrb[114].mxu1 }
 0x6be   :  { %3370 = vst.msk [vmem:[#allocation2] sm:$0xff] %vm85_vm1, %v3354_v30  ;;  %v3281_v14 = vadd.f32 %v3280_v20, %v6530_v34  ;;  %v3282_v50 = vpop.f32.mrb[115].mxu1 }
 0x6c0   :  { %v3355_v52 = vmul.f32 %v3281_v14, %v5726_v13 }
 0x6c1   :  { %v3285_v16 = vpop.f32.mrb[116].mxu1 }
 0x6c2   :  { %3371 = vst.msk [vmem:[#allocation2 + $0x8] sm:$0xff] %vm85_vm1, %v3355_v52  ;;  %v3286_v58 = vadd.f32 %v3285_v16, %v6530_v34  ;;  %v3287_v63 = vpop.f32.mrb[117].mxu1 }
 0x6c4   :  { %v3356_v21 = vmul.f32 %v3286_v58, %v5736_v40 }
 0x6c5   :  { %v3290_v5 = vpop.f32.mrb[118].mxu1 }
 0x6c6   :  { %3372 = vst.msk [vmem:[#allocation2 + $0x10] sm:$0xff] %vm85_vm1, %v3356_v21  ;;  %v3291_v18 = vadd.f32 %v3290_v5, %v6530_v34  ;;  %v3292_v41 = vpop.f32.mrb[119].mxu1 }
 0x6c8   :  { %v3357_v25 = vmul.f32 %v3291_v18, %v5764_v31 }
 0x6c9   :  { %v3295_v11 = vpop.f32.mrb[120].mxu1 }
 0x6ca   :  { %3373 = vst.msk [vmem:[#allocation2 + $0x18] sm:$0xff] %vm85_vm1, %v3357_v25  ;;  %v3296_v13 = vadd.f32 %v3295_v11, %v6530_v34  ;;  %v3297_v19 = vpop.f32.mrb[121].mxu1 }
 0x6cc   :  { %v3358_v15 = vmul.f32 %v3296_v13, %v5783_v44 }
 0x6cd   :  { %v3300_v6 = vpop.f32.mrb[122].mxu1 }
 0x6ce   :  { %3374 = vst.msk [vmem:[#allocation2 + $0x20] sm:$0xff] %vm85_vm1, %v3358_v15  ;;  %v3301_v40 = vadd.f32 %v3300_v6, %v6530_v34  ;;  %v3302_v0 = vpop.f32.mrb[123].mxu1 }
 0x6d0   :  { %v3359_v27 = vmul.f32 %v3301_v40, %v5802_v17 }
 0x6d1   :  { %v3305_v3 = vpop.f32.mrb[124].mxu1 }
 0x6d2   :  { %3375 = vst.msk [vmem:[#allocation2 + $0x28] sm:$0xff] %vm85_vm1, %v3359_v27  ;;  %v3306_v31 = vadd.f32 %v3305_v3, %v6530_v34  ;;  %v3307_v38 = vpop.f32.mrb[125].mxu1 }
 0x6d4   :  { %v3360_v35 = vmul.f32 %v3306_v31, %v5821_v42 }
 0x6d5   :  { %v3310_v29 = vpop.f32.mrb[126].mxu1 }
 0x6d6   :  { %3376 = vst.msk [vmem:[#allocation2 + $0x30] sm:$0xff] %vm85_vm1, %v3360_v35  ;;  %v3311_v44 = vadd.f32 %v3310_v29, %v6530_v34  ;;  %v3312_v45 = vpop.f32.mrb[127].mxu1 }
 0x6d8   :  { %v3361_v2 = vmul.f32 %v3311_v44, %v5840_v53 }
 0x6d9   :  { %v3315_v12 = vpop.f32.mrb[128].mxu1 }
 0x6da   :  { %3377 = vst.msk [vmem:[#allocation2 + $0x38] sm:$0xff] %vm85_vm1, %v3361_v2  ;;  %v3316_v17 = vadd.f32 %v3315_v12, %v6530_v34  ;;  %v3317_v32 = vpop.f32.mrb[129].mxu1 }
 0x6dc   :  { %v3362_v24 = vmul.f32 %v3316_v17, %v5859_v43 }
 0x6dd   :  { %v3320_v55 = vpop.f32.mrb[130].mxu1 }
 0x6de   :  { %3378 = vst.msk [vmem:[#allocation2 + $0x40] sm:$0xff] %vm85_vm1, %v3362_v24  ;;  %v3321_v42 = vadd.f32 %v3320_v55, %v6530_v34  ;;  %v3322_v8 = vpop.f32.mrb[131].mxu1 }
 0x6e0   :  { %v3363_v61 = vmul.f32 %v3321_v42, %v5878_v54 }
 0x6e1   :  { %v3325_v56 = vpop.f32.mrb[132].mxu1 }
 0x6e2   :  { %3379 = vst.msk [vmem:[#allocation2 + $0x48] sm:$0xff] %vm85_vm1, %v3363_v61  ;;  %v3326_v53 = vadd.f32 %v3325_v56, %v6530_v34  ;;  %v3327_v23 = vpop.f32.mrb[133].mxu1 }
 0x6e4   :  { %v3364_v49 = vmul.f32 %v3326_v53, %v5891_v48 }
 0x6e5   :  { %v3330_v7 = vpop.f32.mrb[134].mxu1 }
 0x6e6   :  { %3380 = vst.msk [vmem:[#allocation2 + $0x50] sm:$0xff] %vm85_vm1, %v3364_v49  ;;  %v3331_v43 = vadd.f32 %v3330_v7, %v6530_v34  ;;  %v3332_v59 = vpop.f32.mrb[135].mxu1 }
 0x6e8   :  { %v3365_v28 = vmul.f32 %v3331_v43, %v5898_v26 }
 0x6e9   :  { %v3335_v36 = vpop.f32.mrb[136].mxu1 }
 0x6ea   :  { %3381 = vst.msk [vmem:[#allocation2 + $0x58] sm:$0xff] %vm85_vm1, %v3365_v28  ;;  %v3336_v54 = vadd.f32 %v3335_v36, %v6530_v34  ;;  %v3337_v9 = vpop.f32.mrb[137].mxu1 }
 0x6ec   :  { %v3366_v39 = vmul.f32 %v3336_v54, %v5905_v47 }
 0x6ed   :  { %v3340_v1 = vpop.f32.mrb[138].mxu1 }
 0x6ee   :  { %3382 = vst.msk [vmem:[#allocation2 + $0x60] sm:$0xff] %vm85_vm1, %v3366_v39  ;;  %v3341_v48 = vadd.f32 %v3340_v1, %v6530_v34  ;;  %v3342_v22 = vpop.f32.mrb[139].mxu1 }
 0x6f0   :  { %v3367_v10 = vmul.f32 %v3341_v48, %v6615_v46 }
 0x6f1   :  { %v3345_v33 = vpop.f32.mrb[140].mxu1 }
 0x6f2   :  { %3383 = vst.msk [vmem:[#allocation2 + $0x68] sm:$0xff] %vm85_vm1, %v3367_v10  ;;  %v3346_v26 = vadd.f32 %v3345_v33, %v6530_v34  ;;  %v3347_v62 = vpop.f32.mrb[141].mxu1 }
 0x6f4   :  { %v3368_v51 = vmul.f32 %v3346_v26, %v6616_v60 }
 0x6f5   :  { %v3350_v37 = vpop.f32.mrb[142].mxu1 }
 0x6f6   :  { %3384 = vst.msk [vmem:[#allocation2 + $0x70] sm:$0xff] %vm85_vm1, %v3368_v51  ;;  %v3351_v47 = vadd.f32 %v3350_v37, %v6530_v34  ;;  %v3352_v57 = vpop.f32.mrb[143].mxu1 }
 0x6f8   :  { %v3369_v30 = vmul.f32 %v3351_v47, %v6617_v4 }
 0x6fa   :  { %3385 = vst.msk [vmem:[#allocation2 + $0x78] sm:$0xff] %vm85_vm1, %v3369_v30 }
 0x6fb   :  { %4382 = shalt.err (!%p4379_p4)
}
 0x6fc   :  { %s4383_s5 = scalar_lea.hbm %s6602_s10, 2048 }
 0x6fd   :  { %p4384_p5 = scmp.ne.s32.totalorder %s6602_s10, %s4383_s5  ;;  %p4387_p6 = scmp.lt.u32.totalorder %s4383_s5, %s6602_s10 }
 0x6ff   :  { %p4389_p7 = pnand %p4387_p6, %p4384_p5 }
 0x701   :  { %4392 = shalt.err (!%p4389_p7)
}
 0x702   :  { %s4399_s29 = smov 128   ;;  %s4400_s30 = smov 8  }
 0x703   :  { %3397 = dma.vmem_to_hbm [thread:$0]  %s3392_s9, 2048, %s6602_s10, [#allocation3], %s4399_s29, %s4399_s29, %s4400_s30  }
 0x704   :  { %4393 = dma.done.wait [#allocation3], 2048  }
 0x705   :  { %4394 = vsyncadd [#allocation3], 4294965248 }
 0x706   :  { %3401 = vsyncpa [#allocation3], 1 }

</bundles_post_ra>
